<compile_context>
chip_gen: v5e
topology: v5e:2x2
jax: 0.10.0
libtpu: 0.0.40
codegen_flags: <defaults>
</compile_context>

<pallas_src>
import functools

import numpy as np

import jax
import jax.numpy as jnp
from jax import lax
from jax.experimental import pallas as pl
from jax.experimental.pallas import tpu as pltpu


# ----------------------------- in-kernel conv helpers ----------------------------- #

def _tap_shifts(H, W):
    """Lane-roll amounts (static python ints) for the 9 taps of a 3x3 same conv
    in (C, H*W) layout.  Tap order: dy-major, dy, dx in {-1, 0, 1}."""
    HW = H * W
    return [(-(dy * W + dx)) % HW for dy in (-1, 0, 1) for dx in (-1, 0, 1)]


def _tap_masks(H, W, C):
    """(9, C, H*W) float32 0/1 validity masks for the 9 taps (same tap order).
    Built with numpy at trace time; passed to the kernel as a small VMEM input."""
    hh, ww = np.meshgrid(np.arange(H), np.arange(W), indexing="ij")
    masks = []
    for dy in (-1, 0, 1):
        for dx in (-1, 0, 1):
            valid = ((hh + dy >= 0) & (hh + dy < H) &
                     (ww + dx >= 0) & (ww + dx < W))
            masks.append(np.broadcast_to(valid.reshape(1, H * W), (C, H * W)))
    return jnp.asarray(np.stack(masks, axis=0).astype(np.float32))


def _conv3x3_im2col(x, w2b, shifts, mask_ref, ones_row):
    """Same-padded 3x3 conv in (C, H*W) layout.

    x:    (Cin, HW) float32 activation (spatial on lanes).
    w2b:  (Cout, 9*Cin + 1) packed weights; last column is the bias.
    Tap extraction = pltpu.roll (XLU) + 0/1 mask multiply (VPU); all 9 taps plus the
    bias row collapse into a single MXU matmul with a lane-dense (Cout, HW) result.
    """
    cols = []
    for t in range(9):
        if shifts[t] == 0:                       # center tap: identity, always valid
            cols.append(x)
        else:
            cols.append(pltpu.roll(x, shift=shifts[t], axis=1) * mask_ref[t])
    cols.append(ones_row)                        # bias row
    col = jnp.concatenate(cols, axis=0)          # (9*Cin + 1, HW)
    return jnp.dot(w2b, col, preferred_element_type=jnp.float32)


# --------------------------------- Pallas kernels --------------------------------- #

def _emsr_body_kernel(x_ref, sub_ref, mask_ref, headw_ref, bodyw_ref,
                      redw_ref, redb_ref, upw_ref, o_ref,
                      *, H, W, n_stages, n_blocks, res_scale):
    """sub_mean + head + (8 ResStages x 4 ResBlocks) + 1x1 reduction + skip + up-conv,
    all on a single (C, H*W) activation kept resident in VMEM/vregs."""
    HW = H * W
    nf = redb_ref.shape[0]
    shifts = _tap_shifts(H, W)
    ones_row = jnp.ones((1, HW), jnp.float32)

    # MeanShift (sub_mean): exact — applied before the head conv's zero padding.
    x = x_ref[0] - sub_ref[...]

    # head conv (n_colors zero-padded to n_feats input channels)
    x = _conv3x3_im2col(x, headw_ref[...], shifts, mask_ref, ones_row)
    res = x

    # Body.  The 1x1 fusion/reduction conv over the 8-stage channel concat is
    # accumulated on the fly, so the 64-channel concat never exists (not in HBM,
    # not in VMEM).
    def stage_body(s, carry):
        x, red_acc = carry
        for j in range(n_blocks):
            base = (s * n_blocks + j) * 2
            z = _conv3x3_im2col(x, bodyw_ref[base], shifts, mask_ref, ones_row)
            z = jnp.maximum(z, 0.0)                                   # ReLU
            y = _conv3x3_im2col(z, bodyw_ref[base + 1], shifts, mask_ref, ones_row)
            x = y * res_scale + x                                     # ResBlock skip
        red_acc = red_acc + jnp.dot(redw_ref[s], x,
                                    preferred_element_type=jnp.float32)
        return x, red_acc

    red0 = jnp.zeros((nf, HW), jnp.float32)
    _, red_acc = lax.fori_loop(0, n_stages, stage_body, (x, red0))

    # reduction bias + global skip connection ("x += res")
    x = red_acc + redb_ref[...] + res

    # Upsampler conv: n_feats -> (scale**2)*n_feats.  PixelShuffle is a pure layout
    # shuffle done outside the kernel.
    o_ref[0] = _conv3x3_im2col(x, upw_ref[...], shifts, mask_ref,
                               ones_row).astype(o_ref.dtype)


def _tail_kernel(x_ref, mask_ref, tailw_ref, o_ref, *, H, W):
    """Final 3x3 conv at the upscaled resolution; add_mean is folded into its bias."""
    shifts = _tap_shifts(H, W)
    ones_row = jnp.ones((1, H * W), jnp.float32)
    o_ref[0] = _conv3x3_im2col(x_ref[0], tailw_ref[...], shifts, mask_ref,
                               ones_row).astype(o_ref.dtype)


# ------------------------------ weight / layout packing ---------------------------- #

def _pack_conv(w, b):
    """HWIO (kh,kw,cin,cout) weights + (cout,) bias -> (cout, kh*kw*cin + 1) matmul
    weights matching the kernel's im2col row order (tap-major, then channel), with the
    bias as the trailing column."""
    kh, kw, cin, cout = w.shape
    wm = jnp.transpose(jnp.reshape(w, (kh * kw * cin, cout)))
    return jnp.concatenate([wm, jnp.reshape(b, (cout, 1))], axis=1).astype(jnp.float32)


def _pixel_shuffle_chw(x, r, C, H, W):
    """PixelShuffle(r) on (N, C*r*r, H*W) channel-major activations (torch ordering)."""
    N = x.shape[0]
    t = jnp.reshape(x, (N, C, r, r, H, W))           # (n, c, i, j, h, w)
    t = jnp.transpose(t, (0, 1, 4, 2, 5, 3))         # (n, c, h, i, w, j)
    return jnp.reshape(t, (N, C, (H * r) * (W * r)))


# ------------------------------------- forward ------------------------------------- #

def emsr_forward(x, params, *, rgb_range=255.0, res_scale=0.1, upscale=2):
    """EMSR forward pass.  x: NHWC float32; returns NHWC upscaled output."""
    N, H, W, n_colors = x.shape
    hw = H * W
    n_stages = len(params["body"])
    n_blocks = len(params["body"][0])
    n_feats = params["head"][0].shape[-1]
    assert n_colors <= n_feats
    assert upscale == 2  # Upsampler here is one conv + PixelShuffle(2)

    rgb_mean = jnp.array([0.4488, 0.4371, 0.4040], jnp.float32)

    # ---- pack all conv weights into (Cout, 9*Cin + 1) matmul form (tiny, once) ----
    hw_w, hw_b = params["head"]
    head_w = jnp.pad(hw_w, ((0, 0), (0, 0), (0, n_feats - n_colors), (0, 0)))
    head_p = _pack_conv(head_w, hw_b)                                # (nf, 9*nf+1)

    packed = []
    for stage in params["body"]:
        for (w1, b1), (w2, b2) in stage:
            packed.append(_pack_conv(w1, b1))
            packed.append(_pack_conv(w2, b2))
    body_p = jnp.stack(packed, axis=0)                               # (64, nf, 9*nf+1)

    rw, rb = params["reduction"]                                     # (1,1,8*nf,nf), (nf,)
    red_p = jnp.transpose(jnp.reshape(rw, (n_stages, n_feats, n_feats)), (0, 2, 1))
    red_b = jnp.reshape(rb, (n_feats, 1)).astype(jnp.float32)

    up_p = _pack_conv(*params["up"])                                 # (4*nf, 9*nf+1)

    tw, tb = params["tail"]
    tail_p = _pack_conv(tw, tb + rgb_range * rgb_mean)               # add_mean folded in

    sub_c = jnp.pad(rgb_range * rgb_mean,
                    (0, n_feats - n_colors)).reshape(n_feats, 1)     # sub_mean constant

    masks_a = _tap_masks(H, W, n_feats)                              # (9, nf, H*W)
    H2, W2 = H * upscale, W * upscale
    masks_b = _tap_masks(H2, W2, n_feats)                            # (9, nf, H2*W2)

    # ---- layout: NHWC -> channels-on-sublanes / spatial-on-lanes (C, H*W) ----------
    x_chw = jnp.reshape(jnp.transpose(x, (0, 3, 1, 2)), (N, n_colors, hw))
    x_chw = jnp.pad(x_chw, ((0, 0), (0, n_feats - n_colors), (0, 0))).astype(jnp.float32)

    # ---- kernel A: sub_mean + head + whole body + reduction + skip + up-conv -------
    feat = pl.pallas_call(
        functools.partial(_emsr_body_kernel, H=H, W=W, n_stages=n_stages,
                          n_blocks=n_blocks, res_scale=res_scale),
        out_shape=jax.ShapeDtypeStruct((N, upscale * upscale * n_feats, hw),
                                       jnp.float32),
        grid=(N,),
        in_specs=[
            pl.BlockSpec((1, n_feats, hw), lambda n: (n, 0, 0)),
            pl.BlockSpec(sub_c.shape, lambda n: (0, 0)),
            pl.BlockSpec(masks_a.shape, lambda n: (0, 0, 0)),
            pl.BlockSpec(head_p.shape, lambda n: (0, 0)),
            pl.BlockSpec(body_p.shape, lambda n: (0, 0, 0)),
            pl.BlockSpec(red_p.shape, lambda n: (0, 0, 0)),
            pl.BlockSpec(red_b.shape, lambda n: (0, 0)),
            pl.BlockSpec(up_p.shape, lambda n: (0, 0)),
        ],
        out_specs=pl.BlockSpec((1, upscale * upscale * n_feats, hw),
                               lambda n: (n, 0, 0)),
        compiler_params=pltpu.CompilerParams(dimension_semantics=("parallel",)),
    )(x_chw, sub_c, masks_a, head_p, body_p, red_p, red_b, up_p)

    # ---- PixelShuffle: pure layout shuffle, stays in plain JAX ---------------------
    x_up = _pixel_shuffle_chw(feat, upscale, n_feats, H, W)          # (N, nf, H2*W2)

    # ---- kernel B: tail conv at upscaled resolution (+ folded add_mean) ------------
    out = pl.pallas_call(
        functools.partial(_tail_kernel, H=H2, W=W2),
        out_shape=jax.ShapeDtypeStruct((N, n_colors, H2 * W2), jnp.float32),
        grid=(N,),
        in_specs=[
            pl.BlockSpec((1, n_feats, H2 * W2), lambda n: (n, 0, 0)),
            pl.BlockSpec(masks_b.shape, lambda n: (0, 0, 0)),
            pl.BlockSpec(tail_p.shape, lambda n: (0, 0)),
        ],
        out_specs=pl.BlockSpec((1, n_colors, H2 * W2), lambda n: (n, 0, 0)),
        compiler_params=pltpu.CompilerParams(dimension_semantics=("parallel",)),
    )(x_up, masks_b, tail_p)

    return jnp.transpose(jnp.reshape(out, (N, n_colors, H2, W2)), (0, 2, 3, 1))


# ---------------------------------- synthetic params -------------------------------- #

def init_params(key, n_colors=3, n_feats=8, scale=2, n_stages=8, n_blocks=4):
    """Deterministic synthetic parameters matching EMSR's module shapes (HWIO)."""
    def conv_init(k, ksz, cin, cout):
        kw_, kb = jax.random.split(k)
        std = 1.0 / jnp.sqrt(float(ksz * ksz * cin))
        w = jax.random.normal(kw_, (ksz, ksz, cin, cout), jnp.float32) * std
        b = jax.random.normal(kb, (cout,), jnp.float32) * 0.01
        return w, b

    n_keys = 4 + n_stages * n_blocks * 2
    keys = iter(jax.random.split(key, n_keys))
    p = {}
    p["head"] = conv_init(next(keys), 3, n_colors, n_feats)
    body = []
    for _ in range(n_stages):
        stage = []
        for _ in range(n_blocks):
            c1 = conv_init(next(keys), 3, n_feats, n_feats)
            c2 = conv_init(next(keys), 3, n_feats, n_feats)
            stage.append((c1, c2))
        body.append(stage)
    p["body"] = body
    p["reduction"] = conv_init(next(keys), 1, n_feats * n_stages, n_feats)
    assert scale == 2, "example uses scale=2 (one conv + PixelShuffle(2) in Upsampler)"
    p["up"] = conv_init(next(keys), 3, n_feats, 4 * n_feats)
    p["tail"] = conv_init(next(keys), 3, n_feats, n_colors)
    return p


# --------------------------------------- main --------------------------------------- #

if __name__ == "__main__":
    key = jax.random.PRNGKey(0)
    pkey, xkey = jax.random.split(key)

    N, H, W = 2, 16, 16
    n_colors, n_feats, scale = 3, 8, 2
    params = init_params(pkey, n_colors=n_colors, n_feats=n_feats, scale=scale)

    # NHWC input (the PyTorch module would take the NCHW transpose of this).
    x = jax.random.uniform(xkey, (N, H, W, n_colors), jnp.float32) * 255.0

    fwd = jax.jit(functools.partial(emsr_forward, rgb_range=255.0,
                                    res_scale=0.1, upscale=scale))
    y = jax.block_until_ready(fwd(x, params))
    assert y.shape == (N, H * scale, W * scale, n_colors), y.shape
    assert bool(jnp.all(jnp.isfinite(y)))
    print("KERNEL_OK")
</pallas_src>

<mosaic_0001>
module attributes {stable_mosaic.version = 11 : i64} {
  func.func @_emsr_body_kernel(%arg0: i32, %arg1: memref<1x8x256xf32, #tpu.memory_space<vmem>>, %arg2: memref<8x1xf32, #tpu.memory_space<vmem>>, %arg3: memref<9x8x256xf32, #tpu.memory_space<vmem>>, %arg4: memref<8x73xf32, #tpu.memory_space<vmem>>, %arg5: memref<64x8x73xf32, #tpu.memory_space<vmem>>, %arg6: memref<8x8x8xf32, #tpu.memory_space<vmem>>, %arg7: memref<8x1xf32, #tpu.memory_space<vmem>>, %arg8: memref<32x73xf32, #tpu.memory_space<vmem>>, %arg9: memref<1x32x256xf32, #tpu.memory_space<vmem>>) attributes {dimension_semantics = [#tpu.dimension_semantics<parallel>], iteration_bounds = array<i64: 2>, scalar_prefetch = 0 : i64, scratch_operands = 0 : i64, tpu.core_type = #tpu.core_type<tc>, window_params = [{transform_indices = @transform_0, window_bounds = array<i64: 1, 8, 256>}, {pipeline_mode = #tpu.pipeline_mode<synchronous>, transform_indices = @transform_1, window_bounds = array<i64: 8, 1>}, {pipeline_mode = #tpu.pipeline_mode<synchronous>, transform_indices = @transform_2, window_bounds = array<i64: 9, 8, 256>}, {pipeline_mode = #tpu.pipeline_mode<synchronous>, transform_indices = @transform_3, window_bounds = array<i64: 8, 73>}, {pipeline_mode = #tpu.pipeline_mode<synchronous>, transform_indices = @transform_4, window_bounds = array<i64: 64, 8, 73>}, {pipeline_mode = #tpu.pipeline_mode<synchronous>, transform_indices = @transform_5, window_bounds = array<i64: 8, 8, 8>}, {pipeline_mode = #tpu.pipeline_mode<synchronous>, transform_indices = @transform_6, window_bounds = array<i64: 8, 1>}, {pipeline_mode = #tpu.pipeline_mode<synchronous>, transform_indices = @transform_7, window_bounds = array<i64: 32, 73>}, {transform_indices = @transform_8, window_bounds = array<i64: 1, 32, 256>}]} {
    %cst = arith.constant 1.000000e+00 : f32
    %0 = vector.broadcast %cst : f32 to vector<1x256xf32>
    %c0 = arith.constant 0 : index
    %c0_0 = arith.constant 0 : index
    %c0_1 = arith.constant 0 : index
    %1 = vector.load %arg1[%c0, %c0_0, %c0_1] : memref<1x8x256xf32, #tpu.memory_space<vmem>>, vector<1x8x256xf32>
    %2 = vector.shape_cast %1 : vector<1x8x256xf32> to vector<8x256xf32>
    %c0_2 = arith.constant 0 : index
    %c0_3 = arith.constant 0 : index
    %3 = vector.load %arg2[%c0_2, %c0_3] : memref<8x1xf32, #tpu.memory_space<vmem>>, vector<8x1xf32>
    %4 = vector.broadcast %3 : vector<8x1xf32> to vector<8x256xf32>
    %5 = arith.subf %2, %4 : vector<8x256xf32>
    %c0_4 = arith.constant 0 : index
    %c0_5 = arith.constant 0 : index
    %6 = vector.load %arg4[%c0_4, %c0_5] : memref<8x73xf32, #tpu.memory_space<vmem>>, vector<8x73xf32>
    %c17_i32 = arith.constant 17 : i32
    %7 = tpu.dynamic_rotate %5 by %c17_i32 dim 1 : vector<8x256xf32>, i32 -> vector<8x256xf32>
    %c0_6 = arith.constant 0 : index
    %c0_7 = arith.constant 0 : index
    %c0_8 = arith.constant 0 : index
    %8 = vector.load %arg3[%c0_6, %c0_7, %c0_8] : memref<9x8x256xf32, #tpu.memory_space<vmem>>, vector<1x8x256xf32>
    %9 = vector.shape_cast %8 : vector<1x8x256xf32> to vector<8x256xf32>
    %10 = arith.mulf %7, %9 : vector<8x256xf32>
    %c16_i32 = arith.constant 16 : i32
    %11 = tpu.dynamic_rotate %5 by %c16_i32 dim 1 : vector<8x256xf32>, i32 -> vector<8x256xf32>
    %c1 = arith.constant 1 : index
    %c0_9 = arith.constant 0 : index
    %c0_10 = arith.constant 0 : index
    %12 = vector.load %arg3[%c1, %c0_9, %c0_10] : memref<9x8x256xf32, #tpu.memory_space<vmem>>, vector<1x8x256xf32>
    %13 = vector.shape_cast %12 : vector<1x8x256xf32> to vector<8x256xf32>
    %14 = arith.mulf %11, %13 : vector<8x256xf32>
    %c15_i32 = arith.constant 15 : i32
    %15 = tpu.dynamic_rotate %5 by %c15_i32 dim 1 : vector<8x256xf32>, i32 -> vector<8x256xf32>
    %c2 = arith.constant 2 : index
    %c0_11 = arith.constant 0 : index
    %c0_12 = arith.constant 0 : index
    %16 = vector.load %arg3[%c2, %c0_11, %c0_12] : memref<9x8x256xf32, #tpu.memory_space<vmem>>, vector<1x8x256xf32>
    %17 = vector.shape_cast %16 : vector<1x8x256xf32> to vector<8x256xf32>
    %18 = arith.mulf %15, %17 : vector<8x256xf32>
    %c1_i32 = arith.constant 1 : i32
    %19 = tpu.dynamic_rotate %5 by %c1_i32 dim 1 : vector<8x256xf32>, i32 -> vector<8x256xf32>
    %c3 = arith.constant 3 : index
    %c0_13 = arith.constant 0 : index
    %c0_14 = arith.constant 0 : index
    %20 = vector.load %arg3[%c3, %c0_13, %c0_14] : memref<9x8x256xf32, #tpu.memory_space<vmem>>, vector<1x8x256xf32>
    %21 = vector.shape_cast %20 : vector<1x8x256xf32> to vector<8x256xf32>
    %22 = arith.mulf %19, %21 : vector<8x256xf32>
    %c255_i32 = arith.constant 255 : i32
    %23 = tpu.dynamic_rotate %5 by %c255_i32 dim 1 : vector<8x256xf32>, i32 -> vector<8x256xf32>
    %c5 = arith.constant 5 : index
    %c0_15 = arith.constant 0 : index
    %c0_16 = arith.constant 0 : index
    %24 = vector.load %arg3[%c5, %c0_15, %c0_16] : memref<9x8x256xf32, #tpu.memory_space<vmem>>, vector<1x8x256xf32>
    %25 = vector.shape_cast %24 : vector<1x8x256xf32> to vector<8x256xf32>
    %26 = arith.mulf %23, %25 : vector<8x256xf32>
    %c241_i32 = arith.constant 241 : i32
    %27 = tpu.dynamic_rotate %5 by %c241_i32 dim 1 : vector<8x256xf32>, i32 -> vector<8x256xf32>
    %c6 = arith.constant 6 : index
    %c0_17 = arith.constant 0 : index
    %c0_18 = arith.constant 0 : index
    %28 = vector.load %arg3[%c6, %c0_17, %c0_18] : memref<9x8x256xf32, #tpu.memory_space<vmem>>, vector<1x8x256xf32>
    %29 = vector.shape_cast %28 : vector<1x8x256xf32> to vector<8x256xf32>
    %30 = arith.mulf %27, %29 : vector<8x256xf32>
    %c240_i32 = arith.constant 240 : i32
    %31 = tpu.dynamic_rotate %5 by %c240_i32 dim 1 : vector<8x256xf32>, i32 -> vector<8x256xf32>
    %c7 = arith.constant 7 : index
    %c0_19 = arith.constant 0 : index
    %c0_20 = arith.constant 0 : index
    %32 = vector.load %arg3[%c7, %c0_19, %c0_20] : memref<9x8x256xf32, #tpu.memory_space<vmem>>, vector<1x8x256xf32>
    %33 = vector.shape_cast %32 : vector<1x8x256xf32> to vector<8x256xf32>
    %34 = arith.mulf %31, %33 : vector<8x256xf32>
    %c239_i32 = arith.constant 239 : i32
    %35 = tpu.dynamic_rotate %5 by %c239_i32 dim 1 : vector<8x256xf32>, i32 -> vector<8x256xf32>
    %c8 = arith.constant 8 : index
    %c0_21 = arith.constant 0 : index
    %c0_22 = arith.constant 0 : index
    %36 = vector.load %arg3[%c8, %c0_21, %c0_22] : memref<9x8x256xf32, #tpu.memory_space<vmem>>, vector<1x8x256xf32>
    %37 = vector.shape_cast %36 : vector<1x8x256xf32> to vector<8x256xf32>
    %38 = arith.mulf %35, %37 : vector<8x256xf32>
    %39 = tpu.concatenate %10, %14, %18, %22, %5, %26, %30, %34, %38, %0 in 0 : vector<8x256xf32>, vector<8x256xf32>, vector<8x256xf32>, vector<8x256xf32>, vector<8x256xf32>, vector<8x256xf32>, vector<8x256xf32>, vector<8x256xf32>, vector<8x256xf32>, vector<1x256xf32> -> vector<73x256xf32>
    %cst_23 = arith.constant dense<0.000000e+00> : vector<8x256xf32>
    %40 = tpu.matmul %6, %39, %cst_23 {dimension_numbers = #tpu.dot_dimension_numbers<[1], [0], [0], [1], [0, 0, 1, 1], [], []>} : vector<8x73xf32>, vector<73x256xf32>, vector<8x256xf32> -> vector<8x256xf32>
    %cst_24 = arith.constant 0.000000e+00 : f32
    %41 = vector.broadcast %cst_24 : f32 to vector<8x256xf32>
    %c0_i32 = arith.constant 0 : i32
    %c8_i32 = arith.constant 8 : i32
    %42 = arith.addi %c0_i32, %c8_i32 : i32
    %c1_i32_25 = arith.constant 1 : i32
    %43:2 = scf.for %arg10 = %c0_i32 to %42 step %c1_i32_25 iter_args(%arg11 = %40, %arg12 = %41) -> (vector<8x256xf32>, vector<8x256xf32>)  : i32 {
      %c4_i32 = arith.constant 4 : i32
      %86 = arith.muli %arg10, %c4_i32 : i32
      %c0_i32_67 = arith.constant 0 : i32
      %87 = arith.addi %86, %c0_i32_67 : i32
      %c2_i32 = arith.constant 2 : i32
      %88 = arith.muli %87, %c2_i32 : i32
      %89 = arith.index_cast %88 : i32 to index
      %c0_68 = arith.constant 0 : index
      %c0_69 = arith.constant 0 : index
      %90 = vector.load %arg5[%89, %c0_68, %c0_69] : memref<64x8x73xf32, #tpu.memory_space<vmem>>, vector<1x8x73xf32>
      %91 = vector.shape_cast %90 : vector<1x8x73xf32> to vector<8x73xf32>
      %c17_i32_70 = arith.constant 17 : i32
      %92 = tpu.dynamic_rotate %arg11 by %c17_i32_70 dim 1 : vector<8x256xf32>, i32 -> vector<8x256xf32>
      %c0_71 = arith.constant 0 : index
      %c0_72 = arith.constant 0 : index
      %c0_73 = arith.constant 0 : index
      %93 = vector.load %arg3[%c0_71, %c0_72, %c0_73] : memref<9x8x256xf32, #tpu.memory_space<vmem>>, vector<1x8x256xf32>
      %94 = vector.shape_cast %93 : vector<1x8x256xf32> to vector<8x256xf32>
      %95 = arith.mulf %92, %94 : vector<8x256xf32>
      %c16_i32_74 = arith.constant 16 : i32
      %96 = tpu.dynamic_rotate %arg11 by %c16_i32_74 dim 1 : vector<8x256xf32>, i32 -> vector<8x256xf32>
      %c1_75 = arith.constant 1 : index
      %c0_76 = arith.constant 0 : index
      %c0_77 = arith.constant 0 : index
      %97 = vector.load %arg3[%c1_75, %c0_76, %c0_77] : memref<9x8x256xf32, #tpu.memory_space<vmem>>, vector<1x8x256xf32>
      %98 = vector.shape_cast %97 : vector<1x8x256xf32> to vector<8x256xf32>
      %99 = arith.mulf %96, %98 : vector<8x256xf32>
      %c15_i32_78 = arith.constant 15 : i32
      %100 = tpu.dynamic_rotate %arg11 by %c15_i32_78 dim 1 : vector<8x256xf32>, i32 -> vector<8x256xf32>
      %c2_79 = arith.constant 2 : index
      %c0_80 = arith.constant 0 : index
      %c0_81 = arith.constant 0 : index
      %101 = vector.load %arg3[%c2_79, %c0_80, %c0_81] : memref<9x8x256xf32, #tpu.memory_space<vmem>>, vector<1x8x256xf32>
      %102 = vector.shape_cast %101 : vector<1x8x256xf32> to vector<8x256xf32>
      %103 = arith.mulf %100, %102 : vector<8x256xf32>
      %c1_i32_82 = arith.constant 1 : i32
      %104 = tpu.dynamic_rotate %arg11 by %c1_i32_82 dim 1 : vector<8x256xf32>, i32 -> vector<8x256xf32>
      %c3_83 = arith.constant 3 : index
      %c0_84 = arith.constant 0 : index
      %c0_85 = arith.constant 0 : index
      %105 = vector.load %arg3[%c3_83, %c0_84, %c0_85] : memref<9x8x256xf32, #tpu.memory_space<vmem>>, vector<1x8x256xf32>
      %106 = vector.shape_cast %105 : vector<1x8x256xf32> to vector<8x256xf32>
      %107 = arith.mulf %104, %106 : vector<8x256xf32>
      %c255_i32_86 = arith.constant 255 : i32
      %108 = tpu.dynamic_rotate %arg11 by %c255_i32_86 dim 1 : vector<8x256xf32>, i32 -> vector<8x256xf32>
      %c5_87 = arith.constant 5 : index
      %c0_88 = arith.constant 0 : index
      %c0_89 = arith.constant 0 : index
      %109 = vector.load %arg3[%c5_87, %c0_88, %c0_89] : memref<9x8x256xf32, #tpu.memory_space<vmem>>, vector<1x8x256xf32>
      %110 = vector.shape_cast %109 : vector<1x8x256xf32> to vector<8x256xf32>
      %111 = arith.mulf %108, %110 : vector<8x256xf32>
      %c241_i32_90 = arith.constant 241 : i32
      %112 = tpu.dynamic_rotate %arg11 by %c241_i32_90 dim 1 : vector<8x256xf32>, i32 -> vector<8x256xf32>
      %c6_91 = arith.constant 6 : index
      %c0_92 = arith.constant 0 : index
      %c0_93 = arith.constant 0 : index
      %113 = vector.load %arg3[%c6_91, %c0_92, %c0_93] : memref<9x8x256xf32, #tpu.memory_space<vmem>>, vector<1x8x256xf32>
      %114 = vector.shape_cast %113 : vector<1x8x256xf32> to vector<8x256xf32>
      %115 = arith.mulf %112, %114 : vector<8x256xf32>
      %c240_i32_94 = arith.constant 240 : i32
      %116 = tpu.dynamic_rotate %arg11 by %c240_i32_94 dim 1 : vector<8x256xf32>, i32 -> vector<8x256xf32>
      %c7_95 = arith.constant 7 : index
      %c0_96 = arith.constant 0 : index
      %c0_97 = arith.constant 0 : index
      %117 = vector.load %arg3[%c7_95, %c0_96, %c0_97] : memref<9x8x256xf32, #tpu.memory_space<vmem>>, vector<1x8x256xf32>
      %118 = vector.shape_cast %117 : vector<1x8x256xf32> to vector<8x256xf32>
      %119 = arith.mulf %116, %118 : vector<8x256xf32>
      %c239_i32_98 = arith.constant 239 : i32
      %120 = tpu.dynamic_rotate %arg11 by %c239_i32_98 dim 1 : vector<8x256xf32>, i32 -> vector<8x256xf32>
      %c8_99 = arith.constant 8 : index
      %c0_100 = arith.constant 0 : index
      %c0_101 = arith.constant 0 : index
      %121 = vector.load %arg3[%c8_99, %c0_100, %c0_101] : memref<9x8x256xf32, #tpu.memory_space<vmem>>, vector<1x8x256xf32>
      %122 = vector.shape_cast %121 : vector<1x8x256xf32> to vector<8x256xf32>
      %123 = arith.mulf %120, %122 : vector<8x256xf32>
      %124 = tpu.concatenate %95, %99, %103, %107, %arg11, %111, %115, %119, %123, %0 in 0 : vector<8x256xf32>, vector<8x256xf32>, vector<8x256xf32>, vector<8x256xf32>, vector<8x256xf32>, vector<8x256xf32>, vector<8x256xf32>, vector<8x256xf32>, vector<8x256xf32>, vector<1x256xf32> -> vector<73x256xf32>
      %cst_102 = arith.constant dense<0.000000e+00> : vector<8x256xf32>
      %125 = tpu.matmul %91, %124, %cst_102 {dimension_numbers = #tpu.dot_dimension_numbers<[1], [0], [0], [1], [0, 0, 1, 1], [], []>} : vector<8x73xf32>, vector<73x256xf32>, vector<8x256xf32> -> vector<8x256xf32>
      %cst_103 = arith.constant 0.000000e+00 : f32
      %126 = vector.broadcast %cst_103 : f32 to vector<8x256xf32>
      %127 = arith.maximumf %125, %126 : vector<8x256xf32>
      %c1_i32_104 = arith.constant 1 : i32
      %128 = arith.addi %88, %c1_i32_104 : i32
      %129 = arith.index_cast %128 : i32 to index
      %c0_105 = arith.constant 0 : index
      %c0_106 = arith.constant 0 : index
      %130 = vector.load %arg5[%129, %c0_105, %c0_106] : memref<64x8x73xf32, #tpu.memory_space<vmem>>, vector<1x8x73xf32>
      %131 = vector.shape_cast %130 : vector<1x8x73xf32> to vector<8x73xf32>
      %c17_i32_107 = arith.constant 17 : i32
      %132 = tpu.dynamic_rotate %127 by %c17_i32_107 dim 1 : vector<8x256xf32>, i32 -> vector<8x256xf32>
      %c0_108 = arith.constant 0 : index
      %c0_109 = arith.constant 0 : index
      %c0_110 = arith.constant 0 : index
      %133 = vector.load %arg3[%c0_108, %c0_109, %c0_110] : memref<9x8x256xf32, #tpu.memory_space<vmem>>, vector<1x8x256xf32>
      %134 = vector.shape_cast %133 : vector<1x8x256xf32> to vector<8x256xf32>
      %135 = arith.mulf %132, %134 : vector<8x256xf32>
      %c16_i32_111 = arith.constant 16 : i32
      %136 = tpu.dynamic_rotate %127 by %c16_i32_111 dim 1 : vector<8x256xf32>, i32 -> vector<8x256xf32>
      %c1_112 = arith.constant 1 : index
      %c0_113 = arith.constant 0 : index
      %c0_114 = arith.constant 0 : index
      %137 = vector.load %arg3[%c1_112, %c0_113, %c0_114] : memref<9x8x256xf32, #tpu.memory_space<vmem>>, vector<1x8x256xf32>
      %138 = vector.shape_cast %137 : vector<1x8x256xf32> to vector<8x256xf32>
      %139 = arith.mulf %136, %138 : vector<8x256xf32>
      %c15_i32_115 = arith.constant 15 : i32
      %140 = tpu.dynamic_rotate %127 by %c15_i32_115 dim 1 : vector<8x256xf32>, i32 -> vector<8x256xf32>
      %c2_116 = arith.constant 2 : index
      %c0_117 = arith.constant 0 : index
      %c0_118 = arith.constant 0 : index
      %141 = vector.load %arg3[%c2_116, %c0_117, %c0_118] : memref<9x8x256xf32, #tpu.memory_space<vmem>>, vector<1x8x256xf32>
      %142 = vector.shape_cast %141 : vector<1x8x256xf32> to vector<8x256xf32>
      %143 = arith.mulf %140, %142 : vector<8x256xf32>
      %c1_i32_119 = arith.constant 1 : i32
      %144 = tpu.dynamic_rotate %127 by %c1_i32_119 dim 1 : vector<8x256xf32>, i32 -> vector<8x256xf32>
      %c3_120 = arith.constant 3 : index
      %c0_121 = arith.constant 0 : index
      %c0_122 = arith.constant 0 : index
      %145 = vector.load %arg3[%c3_120, %c0_121, %c0_122] : memref<9x8x256xf32, #tpu.memory_space<vmem>>, vector<1x8x256xf32>
      %146 = vector.shape_cast %145 : vector<1x8x256xf32> to vector<8x256xf32>
      %147 = arith.mulf %144, %146 : vector<8x256xf32>
      %c255_i32_123 = arith.constant 255 : i32
      %148 = tpu.dynamic_rotate %127 by %c255_i32_123 dim 1 : vector<8x256xf32>, i32 -> vector<8x256xf32>
      %c5_124 = arith.constant 5 : index
      %c0_125 = arith.constant 0 : index
      %c0_126 = arith.constant 0 : index
      %149 = vector.load %arg3[%c5_124, %c0_125, %c0_126] : memref<9x8x256xf32, #tpu.memory_space<vmem>>, vector<1x8x256xf32>
      %150 = vector.shape_cast %149 : vector<1x8x256xf32> to vector<8x256xf32>
      %151 = arith.mulf %148, %150 : vector<8x256xf32>
      %c241_i32_127 = arith.constant 241 : i32
      %152 = tpu.dynamic_rotate %127 by %c241_i32_127 dim 1 : vector<8x256xf32>, i32 -> vector<8x256xf32>
      %c6_128 = arith.constant 6 : index
      %c0_129 = arith.constant 0 : index
      %c0_130 = arith.constant 0 : index
      %153 = vector.load %arg3[%c6_128, %c0_129, %c0_130] : memref<9x8x256xf32, #tpu.memory_space<vmem>>, vector<1x8x256xf32>
      %154 = vector.shape_cast %153 : vector<1x8x256xf32> to vector<8x256xf32>
      %155 = arith.mulf %152, %154 : vector<8x256xf32>
      %c240_i32_131 = arith.constant 240 : i32
      %156 = tpu.dynamic_rotate %127 by %c240_i32_131 dim 1 : vector<8x256xf32>, i32 -> vector<8x256xf32>
      %c7_132 = arith.constant 7 : index
      %c0_133 = arith.constant 0 : index
      %c0_134 = arith.constant 0 : index
      %157 = vector.load %arg3[%c7_132, %c0_133, %c0_134] : memref<9x8x256xf32, #tpu.memory_space<vmem>>, vector<1x8x256xf32>
      %158 = vector.shape_cast %157 : vector<1x8x256xf32> to vector<8x256xf32>
      %159 = arith.mulf %156, %158 : vector<8x256xf32>
      %c239_i32_135 = arith.constant 239 : i32
      %160 = tpu.dynamic_rotate %127 by %c239_i32_135 dim 1 : vector<8x256xf32>, i32 -> vector<8x256xf32>
      %c8_136 = arith.constant 8 : index
      %c0_137 = arith.constant 0 : index
      %c0_138 = arith.constant 0 : index
      %161 = vector.load %arg3[%c8_136, %c0_137, %c0_138] : memref<9x8x256xf32, #tpu.memory_space<vmem>>, vector<1x8x256xf32>
      %162 = vector.shape_cast %161 : vector<1x8x256xf32> to vector<8x256xf32>
      %163 = arith.mulf %160, %162 : vector<8x256xf32>
      %164 = tpu.concatenate %135, %139, %143, %147, %127, %151, %155, %159, %163, %0 in 0 : vector<8x256xf32>, vector<8x256xf32>, vector<8x256xf32>, vector<8x256xf32>, vector<8x256xf32>, vector<8x256xf32>, vector<8x256xf32>, vector<8x256xf32>, vector<8x256xf32>, vector<1x256xf32> -> vector<73x256xf32>
      %cst_139 = arith.constant dense<0.000000e+00> : vector<8x256xf32>
      %165 = tpu.matmul %131, %164, %cst_139 {dimension_numbers = #tpu.dot_dimension_numbers<[1], [0], [0], [1], [0, 0, 1, 1], [], []>} : vector<8x73xf32>, vector<73x256xf32>, vector<8x256xf32> -> vector<8x256xf32>
      %cst_140 = arith.constant 1.000000e-01 : f32
      %166 = vector.broadcast %cst_140 : f32 to vector<8x256xf32>
      %167 = arith.mulf %165, %166 : vector<8x256xf32>
      %168 = arith.addf %167, %arg11 : vector<8x256xf32>
      %c4_i32_141 = arith.constant 4 : i32
      %169 = arith.muli %arg10, %c4_i32_141 : i32
      %c1_i32_142 = arith.constant 1 : i32
      %170 = arith.addi %169, %c1_i32_142 : i32
      %c2_i32_143 = arith.constant 2 : i32
      %171 = arith.muli %170, %c2_i32_143 : i32
      %172 = arith.index_cast %171 : i32 to index
      %c0_144 = arith.constant 0 : index
      %c0_145 = arith.constant 0 : index
      %173 = vector.load %arg5[%172, %c0_144, %c0_145] : memref<64x8x73xf32, #tpu.memory_space<vmem>>, vector<1x8x73xf32>
      %174 = vector.shape_cast %173 : vector<1x8x73xf32> to vector<8x73xf32>
      %c17_i32_146 = arith.constant 17 : i32
      %175 = tpu.dynamic_rotate %168 by %c17_i32_146 dim 1 : vector<8x256xf32>, i32 -> vector<8x256xf32>
      %c0_147 = arith.constant 0 : index
      %c0_148 = arith.constant 0 : index
      %c0_149 = arith.constant 0 : index
      %176 = vector.load %arg3[%c0_147, %c0_148, %c0_149] : memref<9x8x256xf32, #tpu.memory_space<vmem>>, vector<1x8x256xf32>
      %177 = vector.shape_cast %176 : vector<1x8x256xf32> to vector<8x256xf32>
      %178 = arith.mulf %175, %177 : vector<8x256xf32>
      %c16_i32_150 = arith.constant 16 : i32
      %179 = tpu.dynamic_rotate %168 by %c16_i32_150 dim 1 : vector<8x256xf32>, i32 -> vector<8x256xf32>
      %c1_151 = arith.constant 1 : index
      %c0_152 = arith.constant 0 : index
      %c0_153 = arith.constant 0 : index
      %180 = vector.load %arg3[%c1_151, %c0_152, %c0_153] : memref<9x8x256xf32, #tpu.memory_space<vmem>>, vector<1x8x256xf32>
      %181 = vector.shape_cast %180 : vector<1x8x256xf32> to vector<8x256xf32>
      %182 = arith.mulf %179, %181 : vector<8x256xf32>
      %c15_i32_154 = arith.constant 15 : i32
      %183 = tpu.dynamic_rotate %168 by %c15_i32_154 dim 1 : vector<8x256xf32>, i32 -> vector<8x256xf32>
      %c2_155 = arith.constant 2 : index
      %c0_156 = arith.constant 0 : index
      %c0_157 = arith.constant 0 : index
      %184 = vector.load %arg3[%c2_155, %c0_156, %c0_157] : memref<9x8x256xf32, #tpu.memory_space<vmem>>, vector<1x8x256xf32>
      %185 = vector.shape_cast %184 : vector<1x8x256xf32> to vector<8x256xf32>
      %186 = arith.mulf %183, %185 : vector<8x256xf32>
      %c1_i32_158 = arith.constant 1 : i32
      %187 = tpu.dynamic_rotate %168 by %c1_i32_158 dim 1 : vector<8x256xf32>, i32 -> vector<8x256xf32>
      %c3_159 = arith.constant 3 : index
      %c0_160 = arith.constant 0 : index
      %c0_161 = arith.constant 0 : index
      %188 = vector.load %arg3[%c3_159, %c0_160, %c0_161] : memref<9x8x256xf32, #tpu.memory_space<vmem>>, vector<1x8x256xf32>
      %189 = vector.shape_cast %188 : vector<1x8x256xf32> to vector<8x256xf32>
      %190 = arith.mulf %187, %189 : vector<8x256xf32>
      %c255_i32_162 = arith.constant 255 : i32
      %191 = tpu.dynamic_rotate %168 by %c255_i32_162 dim 1 : vector<8x256xf32>, i32 -> vector<8x256xf32>
      %c5_163 = arith.constant 5 : index
      %c0_164 = arith.constant 0 : index
      %c0_165 = arith.constant 0 : index
      %192 = vector.load %arg3[%c5_163, %c0_164, %c0_165] : memref<9x8x256xf32, #tpu.memory_space<vmem>>, vector<1x8x256xf32>
      %193 = vector.shape_cast %192 : vector<1x8x256xf32> to vector<8x256xf32>
      %194 = arith.mulf %191, %193 : vector<8x256xf32>
      %c241_i32_166 = arith.constant 241 : i32
      %195 = tpu.dynamic_rotate %168 by %c241_i32_166 dim 1 : vector<8x256xf32>, i32 -> vector<8x256xf32>
      %c6_167 = arith.constant 6 : index
      %c0_168 = arith.constant 0 : index
      %c0_169 = arith.constant 0 : index
      %196 = vector.load %arg3[%c6_167, %c0_168, %c0_169] : memref<9x8x256xf32, #tpu.memory_space<vmem>>, vector<1x8x256xf32>
      %197 = vector.shape_cast %196 : vector<1x8x256xf32> to vector<8x256xf32>
      %198 = arith.mulf %195, %197 : vector<8x256xf32>
      %c240_i32_170 = arith.constant 240 : i32
      %199 = tpu.dynamic_rotate %168 by %c240_i32_170 dim 1 : vector<8x256xf32>, i32 -> vector<8x256xf32>
      %c7_171 = arith.constant 7 : index
      %c0_172 = arith.constant 0 : index
      %c0_173 = arith.constant 0 : index
      %200 = vector.load %arg3[%c7_171, %c0_172, %c0_173] : memref<9x8x256xf32, #tpu.memory_space<vmem>>, vector<1x8x256xf32>
      %201 = vector.shape_cast %200 : vector<1x8x256xf32> to vector<8x256xf32>
      %202 = arith.mulf %199, %201 : vector<8x256xf32>
      %c239_i32_174 = arith.constant 239 : i32
      %203 = tpu.dynamic_rotate %168 by %c239_i32_174 dim 1 : vector<8x256xf32>, i32 -> vector<8x256xf32>
      %c8_175 = arith.constant 8 : index
      %c0_176 = arith.constant 0 : index
      %c0_177 = arith.constant 0 : index
      %204 = vector.load %arg3[%c8_175, %c0_176, %c0_177] : memref<9x8x256xf32, #tpu.memory_space<vmem>>, vector<1x8x256xf32>
      %205 = vector.shape_cast %204 : vector<1x8x256xf32> to vector<8x256xf32>
      %206 = arith.mulf %203, %205 : vector<8x256xf32>
      %207 = tpu.concatenate %178, %182, %186, %190, %168, %194, %198, %202, %206, %0 in 0 : vector<8x256xf32>, vector<8x256xf32>, vector<8x256xf32>, vector<8x256xf32>, vector<8x256xf32>, vector<8x256xf32>, vector<8x256xf32>, vector<8x256xf32>, vector<8x256xf32>, vector<1x256xf32> -> vector<73x256xf32>
      %cst_178 = arith.constant dense<0.000000e+00> : vector<8x256xf32>
      %208 = tpu.matmul %174, %207, %cst_178 {dimension_numbers = #tpu.dot_dimension_numbers<[1], [0], [0], [1], [0, 0, 1, 1], [], []>} : vector<8x73xf32>, vector<73x256xf32>, vector<8x256xf32> -> vector<8x256xf32>
      %cst_179 = arith.constant 0.000000e+00 : f32
      %209 = vector.broadcast %cst_179 : f32 to vector<8x256xf32>
      %210 = arith.maximumf %208, %209 : vector<8x256xf32>
      %c1_i32_180 = arith.constant 1 : i32
      %211 = arith.addi %171, %c1_i32_180 : i32
      %212 = arith.index_cast %211 : i32 to index
      %c0_181 = arith.constant 0 : index
      %c0_182 = arith.constant 0 : index
      %213 = vector.load %arg5[%212, %c0_181, %c0_182] : memref<64x8x73xf32, #tpu.memory_space<vmem>>, vector<1x8x73xf32>
      %214 = vector.shape_cast %213 : vector<1x8x73xf32> to vector<8x73xf32>
      %c17_i32_183 = arith.constant 17 : i32
      %215 = tpu.dynamic_rotate %210 by %c17_i32_183 dim 1 : vector<8x256xf32>, i32 -> vector<8x256xf32>
      %c0_184 = arith.constant 0 : index
      %c0_185 = arith.constant 0 : index
      %c0_186 = arith.constant 0 : index
      %216 = vector.load %arg3[%c0_184, %c0_185, %c0_186] : memref<9x8x256xf32, #tpu.memory_space<vmem>>, vector<1x8x256xf32>
      %217 = vector.shape_cast %216 : vector<1x8x256xf32> to vector<8x256xf32>
      %218 = arith.mulf %215, %217 : vector<8x256xf32>
      %c16_i32_187 = arith.constant 16 : i32
      %219 = tpu.dynamic_rotate %210 by %c16_i32_187 dim 1 : vector<8x256xf32>, i32 -> vector<8x256xf32>
      %c1_188 = arith.constant 1 : index
      %c0_189 = arith.constant 0 : index
      %c0_190 = arith.constant 0 : index
      %220 = vector.load %arg3[%c1_188, %c0_189, %c0_190] : memref<9x8x256xf32, #tpu.memory_space<vmem>>, vector<1x8x256xf32>
      %221 = vector.shape_cast %220 : vector<1x8x256xf32> to vector<8x256xf32>
      %222 = arith.mulf %219, %221 : vector<8x256xf32>
      %c15_i32_191 = arith.constant 15 : i32
      %223 = tpu.dynamic_rotate %210 by %c15_i32_191 dim 1 : vector<8x256xf32>, i32 -> vector<8x256xf32>
      %c2_192 = arith.constant 2 : index
      %c0_193 = arith.constant 0 : index
      %c0_194 = arith.constant 0 : index
      %224 = vector.load %arg3[%c2_192, %c0_193, %c0_194] : memref<9x8x256xf32, #tpu.memory_space<vmem>>, vector<1x8x256xf32>
      %225 = vector.shape_cast %224 : vector<1x8x256xf32> to vector<8x256xf32>
      %226 = arith.mulf %223, %225 : vector<8x256xf32>
      %c1_i32_195 = arith.constant 1 : i32
      %227 = tpu.dynamic_rotate %210 by %c1_i32_195 dim 1 : vector<8x256xf32>, i32 -> vector<8x256xf32>
      %c3_196 = arith.constant 3 : index
      %c0_197 = arith.constant 0 : index
      %c0_198 = arith.constant 0 : index
      %228 = vector.load %arg3[%c3_196, %c0_197, %c0_198] : memref<9x8x256xf32, #tpu.memory_space<vmem>>, vector<1x8x256xf32>
      %229 = vector.shape_cast %228 : vector<1x8x256xf32> to vector<8x256xf32>
      %230 = arith.mulf %227, %229 : vector<8x256xf32>
      %c255_i32_199 = arith.constant 255 : i32
      %231 = tpu.dynamic_rotate %210 by %c255_i32_199 dim 1 : vector<8x256xf32>, i32 -> vector<8x256xf32>
      %c5_200 = arith.constant 5 : index
      %c0_201 = arith.constant 0 : index
      %c0_202 = arith.constant 0 : index
      %232 = vector.load %arg3[%c5_200, %c0_201, %c0_202] : memref<9x8x256xf32, #tpu.memory_space<vmem>>, vector<1x8x256xf32>
      %233 = vector.shape_cast %232 : vector<1x8x256xf32> to vector<8x256xf32>
      %234 = arith.mulf %231, %233 : vector<8x256xf32>
      %c241_i32_203 = arith.constant 241 : i32
      %235 = tpu.dynamic_rotate %210 by %c241_i32_203 dim 1 : vector<8x256xf32>, i32 -> vector<8x256xf32>
      %c6_204 = arith.constant 6 : index
      %c0_205 = arith.constant 0 : index
      %c0_206 = arith.constant 0 : index
      %236 = vector.load %arg3[%c6_204, %c0_205, %c0_206] : memref<9x8x256xf32, #tpu.memory_space<vmem>>, vector<1x8x256xf32>
      %237 = vector.shape_cast %236 : vector<1x8x256xf32> to vector<8x256xf32>
      %238 = arith.mulf %235, %237 : vector<8x256xf32>
      %c240_i32_207 = arith.constant 240 : i32
      %239 = tpu.dynamic_rotate %210 by %c240_i32_207 dim 1 : vector<8x256xf32>, i32 -> vector<8x256xf32>
      %c7_208 = arith.constant 7 : index
      %c0_209 = arith.constant 0 : index
      %c0_210 = arith.constant 0 : index
      %240 = vector.load %arg3[%c7_208, %c0_209, %c0_210] : memref<9x8x256xf32, #tpu.memory_space<vmem>>, vector<1x8x256xf32>
      %241 = vector.shape_cast %240 : vector<1x8x256xf32> to vector<8x256xf32>
      %242 = arith.mulf %239, %241 : vector<8x256xf32>
      %c239_i32_211 = arith.constant 239 : i32
      %243 = tpu.dynamic_rotate %210 by %c239_i32_211 dim 1 : vector<8x256xf32>, i32 -> vector<8x256xf32>
      %c8_212 = arith.constant 8 : index
      %c0_213 = arith.constant 0 : index
      %c0_214 = arith.constant 0 : index
      %244 = vector.load %arg3[%c8_212, %c0_213, %c0_214] : memref<9x8x256xf32, #tpu.memory_space<vmem>>, vector<1x8x256xf32>
      %245 = vector.shape_cast %244 : vector<1x8x256xf32> to vector<8x256xf32>
      %246 = arith.mulf %243, %245 : vector<8x256xf32>
      %247 = tpu.concatenate %218, %222, %226, %230, %210, %234, %238, %242, %246, %0 in 0 : vector<8x256xf32>, vector<8x256xf32>, vector<8x256xf32>, vector<8x256xf32>, vector<8x256xf32>, vector<8x256xf32>, vector<8x256xf32>, vector<8x256xf32>, vector<8x256xf32>, vector<1x256xf32> -> vector<73x256xf32>
      %cst_215 = arith.constant dense<0.000000e+00> : vector<8x256xf32>
      %248 = tpu.matmul %214, %247, %cst_215 {dimension_numbers = #tpu.dot_dimension_numbers<[1], [0], [0], [1], [0, 0, 1, 1], [], []>} : vector<8x73xf32>, vector<73x256xf32>, vector<8x256xf32> -> vector<8x256xf32>
      %cst_216 = arith.constant 1.000000e-01 : f32
      %249 = vector.broadcast %cst_216 : f32 to vector<8x256xf32>
      %250 = arith.mulf %248, %249 : vector<8x256xf32>
      %251 = arith.addf %250, %168 : vector<8x256xf32>
      %c4_i32_217 = arith.constant 4 : i32
      %252 = arith.muli %arg10, %c4_i32_217 : i32
      %c2_i32_218 = arith.constant 2 : i32
      %253 = arith.addi %252, %c2_i32_218 : i32
      %c2_i32_219 = arith.constant 2 : i32
      %254 = arith.muli %253, %c2_i32_219 : i32
      %255 = arith.index_cast %254 : i32 to index
      %c0_220 = arith.constant 0 : index
      %c0_221 = arith.constant 0 : index
      %256 = vector.load %arg5[%255, %c0_220, %c0_221] : memref<64x8x73xf32, #tpu.memory_space<vmem>>, vector<1x8x73xf32>
      %257 = vector.shape_cast %256 : vector<1x8x73xf32> to vector<8x73xf32>
      %c17_i32_222 = arith.constant 17 : i32
      %258 = tpu.dynamic_rotate %251 by %c17_i32_222 dim 1 : vector<8x256xf32>, i32 -> vector<8x256xf32>
      %c0_223 = arith.constant 0 : index
      %c0_224 = arith.constant 0 : index
      %c0_225 = arith.constant 0 : index
      %259 = vector.load %arg3[%c0_223, %c0_224, %c0_225] : memref<9x8x256xf32, #tpu.memory_space<vmem>>, vector<1x8x256xf32>
      %260 = vector.shape_cast %259 : vector<1x8x256xf32> to vector<8x256xf32>
      %261 = arith.mulf %258, %260 : vector<8x256xf32>
      %c16_i32_226 = arith.constant 16 : i32
      %262 = tpu.dynamic_rotate %251 by %c16_i32_226 dim 1 : vector<8x256xf32>, i32 -> vector<8x256xf32>
      %c1_227 = arith.constant 1 : index
      %c0_228 = arith.constant 0 : index
      %c0_229 = arith.constant 0 : index
      %263 = vector.load %arg3[%c1_227, %c0_228, %c0_229] : memref<9x8x256xf32, #tpu.memory_space<vmem>>, vector<1x8x256xf32>
      %264 = vector.shape_cast %263 : vector<1x8x256xf32> to vector<8x256xf32>
      %265 = arith.mulf %262, %264 : vector<8x256xf32>
      %c15_i32_230 = arith.constant 15 : i32
      %266 = tpu.dynamic_rotate %251 by %c15_i32_230 dim 1 : vector<8x256xf32>, i32 -> vector<8x256xf32>
      %c2_231 = arith.constant 2 : index
      %c0_232 = arith.constant 0 : index
      %c0_233 = arith.constant 0 : index
      %267 = vector.load %arg3[%c2_231, %c0_232, %c0_233] : memref<9x8x256xf32, #tpu.memory_space<vmem>>, vector<1x8x256xf32>
      %268 = vector.shape_cast %267 : vector<1x8x256xf32> to vector<8x256xf32>
      %269 = arith.mulf %266, %268 : vector<8x256xf32>
      %c1_i32_234 = arith.constant 1 : i32
      %270 = tpu.dynamic_rotate %251 by %c1_i32_234 dim 1 : vector<8x256xf32>, i32 -> vector<8x256xf32>
      %c3_235 = arith.constant 3 : index
      %c0_236 = arith.constant 0 : index
      %c0_237 = arith.constant 0 : index
      %271 = vector.load %arg3[%c3_235, %c0_236, %c0_237] : memref<9x8x256xf32, #tpu.memory_space<vmem>>, vector<1x8x256xf32>
      %272 = vector.shape_cast %271 : vector<1x8x256xf32> to vector<8x256xf32>
      %273 = arith.mulf %270, %272 : vector<8x256xf32>
      %c255_i32_238 = arith.constant 255 : i32
      %274 = tpu.dynamic_rotate %251 by %c255_i32_238 dim 1 : vector<8x256xf32>, i32 -> vector<8x256xf32>
      %c5_239 = arith.constant 5 : index
      %c0_240 = arith.constant 0 : index
      %c0_241 = arith.constant 0 : index
      %275 = vector.load %arg3[%c5_239, %c0_240, %c0_241] : memref<9x8x256xf32, #tpu.memory_space<vmem>>, vector<1x8x256xf32>
      %276 = vector.shape_cast %275 : vector<1x8x256xf32> to vector<8x256xf32>
      %277 = arith.mulf %274, %276 : vector<8x256xf32>
      %c241_i32_242 = arith.constant 241 : i32
      %278 = tpu.dynamic_rotate %251 by %c241_i32_242 dim 1 : vector<8x256xf32>, i32 -> vector<8x256xf32>
      %c6_243 = arith.constant 6 : index
      %c0_244 = arith.constant 0 : index
      %c0_245 = arith.constant 0 : index
      %279 = vector.load %arg3[%c6_243, %c0_244, %c0_245] : memref<9x8x256xf32, #tpu.memory_space<vmem>>, vector<1x8x256xf32>
      %280 = vector.shape_cast %279 : vector<1x8x256xf32> to vector<8x256xf32>
      %281 = arith.mulf %278, %280 : vector<8x256xf32>
      %c240_i32_246 = arith.constant 240 : i32
      %282 = tpu.dynamic_rotate %251 by %c240_i32_246 dim 1 : vector<8x256xf32>, i32 -> vector<8x256xf32>
      %c7_247 = arith.constant 7 : index
      %c0_248 = arith.constant 0 : index
      %c0_249 = arith.constant 0 : index
      %283 = vector.load %arg3[%c7_247, %c0_248, %c0_249] : memref<9x8x256xf32, #tpu.memory_space<vmem>>, vector<1x8x256xf32>
      %284 = vector.shape_cast %283 : vector<1x8x256xf32> to vector<8x256xf32>
      %285 = arith.mulf %282, %284 : vector<8x256xf32>
      %c239_i32_250 = arith.constant 239 : i32
      %286 = tpu.dynamic_rotate %251 by %c239_i32_250 dim 1 : vector<8x256xf32>, i32 -> vector<8x256xf32>
      %c8_251 = arith.constant 8 : index
      %c0_252 = arith.constant 0 : index
      %c0_253 = arith.constant 0 : index
      %287 = vector.load %arg3[%c8_251, %c0_252, %c0_253] : memref<9x8x256xf32, #tpu.memory_space<vmem>>, vector<1x8x256xf32>
      %288 = vector.shape_cast %287 : vector<1x8x256xf32> to vector<8x256xf32>
      %289 = arith.mulf %286, %288 : vector<8x256xf32>
      %290 = tpu.concatenate %261, %265, %269, %273, %251, %277, %281, %285, %289, %0 in 0 : vector<8x256xf32>, vector<8x256xf32>, vector<8x256xf32>, vector<8x256xf32>, vector<8x256xf32>, vector<8x256xf32>, vector<8x256xf32>, vector<8x256xf32>, vector<8x256xf32>, vector<1x256xf32> -> vector<73x256xf32>
      %cst_254 = arith.constant dense<0.000000e+00> : vector<8x256xf32>
      %291 = tpu.matmul %257, %290, %cst_254 {dimension_numbers = #tpu.dot_dimension_numbers<[1], [0], [0], [1], [0, 0, 1, 1], [], []>} : vector<8x73xf32>, vector<73x256xf32>, vector<8x256xf32> -> vector<8x256xf32>
      %cst_255 = arith.constant 0.000000e+00 : f32
      %292 = vector.broadcast %cst_255 : f32 to vector<8x256xf32>
      %293 = arith.maximumf %291, %292 : vector<8x256xf32>
      %c1_i32_256 = arith.constant 1 : i32
      %294 = arith.addi %254, %c1_i32_256 : i32
      %295 = arith.index_cast %294 : i32 to index
      %c0_257 = arith.constant 0 : index
      %c0_258 = arith.constant 0 : index
      %296 = vector.load %arg5[%295, %c0_257, %c0_258] : memref<64x8x73xf32, #tpu.memory_space<vmem>>, vector<1x8x73xf32>
      %297 = vector.shape_cast %296 : vector<1x8x73xf32> to vector<8x73xf32>
      %c17_i32_259 = arith.constant 17 : i32
      %298 = tpu.dynamic_rotate %293 by %c17_i32_259 dim 1 : vector<8x256xf32>, i32 -> vector<8x256xf32>
      %c0_260 = arith.constant 0 : index
      %c0_261 = arith.constant 0 : index
      %c0_262 = arith.constant 0 : index
      %299 = vector.load %arg3[%c0_260, %c0_261, %c0_262] : memref<9x8x256xf32, #tpu.memory_space<vmem>>, vector<1x8x256xf32>
      %300 = vector.shape_cast %299 : vector<1x8x256xf32> to vector<8x256xf32>
      %301 = arith.mulf %298, %300 : vector<8x256xf32>
      %c16_i32_263 = arith.constant 16 : i32
      %302 = tpu.dynamic_rotate %293 by %c16_i32_263 dim 1 : vector<8x256xf32>, i32 -> vector<8x256xf32>
      %c1_264 = arith.constant 1 : index
      %c0_265 = arith.constant 0 : index
      %c0_266 = arith.constant 0 : index
      %303 = vector.load %arg3[%c1_264, %c0_265, %c0_266] : memref<9x8x256xf32, #tpu.memory_space<vmem>>, vector<1x8x256xf32>
      %304 = vector.shape_cast %303 : vector<1x8x256xf32> to vector<8x256xf32>
      %305 = arith.mulf %302, %304 : vector<8x256xf32>
      %c15_i32_267 = arith.constant 15 : i32
      %306 = tpu.dynamic_rotate %293 by %c15_i32_267 dim 1 : vector<8x256xf32>, i32 -> vector<8x256xf32>
      %c2_268 = arith.constant 2 : index
      %c0_269 = arith.constant 0 : index
      %c0_270 = arith.constant 0 : index
      %307 = vector.load %arg3[%c2_268, %c0_269, %c0_270] : memref<9x8x256xf32, #tpu.memory_space<vmem>>, vector<1x8x256xf32>
      %308 = vector.shape_cast %307 : vector<1x8x256xf32> to vector<8x256xf32>
      %309 = arith.mulf %306, %308 : vector<8x256xf32>
      %c1_i32_271 = arith.constant 1 : i32
      %310 = tpu.dynamic_rotate %293 by %c1_i32_271 dim 1 : vector<8x256xf32>, i32 -> vector<8x256xf32>
      %c3_272 = arith.constant 3 : index
      %c0_273 = arith.constant 0 : index
      %c0_274 = arith.constant 0 : index
      %311 = vector.load %arg3[%c3_272, %c0_273, %c0_274] : memref<9x8x256xf32, #tpu.memory_space<vmem>>, vector<1x8x256xf32>
      %312 = vector.shape_cast %311 : vector<1x8x256xf32> to vector<8x256xf32>
      %313 = arith.mulf %310, %312 : vector<8x256xf32>
      %c255_i32_275 = arith.constant 255 : i32
      %314 = tpu.dynamic_rotate %293 by %c255_i32_275 dim 1 : vector<8x256xf32>, i32 -> vector<8x256xf32>
      %c5_276 = arith.constant 5 : index
      %c0_277 = arith.constant 0 : index
      %c0_278 = arith.constant 0 : index
      %315 = vector.load %arg3[%c5_276, %c0_277, %c0_278] : memref<9x8x256xf32, #tpu.memory_space<vmem>>, vector<1x8x256xf32>
      %316 = vector.shape_cast %315 : vector<1x8x256xf32> to vector<8x256xf32>
      %317 = arith.mulf %314, %316 : vector<8x256xf32>
      %c241_i32_279 = arith.constant 241 : i32
      %318 = tpu.dynamic_rotate %293 by %c241_i32_279 dim 1 : vector<8x256xf32>, i32 -> vector<8x256xf32>
      %c6_280 = arith.constant 6 : index
      %c0_281 = arith.constant 0 : index
      %c0_282 = arith.constant 0 : index
      %319 = vector.load %arg3[%c6_280, %c0_281, %c0_282] : memref<9x8x256xf32, #tpu.memory_space<vmem>>, vector<1x8x256xf32>
      %320 = vector.shape_cast %319 : vector<1x8x256xf32> to vector<8x256xf32>
      %321 = arith.mulf %318, %320 : vector<8x256xf32>
      %c240_i32_283 = arith.constant 240 : i32
      %322 = tpu.dynamic_rotate %293 by %c240_i32_283 dim 1 : vector<8x256xf32>, i32 -> vector<8x256xf32>
      %c7_284 = arith.constant 7 : index
      %c0_285 = arith.constant 0 : index
      %c0_286 = arith.constant 0 : index
      %323 = vector.load %arg3[%c7_284, %c0_285, %c0_286] : memref<9x8x256xf32, #tpu.memory_space<vmem>>, vector<1x8x256xf32>
      %324 = vector.shape_cast %323 : vector<1x8x256xf32> to vector<8x256xf32>
      %325 = arith.mulf %322, %324 : vector<8x256xf32>
      %c239_i32_287 = arith.constant 239 : i32
      %326 = tpu.dynamic_rotate %293 by %c239_i32_287 dim 1 : vector<8x256xf32>, i32 -> vector<8x256xf32>
      %c8_288 = arith.constant 8 : index
      %c0_289 = arith.constant 0 : index
      %c0_290 = arith.constant 0 : index
      %327 = vector.load %arg3[%c8_288, %c0_289, %c0_290] : memref<9x8x256xf32, #tpu.memory_space<vmem>>, vector<1x8x256xf32>
      %328 = vector.shape_cast %327 : vector<1x8x256xf32> to vector<8x256xf32>
      %329 = arith.mulf %326, %328 : vector<8x256xf32>
      %330 = tpu.concatenate %301, %305, %309, %313, %293, %317, %321, %325, %329, %0 in 0 : vector<8x256xf32>, vector<8x256xf32>, vector<8x256xf32>, vector<8x256xf32>, vector<8x256xf32>, vector<8x256xf32>, vector<8x256xf32>, vector<8x256xf32>, vector<8x256xf32>, vector<1x256xf32> -> vector<73x256xf32>
      %cst_291 = arith.constant dense<0.000000e+00> : vector<8x256xf32>
      %331 = tpu.matmul %297, %330, %cst_291 {dimension_numbers = #tpu.dot_dimension_numbers<[1], [0], [0], [1], [0, 0, 1, 1], [], []>} : vector<8x73xf32>, vector<73x256xf32>, vector<8x256xf32> -> vector<8x256xf32>
      %cst_292 = arith.constant 1.000000e-01 : f32
      %332 = vector.broadcast %cst_292 : f32 to vector<8x256xf32>
      %333 = arith.mulf %331, %332 : vector<8x256xf32>
      %334 = arith.addf %333, %251 : vector<8x256xf32>
      %c4_i32_293 = arith.constant 4 : i32
      %335 = arith.muli %arg10, %c4_i32_293 : i32
      %c3_i32 = arith.constant 3 : i32
      %336 = arith.addi %335, %c3_i32 : i32
      %c2_i32_294 = arith.constant 2 : i32
      %337 = arith.muli %336, %c2_i32_294 : i32
      %338 = arith.index_cast %337 : i32 to index
      %c0_295 = arith.constant 0 : index
      %c0_296 = arith.constant 0 : index
      %339 = vector.load %arg5[%338, %c0_295, %c0_296] : memref<64x8x73xf32, #tpu.memory_space<vmem>>, vector<1x8x73xf32>
      %340 = vector.shape_cast %339 : vector<1x8x73xf32> to vector<8x73xf32>
      %c17_i32_297 = arith.constant 17 : i32
      %341 = tpu.dynamic_rotate %334 by %c17_i32_297 dim 1 : vector<8x256xf32>, i32 -> vector<8x256xf32>
      %c0_298 = arith.constant 0 : index
      %c0_299 = arith.constant 0 : index
      %c0_300 = arith.constant 0 : index
      %342 = vector.load %arg3[%c0_298, %c0_299, %c0_300] : memref<9x8x256xf32, #tpu.memory_space<vmem>>, vector<1x8x256xf32>
      %343 = vector.shape_cast %342 : vector<1x8x256xf32> to vector<8x256xf32>
      %344 = arith.mulf %341, %343 : vector<8x256xf32>
      %c16_i32_301 = arith.constant 16 : i32
      %345 = tpu.dynamic_rotate %334 by %c16_i32_301 dim 1 : vector<8x256xf32>, i32 -> vector<8x256xf32>
      %c1_302 = arith.constant 1 : index
      %c0_303 = arith.constant 0 : index
      %c0_304 = arith.constant 0 : index
      %346 = vector.load %arg3[%c1_302, %c0_303, %c0_304] : memref<9x8x256xf32, #tpu.memory_space<vmem>>, vector<1x8x256xf32>
      %347 = vector.shape_cast %346 : vector<1x8x256xf32> to vector<8x256xf32>
      %348 = arith.mulf %345, %347 : vector<8x256xf32>
      %c15_i32_305 = arith.constant 15 : i32
      %349 = tpu.dynamic_rotate %334 by %c15_i32_305 dim 1 : vector<8x256xf32>, i32 -> vector<8x256xf32>
      %c2_306 = arith.constant 2 : index
      %c0_307 = arith.constant 0 : index
      %c0_308 = arith.constant 0 : index
      %350 = vector.load %arg3[%c2_306, %c0_307, %c0_308] : memref<9x8x256xf32, #tpu.memory_space<vmem>>, vector<1x8x256xf32>
      %351 = vector.shape_cast %350 : vector<1x8x256xf32> to vector<8x256xf32>
      %352 = arith.mulf %349, %351 : vector<8x256xf32>
      %c1_i32_309 = arith.constant 1 : i32
      %353 = tpu.dynamic_rotate %334 by %c1_i32_309 dim 1 : vector<8x256xf32>, i32 -> vector<8x256xf32>
      %c3_310 = arith.constant 3 : index
      %c0_311 = arith.constant 0 : index
      %c0_312 = arith.constant 0 : index
      %354 = vector.load %arg3[%c3_310, %c0_311, %c0_312] : memref<9x8x256xf32, #tpu.memory_space<vmem>>, vector<1x8x256xf32>
      %355 = vector.shape_cast %354 : vector<1x8x256xf32> to vector<8x256xf32>
      %356 = arith.mulf %353, %355 : vector<8x256xf32>
      %c255_i32_313 = arith.constant 255 : i32
      %357 = tpu.dynamic_rotate %334 by %c255_i32_313 dim 1 : vector<8x256xf32>, i32 -> vector<8x256xf32>
      %c5_314 = arith.constant 5 : index
      %c0_315 = arith.constant 0 : index
      %c0_316 = arith.constant 0 : index
      %358 = vector.load %arg3[%c5_314, %c0_315, %c0_316] : memref<9x8x256xf32, #tpu.memory_space<vmem>>, vector<1x8x256xf32>
      %359 = vector.shape_cast %358 : vector<1x8x256xf32> to vector<8x256xf32>
      %360 = arith.mulf %357, %359 : vector<8x256xf32>
      %c241_i32_317 = arith.constant 241 : i32
      %361 = tpu.dynamic_rotate %334 by %c241_i32_317 dim 1 : vector<8x256xf32>, i32 -> vector<8x256xf32>
      %c6_318 = arith.constant 6 : index
      %c0_319 = arith.constant 0 : index
      %c0_320 = arith.constant 0 : index
      %362 = vector.load %arg3[%c6_318, %c0_319, %c0_320] : memref<9x8x256xf32, #tpu.memory_space<vmem>>, vector<1x8x256xf32>
      %363 = vector.shape_cast %362 : vector<1x8x256xf32> to vector<8x256xf32>
      %364 = arith.mulf %361, %363 : vector<8x256xf32>
      %c240_i32_321 = arith.constant 240 : i32
      %365 = tpu.dynamic_rotate %334 by %c240_i32_321 dim 1 : vector<8x256xf32>, i32 -> vector<8x256xf32>
      %c7_322 = arith.constant 7 : index
      %c0_323 = arith.constant 0 : index
      %c0_324 = arith.constant 0 : index
      %366 = vector.load %arg3[%c7_322, %c0_323, %c0_324] : memref<9x8x256xf32, #tpu.memory_space<vmem>>, vector<1x8x256xf32>
      %367 = vector.shape_cast %366 : vector<1x8x256xf32> to vector<8x256xf32>
      %368 = arith.mulf %365, %367 : vector<8x256xf32>
      %c239_i32_325 = arith.constant 239 : i32
      %369 = tpu.dynamic_rotate %334 by %c239_i32_325 dim 1 : vector<8x256xf32>, i32 -> vector<8x256xf32>
      %c8_326 = arith.constant 8 : index
      %c0_327 = arith.constant 0 : index
      %c0_328 = arith.constant 0 : index
      %370 = vector.load %arg3[%c8_326, %c0_327, %c0_328] : memref<9x8x256xf32, #tpu.memory_space<vmem>>, vector<1x8x256xf32>
      %371 = vector.shape_cast %370 : vector<1x8x256xf32> to vector<8x256xf32>
      %372 = arith.mulf %369, %371 : vector<8x256xf32>
      %373 = tpu.concatenate %344, %348, %352, %356, %334, %360, %364, %368, %372, %0 in 0 : vector<8x256xf32>, vector<8x256xf32>, vector<8x256xf32>, vector<8x256xf32>, vector<8x256xf32>, vector<8x256xf32>, vector<8x256xf32>, vector<8x256xf32>, vector<8x256xf32>, vector<1x256xf32> -> vector<73x256xf32>
      %cst_329 = arith.constant dense<0.000000e+00> : vector<8x256xf32>
      %374 = tpu.matmul %340, %373, %cst_329 {dimension_numbers = #tpu.dot_dimension_numbers<[1], [0], [0], [1], [0, 0, 1, 1], [], []>} : vector<8x73xf32>, vector<73x256xf32>, vector<8x256xf32> -> vector<8x256xf32>
      %cst_330 = arith.constant 0.000000e+00 : f32
      %375 = vector.broadcast %cst_330 : f32 to vector<8x256xf32>
      %376 = arith.maximumf %374, %375 : vector<8x256xf32>
      %c1_i32_331 = arith.constant 1 : i32
      %377 = arith.addi %337, %c1_i32_331 : i32
      %378 = arith.index_cast %377 : i32 to index
      %c0_332 = arith.constant 0 : index
      %c0_333 = arith.constant 0 : index
      %379 = vector.load %arg5[%378, %c0_332, %c0_333] : memref<64x8x73xf32, #tpu.memory_space<vmem>>, vector<1x8x73xf32>
      %380 = vector.shape_cast %379 : vector<1x8x73xf32> to vector<8x73xf32>
      %c17_i32_334 = arith.constant 17 : i32
      %381 = tpu.dynamic_rotate %376 by %c17_i32_334 dim 1 : vector<8x256xf32>, i32 -> vector<8x256xf32>
      %c0_335 = arith.constant 0 : index
      %c0_336 = arith.constant 0 : index
      %c0_337 = arith.constant 0 : index
      %382 = vector.load %arg3[%c0_335, %c0_336, %c0_337] : memref<9x8x256xf32, #tpu.memory_space<vmem>>, vector<1x8x256xf32>
      %383 = vector.shape_cast %382 : vector<1x8x256xf32> to vector<8x256xf32>
      %384 = arith.mulf %381, %383 : vector<8x256xf32>
      %c16_i32_338 = arith.constant 16 : i32
      %385 = tpu.dynamic_rotate %376 by %c16_i32_338 dim 1 : vector<8x256xf32>, i32 -> vector<8x256xf32>
      %c1_339 = arith.constant 1 : index
      %c0_340 = arith.constant 0 : index
      %c0_341 = arith.constant 0 : index
      %386 = vector.load %arg3[%c1_339, %c0_340, %c0_341] : memref<9x8x256xf32, #tpu.memory_space<vmem>>, vector<1x8x256xf32>
      %387 = vector.shape_cast %386 : vector<1x8x256xf32> to vector<8x256xf32>
      %388 = arith.mulf %385, %387 : vector<8x256xf32>
      %c15_i32_342 = arith.constant 15 : i32
      %389 = tpu.dynamic_rotate %376 by %c15_i32_342 dim 1 : vector<8x256xf32>, i32 -> vector<8x256xf32>
      %c2_343 = arith.constant 2 : index
      %c0_344 = arith.constant 0 : index
      %c0_345 = arith.constant 0 : index
      %390 = vector.load %arg3[%c2_343, %c0_344, %c0_345] : memref<9x8x256xf32, #tpu.memory_space<vmem>>, vector<1x8x256xf32>
      %391 = vector.shape_cast %390 : vector<1x8x256xf32> to vector<8x256xf32>
      %392 = arith.mulf %389, %391 : vector<8x256xf32>
      %c1_i32_346 = arith.constant 1 : i32
      %393 = tpu.dynamic_rotate %376 by %c1_i32_346 dim 1 : vector<8x256xf32>, i32 -> vector<8x256xf32>
      %c3_347 = arith.constant 3 : index
      %c0_348 = arith.constant 0 : index
      %c0_349 = arith.constant 0 : index
      %394 = vector.load %arg3[%c3_347, %c0_348, %c0_349] : memref<9x8x256xf32, #tpu.memory_space<vmem>>, vector<1x8x256xf32>
      %395 = vector.shape_cast %394 : vector<1x8x256xf32> to vector<8x256xf32>
      %396 = arith.mulf %393, %395 : vector<8x256xf32>
      %c255_i32_350 = arith.constant 255 : i32
      %397 = tpu.dynamic_rotate %376 by %c255_i32_350 dim 1 : vector<8x256xf32>, i32 -> vector<8x256xf32>
      %c5_351 = arith.constant 5 : index
      %c0_352 = arith.constant 0 : index
      %c0_353 = arith.constant 0 : index
      %398 = vector.load %arg3[%c5_351, %c0_352, %c0_353] : memref<9x8x256xf32, #tpu.memory_space<vmem>>, vector<1x8x256xf32>
      %399 = vector.shape_cast %398 : vector<1x8x256xf32> to vector<8x256xf32>
      %400 = arith.mulf %397, %399 : vector<8x256xf32>
      %c241_i32_354 = arith.constant 241 : i32
      %401 = tpu.dynamic_rotate %376 by %c241_i32_354 dim 1 : vector<8x256xf32>, i32 -> vector<8x256xf32>
      %c6_355 = arith.constant 6 : index
      %c0_356 = arith.constant 0 : index
      %c0_357 = arith.constant 0 : index
      %402 = vector.load %arg3[%c6_355, %c0_356, %c0_357] : memref<9x8x256xf32, #tpu.memory_space<vmem>>, vector<1x8x256xf32>
      %403 = vector.shape_cast %402 : vector<1x8x256xf32> to vector<8x256xf32>
      %404 = arith.mulf %401, %403 : vector<8x256xf32>
      %c240_i32_358 = arith.constant 240 : i32
      %405 = tpu.dynamic_rotate %376 by %c240_i32_358 dim 1 : vector<8x256xf32>, i32 -> vector<8x256xf32>
      %c7_359 = arith.constant 7 : index
      %c0_360 = arith.constant 0 : index
      %c0_361 = arith.constant 0 : index
      %406 = vector.load %arg3[%c7_359, %c0_360, %c0_361] : memref<9x8x256xf32, #tpu.memory_space<vmem>>, vector<1x8x256xf32>
      %407 = vector.shape_cast %406 : vector<1x8x256xf32> to vector<8x256xf32>
      %408 = arith.mulf %405, %407 : vector<8x256xf32>
      %c239_i32_362 = arith.constant 239 : i32
      %409 = tpu.dynamic_rotate %376 by %c239_i32_362 dim 1 : vector<8x256xf32>, i32 -> vector<8x256xf32>
      %c8_363 = arith.constant 8 : index
      %c0_364 = arith.constant 0 : index
      %c0_365 = arith.constant 0 : index
      %410 = vector.load %arg3[%c8_363, %c0_364, %c0_365] : memref<9x8x256xf32, #tpu.memory_space<vmem>>, vector<1x8x256xf32>
      %411 = vector.shape_cast %410 : vector<1x8x256xf32> to vector<8x256xf32>
      %412 = arith.mulf %409, %411 : vector<8x256xf32>
      %413 = tpu.concatenate %384, %388, %392, %396, %376, %400, %404, %408, %412, %0 in 0 : vector<8x256xf32>, vector<8x256xf32>, vector<8x256xf32>, vector<8x256xf32>, vector<8x256xf32>, vector<8x256xf32>, vector<8x256xf32>, vector<8x256xf32>, vector<8x256xf32>, vector<1x256xf32> -> vector<73x256xf32>
      %cst_366 = arith.constant dense<0.000000e+00> : vector<8x256xf32>
      %414 = tpu.matmul %380, %413, %cst_366 {dimension_numbers = #tpu.dot_dimension_numbers<[1], [0], [0], [1], [0, 0, 1, 1], [], []>} : vector<8x73xf32>, vector<73x256xf32>, vector<8x256xf32> -> vector<8x256xf32>
      %cst_367 = arith.constant 1.000000e-01 : f32
      %415 = vector.broadcast %cst_367 : f32 to vector<8x256xf32>
      %416 = arith.mulf %414, %415 : vector<8x256xf32>
      %417 = arith.addf %416, %334 : vector<8x256xf32>
      %418 = arith.index_cast %arg10 : i32 to index
      %c0_368 = arith.constant 0 : index
      %c0_369 = arith.constant 0 : index
      %419 = vector.load %arg6[%418, %c0_368, %c0_369] : memref<8x8x8xf32, #tpu.memory_space<vmem>>, vector<1x8x8xf32>
      %420 = vector.shape_cast %419 : vector<1x8x8xf32> to vector<8x8xf32>
      %cst_370 = arith.constant dense<0.000000e+00> : vector<8x256xf32>
      %421 = tpu.matmul %420, %417, %cst_370 {dimension_numbers = #tpu.dot_dimension_numbers<[1], [0], [0], [1], [0, 0, 1, 1], [], []>} : vector<8x8xf32>, vector<8x256xf32>, vector<8x256xf32> -> vector<8x256xf32>
      %422 = arith.addf %arg12, %421 : vector<8x256xf32>
      scf.yield %417, %422 : vector<8x256xf32>, vector<8x256xf32>
    }
    %c8_i32_26 = arith.constant 8 : i32
    %c0_27 = arith.constant 0 : index
    %c0_28 = arith.constant 0 : index
    %44 = vector.load %arg7[%c0_27, %c0_28] : memref<8x1xf32, #tpu.memory_space<vmem>>, vector<8x1xf32>
    %45 = vector.broadcast %44 : vector<8x1xf32> to vector<8x256xf32>
    %46 = arith.addf %43#1, %45 : vector<8x256xf32>
    %47 = arith.addf %46, %40 : vector<8x256xf32>
    %c0_29 = arith.constant 0 : index
    %c0_30 = arith.constant 0 : index
    %48 = vector.load %arg8[%c0_29, %c0_30] : memref<32x73xf32, #tpu.memory_space<vmem>>, vector<32x73xf32>
    %c17_i32_31 = arith.constant 17 : i32
    %49 = tpu.dynamic_rotate %47 by %c17_i32_31 dim 1 : vector<8x256xf32>, i32 -> vector<8x256xf32>
    %c0_32 = arith.constant 0 : index
    %c0_33 = arith.constant 0 : index
    %c0_34 = arith.constant 0 : index
    %50 = vector.load %arg3[%c0_32, %c0_33, %c0_34] : memref<9x8x256xf32, #tpu.memory_space<vmem>>, vector<1x8x256xf32>
    %51 = vector.shape_cast %50 : vector<1x8x256xf32> to vector<8x256xf32>
    %52 = arith.mulf %49, %51 : vector<8x256xf32>
    %c16_i32_35 = arith.constant 16 : i32
    %53 = tpu.dynamic_rotate %47 by %c16_i32_35 dim 1 : vector<8x256xf32>, i32 -> vector<8x256xf32>
    %c1_36 = arith.constant 1 : index
    %c0_37 = arith.constant 0 : index
    %c0_38 = arith.constant 0 : index
    %54 = vector.load %arg3[%c1_36, %c0_37, %c0_38] : memref<9x8x256xf32, #tpu.memory_space<vmem>>, vector<1x8x256xf32>
    %55 = vector.shape_cast %54 : vector<1x8x256xf32> to vector<8x256xf32>
    %56 = arith.mulf %53, %55 : vector<8x256xf32>
    %c15_i32_39 = arith.constant 15 : i32
    %57 = tpu.dynamic_rotate %47 by %c15_i32_39 dim 1 : vector<8x256xf32>, i32 -> vector<8x256xf32>
    %c2_40 = arith.constant 2 : index
    %c0_41 = arith.constant 0 : index
    %c0_42 = arith.constant 0 : index
    %58 = vector.load %arg3[%c2_40, %c0_41, %c0_42] : memref<9x8x256xf32, #tpu.memory_space<vmem>>, vector<1x8x256xf32>
    %59 = vector.shape_cast %58 : vector<1x8x256xf32> to vector<8x256xf32>
    %60 = arith.mulf %57, %59 : vector<8x256xf32>
    %c1_i32_43 = arith.constant 1 : i32
    %61 = tpu.dynamic_rotate %47 by %c1_i32_43 dim 1 : vector<8x256xf32>, i32 -> vector<8x256xf32>
    %c3_44 = arith.constant 3 : index
    %c0_45 = arith.constant 0 : index
    %c0_46 = arith.constant 0 : index
    %62 = vector.load %arg3[%c3_44, %c0_45, %c0_46] : memref<9x8x256xf32, #tpu.memory_space<vmem>>, vector<1x8x256xf32>
    %63 = vector.shape_cast %62 : vector<1x8x256xf32> to vector<8x256xf32>
    %64 = arith.mulf %61, %63 : vector<8x256xf32>
    %c255_i32_47 = arith.constant 255 : i32
    %65 = tpu.dynamic_rotate %47 by %c255_i32_47 dim 1 : vector<8x256xf32>, i32 -> vector<8x256xf32>
    %c5_48 = arith.constant 5 : index
    %c0_49 = arith.constant 0 : index
    %c0_50 = arith.constant 0 : index
    %66 = vector.load %arg3[%c5_48, %c0_49, %c0_50] : memref<9x8x256xf32, #tpu.memory_space<vmem>>, vector<1x8x256xf32>
    %67 = vector.shape_cast %66 : vector<1x8x256xf32> to vector<8x256xf32>
    %68 = arith.mulf %65, %67 : vector<8x256xf32>
    %c241_i32_51 = arith.constant 241 : i32
    %69 = tpu.dynamic_rotate %47 by %c241_i32_51 dim 1 : vector<8x256xf32>, i32 -> vector<8x256xf32>
    %c6_52 = arith.constant 6 : index
    %c0_53 = arith.constant 0 : index
    %c0_54 = arith.constant 0 : index
    %70 = vector.load %arg3[%c6_52, %c0_53, %c0_54] : memref<9x8x256xf32, #tpu.memory_space<vmem>>, vector<1x8x256xf32>
    %71 = vector.shape_cast %70 : vector<1x8x256xf32> to vector<8x256xf32>
    %72 = arith.mulf %69, %71 : vector<8x256xf32>
    %c240_i32_55 = arith.constant 240 : i32
    %73 = tpu.dynamic_rotate %47 by %c240_i32_55 dim 1 : vector<8x256xf32>, i32 -> vector<8x256xf32>
    %c7_56 = arith.constant 7 : index
    %c0_57 = arith.constant 0 : index
    %c0_58 = arith.constant 0 : index
    %74 = vector.load %arg3[%c7_56, %c0_57, %c0_58] : memref<9x8x256xf32, #tpu.memory_space<vmem>>, vector<1x8x256xf32>
    %75 = vector.shape_cast %74 : vector<1x8x256xf32> to vector<8x256xf32>
    %76 = arith.mulf %73, %75 : vector<8x256xf32>
    %c239_i32_59 = arith.constant 239 : i32
    %77 = tpu.dynamic_rotate %47 by %c239_i32_59 dim 1 : vector<8x256xf32>, i32 -> vector<8x256xf32>
    %c8_60 = arith.constant 8 : index
    %c0_61 = arith.constant 0 : index
    %c0_62 = arith.constant 0 : index
    %78 = vector.load %arg3[%c8_60, %c0_61, %c0_62] : memref<9x8x256xf32, #tpu.memory_space<vmem>>, vector<1x8x256xf32>
    %79 = vector.shape_cast %78 : vector<1x8x256xf32> to vector<8x256xf32>
    %80 = arith.mulf %77, %79 : vector<8x256xf32>
    %81 = tpu.concatenate %52, %56, %60, %64, %47, %68, %72, %76, %80, %0 in 0 : vector<8x256xf32>, vector<8x256xf32>, vector<8x256xf32>, vector<8x256xf32>, vector<8x256xf32>, vector<8x256xf32>, vector<8x256xf32>, vector<8x256xf32>, vector<8x256xf32>, vector<1x256xf32> -> vector<73x256xf32>
    %cst_63 = arith.constant dense<0.000000e+00> : vector<32x256xf32>
    %82 = tpu.matmul %48, %81, %cst_63 {dimension_numbers = #tpu.dot_dimension_numbers<[1], [0], [0], [1], [0, 0, 1, 1], [], []>} : vector<32x73xf32>, vector<73x256xf32>, vector<32x256xf32> -> vector<32x256xf32>
    %c0_64 = arith.constant 0 : index
    %c0_65 = arith.constant 0 : index
    %c0_66 = arith.constant 0 : index
    %83 = vector.load %arg9[%c0_64, %c0_65, %c0_66] : memref<1x32x256xf32, #tpu.memory_space<vmem>>, vector<1x32x256xf32>
    %84 = vector.shape_cast %83 : vector<1x32x256xf32> to vector<32x256xf32>
    %85 = vector.shape_cast %82 : vector<32x256xf32> to vector<1x32x256xf32>
    tpu.vector_store %arg9[%c0_64, %c0_65, %c0_66], %85 {strides = array<i32>} : memref<1x32x256xf32, #tpu.memory_space<vmem>>, vector<1x32x256xf32>,
    return
  }
  func.func @transform_0(%arg0: i32) -> (i32, i32, i32) {
    %c0_i32 = arith.constant 0 : i32
    %c0_i32_0 = arith.constant 0 : i32
    %c0_i32_1 = arith.constant 0 : i32
    return %arg0, %c0_i32, %c0_i32_0 : i32, i32, i32
  }
  func.func @transform_1(%arg0: i32) -> (i32, i32) {
    %c0_i32 = arith.constant 0 : i32
    %c0_i32_0 = arith.constant 0 : i32
    %c0_i32_1 = arith.constant 0 : i32
    return %c0_i32, %c0_i32_0 : i32, i32
  }
  func.func @transform_2(%arg0: i32) -> (i32, i32, i32) {
    %c0_i32 = arith.constant 0 : i32
    %c0_i32_0 = arith.constant 0 : i32
    %c0_i32_1 = arith.constant 0 : i32
    %c0_i32_2 = arith.constant 0 : i32
    return %c0_i32, %c0_i32_0, %c0_i32_1 : i32, i32, i32
  }
  func.func @transform_3(%arg0: i32) -> (i32, i32) {
    %c0_i32 = arith.constant 0 : i32
    %c0_i32_0 = arith.constant 0 : i32
    %c0_i32_1 = arith.constant 0 : i32
    return %c0_i32, %c0_i32_0 : i32, i32
  }
  func.func @transform_4(%arg0: i32) -> (i32, i32, i32) {
    %c0_i32 = arith.constant 0 : i32
    %c0_i32_0 = arith.constant 0 : i32
    %c0_i32_1 = arith.constant 0 : i32
    %c0_i32_2 = arith.constant 0 : i32
    return %c0_i32, %c0_i32_0, %c0_i32_1 : i32, i32, i32
  }
  func.func @transform_5(%arg0: i32) -> (i32, i32, i32) {
    %c0_i32 = arith.constant 0 : i32
    %c0_i32_0 = arith.constant 0 : i32
    %c0_i32_1 = arith.constant 0 : i32
    %c0_i32_2 = arith.constant 0 : i32
    return %c0_i32, %c0_i32_0, %c0_i32_1 : i32, i32, i32
  }
  func.func @transform_6(%arg0: i32) -> (i32, i32) {
    %c0_i32 = arith.constant 0 : i32
    %c0_i32_0 = arith.constant 0 : i32
    %c0_i32_1 = arith.constant 0 : i32
    return %c0_i32, %c0_i32_0 : i32, i32
  }
  func.func @transform_7(%arg0: i32) -> (i32, i32) {
    %c0_i32 = arith.constant 0 : i32
    %c0_i32_0 = arith.constant 0 : i32
    %c0_i32_1 = arith.constant 0 : i32
    return %c0_i32, %c0_i32_0 : i32, i32
  }
  func.func @transform_8(%arg0: i32) -> (i32, i32, i32) {
    %c0_i32 = arith.constant 0 : i32
    %c0_i32_0 = arith.constant 0 : i32
    %c0_i32_1 = arith.constant 0 : i32
    return %arg0, %c0_i32, %c0_i32_0 : i32, i32, i32
  }
}

module attributes {stable_mosaic.version = 11 : i64} {
  func.func @_tail_kernel(%arg0: i32, %arg1: memref<1x8x1024xf32, #tpu.memory_space<vmem>>, %arg2: memref<9x8x1024xf32, #tpu.memory_space<vmem>>, %arg3: memref<3x73xf32, #tpu.memory_space<vmem>>, %arg4: memref<1x3x1024xf32, #tpu.memory_space<vmem>>) attributes {dimension_semantics = [#tpu.dimension_semantics<parallel>], iteration_bounds = array<i64: 2>, scalar_prefetch = 0 : i64, scratch_operands = 0 : i64, tpu.core_type = #tpu.core_type<tc>, window_params = [{transform_indices = @transform_0, window_bounds = array<i64: 1, 8, 1024>}, {pipeline_mode = #tpu.pipeline_mode<synchronous>, transform_indices = @transform_1, window_bounds = array<i64: 9, 8, 1024>}, {pipeline_mode = #tpu.pipeline_mode<synchronous>, transform_indices = @transform_2, window_bounds = array<i64: 3, 73>}, {transform_indices = @transform_3, window_bounds = array<i64: 1, 3, 1024>}]} {
    %cst = arith.constant 1.000000e+00 : f32
    %0 = vector.broadcast %cst : f32 to vector<1x1024xf32>
    %c0 = arith.constant 0 : index
    %c0_0 = arith.constant 0 : index
    %c0_1 = arith.constant 0 : index
    %1 = vector.load %arg1[%c0, %c0_0, %c0_1] : memref<1x8x1024xf32, #tpu.memory_space<vmem>>, vector<1x8x1024xf32>
    %2 = vector.shape_cast %1 : vector<1x8x1024xf32> to vector<8x1024xf32>
    %c0_2 = arith.constant 0 : index
    %c0_3 = arith.constant 0 : index
    %3 = vector.load %arg3[%c0_2, %c0_3] : memref<3x73xf32, #tpu.memory_space<vmem>>, vector<3x73xf32>
    %c33_i32 = arith.constant 33 : i32
    %4 = tpu.dynamic_rotate %2 by %c33_i32 dim 1 : vector<8x1024xf32>, i32 -> vector<8x1024xf32>
    %c0_4 = arith.constant 0 : index
    %c0_5 = arith.constant 0 : index
    %c0_6 = arith.constant 0 : index
    %5 = vector.load %arg2[%c0_4, %c0_5, %c0_6] : memref<9x8x1024xf32, #tpu.memory_space<vmem>>, vector<1x8x1024xf32>
    %6 = vector.shape_cast %5 : vector<1x8x1024xf32> to vector<8x1024xf32>
    %7 = arith.mulf %4, %6 : vector<8x1024xf32>
    %c32_i32 = arith.constant 32 : i32
    %8 = tpu.dynamic_rotate %2 by %c32_i32 dim 1 : vector<8x1024xf32>, i32 -> vector<8x1024xf32>
    %c1 = arith.constant 1 : index
    %c0_7 = arith.constant 0 : index
    %c0_8 = arith.constant 0 : index
    %9 = vector.load %arg2[%c1, %c0_7, %c0_8] : memref<9x8x1024xf32, #tpu.memory_space<vmem>>, vector<1x8x1024xf32>
    %10 = vector.shape_cast %9 : vector<1x8x1024xf32> to vector<8x1024xf32>
    %11 = arith.mulf %8, %10 : vector<8x1024xf32>
    %c31_i32 = arith.constant 31 : i32
    %12 = tpu.dynamic_rotate %2 by %c31_i32 dim 1 : vector<8x1024xf32>, i32 -> vector<8x1024xf32>
    %c2 = arith.constant 2 : index
    %c0_9 = arith.constant 0 : index
    %c0_10 = arith.constant 0 : index
    %13 = vector.load %arg2[%c2, %c0_9, %c0_10] : memref<9x8x1024xf32, #tpu.memory_space<vmem>>, vector<1x8x1024xf32>
    %14 = vector.shape_cast %13 : vector<1x8x1024xf32> to vector<8x1024xf32>
    %15 = arith.mulf %12, %14 : vector<8x1024xf32>
    %c1_i32 = arith.constant 1 : i32
    %16 = tpu.dynamic_rotate %2 by %c1_i32 dim 1 : vector<8x1024xf32>, i32 -> vector<8x1024xf32>
    %c3 = arith.constant 3 : index
    %c0_11 = arith.constant 0 : index
    %c0_12 = arith.constant 0 : index
    %17 = vector.load %arg2[%c3, %c0_11, %c0_12] : memref<9x8x1024xf32, #tpu.memory_space<vmem>>, vector<1x8x1024xf32>
    %18 = vector.shape_cast %17 : vector<1x8x1024xf32> to vector<8x1024xf32>
    %19 = arith.mulf %16, %18 : vector<8x1024xf32>
    %c1023_i32 = arith.constant 1023 : i32
    %20 = tpu.dynamic_rotate %2 by %c1023_i32 dim 1 : vector<8x1024xf32>, i32 -> vector<8x1024xf32>
    %c5 = arith.constant 5 : index
    %c0_13 = arith.constant 0 : index
    %c0_14 = arith.constant 0 : index
    %21 = vector.load %arg2[%c5, %c0_13, %c0_14] : memref<9x8x1024xf32, #tpu.memory_space<vmem>>, vector<1x8x1024xf32>
    %22 = vector.shape_cast %21 : vector<1x8x1024xf32> to vector<8x1024xf32>
    %23 = arith.mulf %20, %22 : vector<8x1024xf32>
    %c993_i32 = arith.constant 993 : i32
    %24 = tpu.dynamic_rotate %2 by %c993_i32 dim 1 : vector<8x1024xf32>, i32 -> vector<8x1024xf32>
    %c6 = arith.constant 6 : index
    %c0_15 = arith.constant 0 : index
    %c0_16 = arith.constant 0 : index
    %25 = vector.load %arg2[%c6, %c0_15, %c0_16] : memref<9x8x1024xf32, #tpu.memory_space<vmem>>, vector<1x8x1024xf32>
    %26 = vector.shape_cast %25 : vector<1x8x1024xf32> to vector<8x1024xf32>
    %27 = arith.mulf %24, %26 : vector<8x1024xf32>
    %c992_i32 = arith.constant 992 : i32
    %28 = tpu.dynamic_rotate %2 by %c992_i32 dim 1 : vector<8x1024xf32>, i32 -> vector<8x1024xf32>
    %c7 = arith.constant 7 : index
    %c0_17 = arith.constant 0 : index
    %c0_18 = arith.constant 0 : index
    %29 = vector.load %arg2[%c7, %c0_17, %c0_18] : memref<9x8x1024xf32, #tpu.memory_space<vmem>>, vector<1x8x1024xf32>
    %30 = vector.shape_cast %29 : vector<1x8x1024xf32> to vector<8x1024xf32>
    %31 = arith.mulf %28, %30 : vector<8x1024xf32>
    %c991_i32 = arith.constant 991 : i32
    %32 = tpu.dynamic_rotate %2 by %c991_i32 dim 1 : vector<8x1024xf32>, i32 -> vector<8x1024xf32>
    %c8 = arith.constant 8 : index
    %c0_19 = arith.constant 0 : index
    %c0_20 = arith.constant 0 : index
    %33 = vector.load %arg2[%c8, %c0_19, %c0_20] : memref<9x8x1024xf32, #tpu.memory_space<vmem>>, vector<1x8x1024xf32>
    %34 = vector.shape_cast %33 : vector<1x8x1024xf32> to vector<8x1024xf32>
    %35 = arith.mulf %32, %34 : vector<8x1024xf32>
    %36 = tpu.concatenate %7, %11, %15, %19, %2, %23, %27, %31, %35, %0 in 0 : vector<8x1024xf32>, vector<8x1024xf32>, vector<8x1024xf32>, vector<8x1024xf32>, vector<8x1024xf32>, vector<8x1024xf32>, vector<8x1024xf32>, vector<8x1024xf32>, vector<8x1024xf32>, vector<1x1024xf32> -> vector<73x1024xf32>
    %cst_21 = arith.constant dense<0.000000e+00> : vector<3x1024xf32>
    %37 = tpu.matmul %3, %36, %cst_21 {dimension_numbers = #tpu.dot_dimension_numbers<[1], [0], [0], [1], [0, 0, 1, 1], [], []>} : vector<3x73xf32>, vector<73x1024xf32>, vector<3x1024xf32> -> vector<3x1024xf32>
    %c0_22 = arith.constant 0 : index
    %c0_23 = arith.constant 0 : index
    %c0_24 = arith.constant 0 : index
    %38 = vector.load %arg4[%c0_22, %c0_23, %c0_24] : memref<1x3x1024xf32, #tpu.memory_space<vmem>>, vector<1x3x1024xf32>
    %39 = vector.shape_cast %38 : vector<1x3x1024xf32> to vector<3x1024xf32>
    %40 = vector.shape_cast %37 : vector<3x1024xf32> to vector<1x3x1024xf32>
    tpu.vector_store %arg4[%c0_22, %c0_23, %c0_24], %40 {strides = array<i32>} : memref<1x3x1024xf32, #tpu.memory_space<vmem>>, vector<1x3x1024xf32>,
    return
  }
  func.func @transform_0(%arg0: i32) -> (i32, i32, i32) {
    %c0_i32 = arith.constant 0 : i32
    %c0_i32_0 = arith.constant 0 : i32
    %c0_i32_1 = arith.constant 0 : i32
    return %arg0, %c0_i32, %c0_i32_0 : i32, i32, i32
  }
  func.func @transform_1(%arg0: i32) -> (i32, i32, i32) {
    %c0_i32 = arith.constant 0 : i32
    %c0_i32_0 = arith.constant 0 : i32
    %c0_i32_1 = arith.constant 0 : i32
    %c0_i32_2 = arith.constant 0 : i32
    return %c0_i32, %c0_i32_0, %c0_i32_1 : i32, i32, i32
  }
  func.func @transform_2(%arg0: i32) -> (i32, i32) {
    %c0_i32 = arith.constant 0 : i32
    %c0_i32_0 = arith.constant 0 : i32
    %c0_i32_1 = arith.constant 0 : i32
    return %c0_i32, %c0_i32_0 : i32, i32
  }
  func.func @transform_3(%arg0: i32) -> (i32, i32, i32) {
    %c0_i32 = arith.constant 0 : i32
    %c0_i32_0 = arith.constant 0 : i32
    %c0_i32_1 = arith.constant 0 : i32
    return %arg0, %c0_i32, %c0_i32_0 : i32, i32, i32
  }
}

</mosaic_0001>

<bundles_post_ra>
// kernel: emsr_forward.3
= control target key start
LH: loop header
LB: loop body
LE: loop exit
PB: predicated region body
PF: predicated region fallthrough
CT: control target
= control target key end

     0   :  { %s904_s12 = smov 0   ;;  %s1588_s0 = inlined_call_operand.vmem [shape: f32[2,8,1024], index: 0, kind: input, shape index: {}]   ;;  %s1589_s1 = inlined_call_operand.vmem [shape: f32[9,8,1024], index: 1, kind: input, shape index: {}]   ;;  %s1590_s2 = inlined_call_operand.vmem [shape: f32[3,73], index: 2, kind: input, shape index: {}]   ;;  %s1591_s3 = inlined_call_operand.vmem [shape: f32[2,3,1024], index: 3, kind: output, shape index: {}]  }
   0x1 LB: > { %s765_s13 = sadd.s32 4294967295, %s873_s12   ;;  %p769_p0 = scmp.ge.s32.totalorder %s873_s12, 1  ;;  %s873_s12 = sphi %s904_s12, %s13_s12  }
   0x2   : > { %p137_p1 = scmp.lt.s32.totalorder %s873_s12, 3 }
   0x4   : > { %p138_p2 = pnand %p769_p0, %p137_p1 }
   0x5   : > { %p161_p3 = scmp.lt.s32.totalorder (!%p138_p2), %s765_s13, 1  ;;  %s875_s18 = smov (!%p138_p2), 96  }
   0x6   : > { %141 = sbr.rel (%p138_p2) target bundleno = 434 (0x1b2), region = 32  ;;  %s876_s19 = smov (!%p138_p2), 95  }
   0x7   : > { %s877_s20 = smov (!%p138_p2), 97   ;;  %s878_s21 = smov (!%p138_p2), 127  }
   0x8   : > { %s879_s22 = smov (!%p138_p2), 1   ;;  %s880_s23 = smov (!%p138_p2), 31  }
   0x9   : > { %s881_s24 = smov (!%p138_p2), 32   ;;  %s883_s25 = smov (!%p138_p2), 33  }
   0xb   : > { %s1593_s13 = smov (!%p161_p3, %s765_s13), 1  ;;  %vm521_vm0 = vcmask 1040384   ;;  %v882_v7 = vmov 1.0   ;;  %v196_v11 = vlaneseq  ;;  %v824_v14 = vld [vmem:[%s1589_s1 + $0x210] sm:$0xff]  ;;  %v823_v17 = vld [vmem:[%s1589_s1 + $0x208] sm:$0xff]  ;;  %v825_v23 = vld [vmem:[%s1589_s1 + $0x218] sm:$0xff] }
   0xc   : > { %s848_s14 = sshll.u32 %s1593_s13, 6  ;;  %834 = vmatpush.msk.msra.mxu2 %vm521_vm0, %v882_v7  ;;  %832 = vmatpush.msk.msra.mxu1 %vm521_vm0, %v882_v7  ;;  %v822_v26 = vld [vmem:[%s1589_s1 + $0x200] sm:$0xff]  ;;  %v817_v30 = vld [vmem:[%s1589_s1 + $0x1d8] sm:$0xff]  ;;  %v816_v35 = vld [vmem:[%s1589_s1 + $0x1d0] sm:$0xff]  ;;  %vm517_vm9 = vcmask 596992   ;;  %s849_s5 = sshll.u32 %s1593_s13, 5 }
   0xd   : > { %s918_s17 = scalar_lea.vmem %s1588_s0, %s848_s14  ;;  %836 = vmatpush.msk.msra.mxu3 %vm521_vm0, %v882_v7  ;;  %830 = vmatpush.msk.msra.mxu0 %vm521_vm0, %v882_v7  ;;  %v1040_v13 = vand.u32 127, %v196_v11  ;;  %v809_v36 = vld [vmem:[%s1589_s1 + $0x198] sm:$0xff]  ;;  %v808_v44 = vld [vmem:[%s1589_s1 + $0x190] sm:$0xff]  ;;  %v815_v53 = vld [vmem:[%s1589_s1 + $0x1c8] sm:$0xff]  ;;  %vm697_vm10 = vcmask 1043456  }
   0xe   : > { %v921_v0 = vld [vmem:[%s918_s17 + $0x18] sm:$0xff]  ;;  %v924_v1 = vld [vmem:[%s918_s17 + $0x10] sm:$0xff]  ;;  %v933_v2 = vld [vmem:[%s918_s17 + $0x20] sm:$0xff] }
   0xf   : > { %439 = vrot.lane.b32.xlu1 %v921_v0, %s875_s18  ;;  %481 = vrot.lane.b32.xlu0 %v921_v0, %s876_s19  ;;  %v948_v3 = vld [vmem:[%s918_s17 + $0x8] sm:$0xff]  ;;  %v957_v4 = vld [vmem:[%s918_s17] sm:$0xff]  ;;  %vm491_vm1 = vcmp.lt.s32.totalorder %v1040_v13, 95  ;;  %vm449_vm2 = vcmp.lt.s32.totalorder %v1040_v13, 96  ;;  %vm407_vm3 = vcmp.lt.s32.totalorder %v1040_v13, 97  ;;  %vm365_vm4 = vcmp.lt.s32.totalorder %v1040_v13, 127 }
  0x10   : > { %479 = vrot.lane.b32.xlu2 %v924_v1, %s876_s19  ;;  %v966_v5 = vld [vmem:[%s918_s17 + $0x38] sm:$0xff]  ;;  %v981_v6 = vld [vmem:[%s918_s17 + $0x30] sm:$0xff]  ;;  %v1012_v8 = vld [vmem:[%s918_s17 + $0x28] sm:$0xff]  ;;  %vm323_vm5 = vcmp.lt.s32.totalorder %v1040_v13, 1  ;;  %vm281_vm6 = vcmp.lt.s32.totalorder %v1040_v13, 31  ;;  %vm239_vm7 = vcmp.lt.s32.totalorder %v1040_v13, 32 }
  0x11   : > { %v801_v45 = vld [vmem:[%s1589_s1 + $0x158] sm:$0xff]  ;;  %v800_v54 = vld [vmem:[%s1589_s1 + $0x150] sm:$0xff]  ;;  %v814_v11 = vld [vmem:[%s1589_s1 + $0x1c0] sm:$0xff]  ;;  %vm198_vm8 = vcmp.lt.s32.totalorder %v1040_v13, 33 }
  0x12   : > { %v793_v62 = vld [vmem:[%s1589_s1 + $0xd8] sm:$0xff] }
  0x17   : > { %441 = vrot.lane.b32.xlu1 %v933_v2, %s875_s18  ;;  %483 = vrot.lane.b32.xlu0 %v933_v2, %s876_s19 }
  0x18   : > { %397 = vrot.lane.b32.xlu2 %v921_v0, %s877_s20 }
  0x1f   : > { %399 = vrot.lane.b32.xlu0 %v933_v2, %s877_s20  ;;  %437 = vrot.lane.b32.xlu1 %v924_v1, %s875_s18 }
  0x20   : > { %355 = vrot.lane.b32.xlu2 %v921_v0, %s878_s21 }
  0x27   : > { %357 = vrot.lane.b32.xlu0 %v933_v2, %s878_s21  ;;  %395 = vrot.lane.b32.xlu1 %v924_v1, %s877_s20 }
  0x28   : > { %477 = vrot.lane.b32.xlu2 %v948_v3, %s876_s19 }
  0x2f   : > { %353 = vrot.lane.b32.xlu0 %v924_v1, %s878_s21  ;;  %435 = vrot.lane.b32.xlu1 %v948_v3, %s875_s18 }
  0x30   : > { %475 = vrot.lane.b32.xlu2 %v957_v4, %s876_s19 }
  0x37   : > { %489 = vrot.lane.b32.xlu0 %v966_v5, %s876_s19  ;;  %311 = vrot.lane.b32.xlu1 %v924_v1, %s879_s22 }
  0x38   : > { %313 = vrot.lane.b32.xlu2 %v921_v0, %s879_s22 }
  0x3f   : > { %393 = vrot.lane.b32.xlu0 %v948_v3, %s877_s20  ;;  %433 = vrot.lane.b32.xlu1 %v957_v4, %s875_s18 }
  0x40   : > { %447 = vrot.lane.b32.xlu2 %v966_v5, %s875_s18 }
  0x47   : > { %487 = vrot.lane.b32.xlu0 %v981_v6, %s876_s19  ;;  %269 = vrot.lane.b32.xlu1 %v924_v1, %s880_s23 }
  0x48   : > { %271 = vrot.lane.b32.xlu2 %v921_v0, %s880_s23 }
  0x4f   : > { %309 = vrot.lane.b32.xlu0 %v948_v3, %s879_s22  ;;  %351 = vrot.lane.b32.xlu1 %v948_v3, %s878_s21 }
  0x50   : > { %391 = vrot.lane.b32.xlu2 %v957_v4, %s877_s20 }
  0x57   : > { %405 = vrot.lane.b32.xlu0 %v966_v5, %s877_s20  ;;  %445 = vrot.lane.b32.xlu1 %v981_v6, %s875_s18 }
  0x58   : > { %227 = vrot.lane.b32.xlu2 %v924_v1, %s881_s24 }
  0x5f   : > { %229 = vrot.lane.b32.xlu0 %v921_v0, %s881_s24  ;;  %267 = vrot.lane.b32.xlu1 %v948_v3, %s880_s23 }
  0x60   : > { %349 = vrot.lane.b32.xlu2 %v957_v4, %s878_s21 }
  0x67   : > { %363 = vrot.lane.b32.xlu0 %v966_v5, %s878_s21  ;;  %403 = vrot.lane.b32.xlu1 %v981_v6, %s877_s20 }
  0x68   : > { %485 = vrot.lane.b32.xlu2 %v1012_v8, %s876_s19 }
  0x6a   : > { %v480_v9 = vpop.permute.xlu2 %479 }
  0x6f   : > { %184 = vrot.lane.b32.xlu0 %v924_v1, %s883_s25  ;;  %186 = vrot.lane.b32.xlu1 %v921_v0, %s883_s25 }
  0x70   : > { %225 = vrot.lane.b32.xlu2 %v948_v3, %s881_s24 }
  0x72   : > { %v1030_v10 = vpop.permute.xlu2 %397 }
  0x77   : > { %307 = vrot.lane.b32.xlu0 %v957_v4, %s879_s22  ;;  %361 = vrot.lane.b32.xlu1 %v981_v6, %s878_s21 }
  0x78   : > { %443 = vrot.lane.b32.xlu2 %v1012_v8, %s875_s18 }
  0x7a   : > { %v1038_v12 = vpop.permute.xlu2 %355 }
  0x7f   : > { %182 = vrot.lane.b32.xlu0 %v948_v3, %s883_s25  ;;  %265 = vrot.lane.b32.xlu1 %v957_v4, %s880_s23 }
  0x80   : > { %319 = vrot.lane.b32.xlu2 %v981_v6, %s879_s22 }
  0x81   : > { %v440_v15 = vpop.permute.xlu1 %439  ;;  %v482_v16 = vpop.permute.xlu0 %481 }
  0x82   : > { %v496_v18 = vsel %vm491_vm1, %v480_v9, %v482_v16  ;;  %v478_v19 = vpop.permute.xlu2 %477 }
  0x83   : > { %v497_v20 = vsel %vm491_vm1, %v478_v19, %v480_v9  ;;  %v511_v21 = vmul.f32 %v824_v14, %v496_v18 }
  0x84   : > { %v510_v22 = vmul.f32 %v823_v17, %v497_v20  ;;  %v806_v20 = vld [vmem:[%s1589_s1 + $0x180] sm:$0xff] }
  0x85   : > { %572 = vmatpush.msra.mxu2 %v511_v21 }
  0x86   : > { %552 = vmatpush.msra.mxu1 %v510_v22 }
  0x87   : > { %321 = vrot.lane.b32.xlu0 %v966_v5, %s879_s22  ;;  %401 = vrot.lane.b32.xlu1 %v1012_v8, %s877_s20 }
  0x88   : > { %223 = vrot.lane.b32.xlu2 %v957_v4, %s881_s24 }
  0x89   : > { %v1069_v24 = vpop.permute.xlu1 %441  ;;  %v1071_v25 = vpop.permute.xlu0 %483 }
  0x8a   : > { %v453_v27 = vsel %vm449_vm2, %v440_v15, %v1069_v24  ;;  %v495_v28 = vsel %vm491_vm1, %v482_v16, %v1071_v25  ;;  %v1082_v29 = vpop.permute.xlu2 %475 }
  0x8b   : > { %v498_v31 = vsel %vm491_vm1, %v1082_v29, %v478_v19  ;;  %v512_v32 = vmul.f32 %v825_v23, %v495_v28  ;;  %v470_v34 = vmul.f32 %v817_v30, %v453_v27 }
  0x8c   : > { %v509_v33 = vmul.f32 %v822_v26, %v498_v31  ;;  %v785_v26 = vld [vmem:[%s1589_s1 + $0x98] sm:$0xff] }
  0x8d   : > { %592 = vmatpush.msra.mxu3 %v512_v32 }
  0x8e   : > { %532 = vmatpush.msra.mxu0 %v509_v33  ;;  %v799_v33 = vld [vmem:[%s1589_s1 + $0x148] sm:$0xff] }
  0x8f   : > { %593 = vmatpush.msra.mxu3 %v470_v34  ;;  %277 = vrot.lane.b32.xlu0 %v981_v6, %s880_s23  ;;  %v792_v34 = vld [vmem:[%s1589_s1 + $0xd0] sm:$0xff] }
  0x90   : > { %279 = vrot.lane.b32.xlu1 %v966_v5, %s880_s23  ;;  %317 = vrot.lane.b32.xlu2 %v1012_v8, %s879_s22 }
  0x91   : > { %v1103_v37 = vpop.permute.xlu0 %399  ;;  %v438_v38 = vpop.permute.xlu1 %437 }
  0x92   : > { %v411_v39 = vsel %vm407_vm3, %v1030_v10, %v1103_v37  ;;  %v454_v40 = vsel %vm449_vm2, %v438_v38, %v440_v15  ;;  %v1111_v41 = vpop.permute.xlu2 %313 }
  0x93   : > { %v469_v42 = vmul.f32 %v816_v35, %v454_v40  ;;  %v428_v43 = vmul.f32 %v809_v36, %v411_v39 }
  0x95   : > { %573 = vmatpush.msra.mxu2 %v469_v42  ;;  %594 = vmatpush.msra.mxu3 %v428_v43 }
  0x97   : > { %359 = vrot.lane.b32.xlu0 %v1012_v8, %s878_s21 }
  0x98   : > { %180 = vrot.lane.b32.xlu1 %v957_v4, %s883_s25  ;;  %235 = vrot.lane.b32.xlu2 %v981_v6, %s881_s24 }
  0x99   : > { %v1126_v46 = vpop.permute.xlu0 %357  ;;  %v396_v47 = vpop.permute.xlu1 %395 }
  0x9a   : > { %v369_v48 = vsel %vm365_vm4, %v1038_v12, %v1126_v46  ;;  %v412_v49 = vsel %vm407_vm3, %v396_v47, %v1030_v10  ;;  %v1135_v50 = vpop.permute.xlu2 %447 }
  0x9b   : > { %v427_v51 = vmul.f32 %v808_v44, %v412_v49  ;;  %v386_v52 = vmul.f32 %v801_v45, %v369_v48 }
  0x9d   : > { %574 = vmatpush.msra.mxu2 %v427_v51  ;;  %595 = vmatpush.msra.mxu3 %v386_v52 }
  0x9f   : > { %237 = vrot.lane.b32.xlu0 %v966_v5, %s881_s24  ;;  %596 = vmatpush.msra.mxu3 %v921_v0 }
  0xa0   : > { %275 = vrot.lane.b32.xlu1 %v1012_v8, %s880_s23  ;;  %192 = vrot.lane.b32.xlu2 %v981_v6, %s883_s25 }
  0xa1   : > { %v354_v55 = vpop.permute.xlu0 %353  ;;  %v436_v56 = vpop.permute.xlu1 %435 }
  0xa2   : > { %v370_v57 = vsel %vm365_vm4, %v354_v55, %v1038_v12  ;;  %v455_v58 = vsel %vm449_vm2, %v436_v56, %v438_v38  ;;  %v1155_v59 = vpop.permute.xlu2 %271  ;;  %v807_v12 = vld [vmem:[%s1589_s1 + $0x188] sm:$0xff]  ;;  %v798_v38 = vld [vmem:[%s1589_s1 + $0x140] sm:$0xff] }
  0xa3   : > { %v468_v60 = vmul.f32 %v815_v53, %v455_v58  ;;  %v385_v61 = vmul.f32 %v800_v54, %v370_v57  ;;  %v777_v54 = vld [vmem:[%s1589_s1 + $0x58] sm:$0xff]  ;;  %v776_v58 = vld [vmem:[%s1589_s1 + $0x50] sm:$0xff] }
  0xa5   : > { %553 = vmatpush.msra.mxu1 %v468_v60  ;;  %575 = vmatpush.msra.mxu2 %v385_v61 }
  0xa7   : > { %194 = vrot.lane.b32.xlu0 %v966_v5, %s883_s25  ;;  %576 = vmatpush.msra.mxu2 %v924_v1 }
  0xa8   : > { %233 = vrot.lane.b32.xlu1 %v1012_v8, %s881_s24  ;;  %315 = vrot.lane.b32.xlu2 %v933_v2, %s879_s22 }
  0xa9   : > { %v1168_v63 = vpop.permute.xlu0 %489  ;;  %v312_v0 = vpop.permute.xlu1 %311 }
  0xaa   : > { %v328_v9 = vsel %vm323_vm5, %v312_v0, %v1111_v41  ;;  %v1173_v10 = vpop.permute.xlu2 %391 }
  0xab   : > { %v344_v1 = vmul.f32 %v793_v62, %v328_v9 }
  0xad   : > { %597 = vmatpush.msra.mxu3 %v344_v1 }
  0xaf   : > { %190 = vrot.lane.b32.xlu0 %v1012_v8, %s883_s25 }
  0xb0   : > { %273 = vrot.lane.b32.xlu1 %v933_v2, %s880_s23  ;;  %231 = vrot.lane.b32.xlu2 %v933_v2, %s881_s24 }
  0xb1   : > { %v394_v14 = vpop.permute.xlu0 %393  ;;  %v1187_v15 = vpop.permute.xlu1 %433 }
  0xb2   : > { %v413_v16 = vsel %vm407_vm3, %v394_v14, %v396_v47  ;;  %v414_v17 = vsel %vm407_vm3, %v1173_v10, %v394_v14  ;;  %v456_v18 = vsel %vm449_vm2, %v1187_v15, %v436_v56  ;;  %v228_v19 = vpop.permute.xlu2 %227 }
  0xb3   : > { %v467_v21 = vmul.f32 %v814_v11, %v456_v18  ;;  %v426_v22 = vmul.f32 %v807_v12, %v413_v16  ;;  %v425_v23 = vmul.f32 %v806_v20, %v414_v17  ;;  %v210_v11 = vld [vmem:[%s1589_s1 + $0x18] sm:$0xff]  ;;  %v499_v17 = vsel %vm491_vm1, %v1168_v63, %v1082_v29 }
  0xb4   : > { %v829_v20 = vld [vmem:[%s1589_s1 + $0x238] sm:$0xff] }
  0xb5   : > { %533 = vmatpush.msra.mxu0 %v467_v21  ;;  %554 = vmatpush.msra.mxu1 %v426_v22  ;;  %v457_v21 = vsel %vm449_vm2, %v1135_v50, %v1187_v15  ;;  %v821_v22 = vld [vmem:[%s1589_s1 + $0x1f8] sm:$0xff]  ;;  %v516_v29 = vmul.f32 %v829_v20, %v499_v17 }
  0xb6   : > { %v474_v15 = vmul.f32 %v821_v22, %v457_v21 }
  0xb7   : > { %188 = vrot.lane.b32.xlu0 %v933_v2, %s883_s25  ;;  %534 = vmatpush.msra.mxu0 %v425_v23  ;;  %s170_s25 = scalar_lea.vmem %s1591_s3, %s849_s5 }
  0xb9   : > { %v1206_v27 = vpop.permute.xlu0 %487  ;;  %v270_v28 = vpop.permute.xlu1 %269 }
  0xba   : > { %v286_v30 = vsel %vm281_vm6, %v270_v28, %v1155_v59  ;;  %v1211_v31 = vpop.permute.xlu2 %349 }
  0xbb   : > { %v302_v32 = vmul.f32 %v785_v26, %v286_v30  ;;  %v813_v26 = vld [vmem:[%s1589_s1 + $0x1b8] sm:$0xff] }
  0xbd   : > { %598 = vmatpush.msra.mxu3 %v302_v32 }
  0xc1   : > { %v310_v35 = vpop.permute.xlu0 %309  ;;  %v352_v36 = vpop.permute.xlu1 %351 }
  0xc2   : > { %v329_v39 = vsel %vm323_vm5, %v310_v35, %v312_v0  ;;  %v371_v40 = vsel %vm365_vm4, %v352_v36, %v354_v55  ;;  %v372_v42 = vsel %vm365_vm4, %v1211_v31, %v352_v36  ;;  %v486_v43 = vpop.permute.xlu2 %485 }
  0xc3   : > { %v1232_v44 = vsel %vm491_vm1, %v486_v43, %v1206_v27  ;;  %v1237_v45 = vsel %vm491_vm1, %v1071_v25, %v486_v43  ;;  %v384_v47 = vmul.f32 %v799_v33, %v371_v40  ;;  %v343_v48 = vmul.f32 %v792_v34, %v329_v39  ;;  %v784_v25 = vld [vmem:[%s1589_s1 + $0x90] sm:$0xff] }
  0xc4   : > { %v383_v49 = vmul.f32 %v798_v38, %v372_v42  ;;  %v209_v42 = vld [vmem:[%s1589_s1 + $0x10] sm:$0xff] }
  0xc5   : > { %555 = vmatpush.msra.mxu1 %v384_v47  ;;  %577 = vmatpush.msra.mxu2 %v343_v48 }
  0xc6   : > { %535 = vmatpush.msra.mxu0 %v383_v49 }
  0xc7   : > { %556 = vmatpush.msra.mxu1 %v948_v3 }
  0xc8   : > { %536 = vmatpush.msra.mxu0 %v957_v4 }
  0xc9   : > { %v1241_v51 = vpop.permute.xlu0 %405  ;;  %v1243_v52 = vpop.permute.xlu1 %445 }
  0xca   : > { %v226_v53 = vpop.permute.xlu2 %225  ;;  %v415_v23 = vsel %vm407_vm3, %v1241_v51, %v1173_v10  ;;  %v805_v10 = vld [vmem:[%s1589_s1 + $0x178] sm:$0xff] }
  0xcb   : > { %v245_v4 = vsel %vm239_vm7, %v226_v53, %v228_v19  ;;  %v432_v36 = vmul.f32 %v813_v26, %v415_v23  ;;  %v796_v23 = vld [vmem:[%s1589_s1 + $0xf0] sm:$0xff] }
  0xcc   : > { %v259_v62 = vmul.f32 %v776_v58, %v245_v4 }
  0xd1   : > { %v1252_v55 = vpop.permute.xlu0 %229  ;;  %v268_v3 = vpop.permute.xlu1 %267 }
  0xd2   : > { %v244_v56 = vsel %vm239_vm7, %v228_v19, %v1252_v55  ;;  %v287_v57 = vsel %vm281_vm6, %v268_v3, %v270_v28  ;;  %v1264_v0 = vpop.permute.xlu2 %443  ;;  %v791_v28 = vld [vmem:[%s1589_s1 + $0xc8] sm:$0xff] }
  0xd3   : > { %v301_v60 = vmul.f32 %v784_v25, %v287_v57  ;;  %v260_v61 = vmul.f32 %v777_v54, %v244_v56  ;;  %v775_v25 = vld [vmem:[%s1589_s1 + $0x48] sm:$0xff]  ;;  %v820_v57 = vld [vmem:[%s1589_s1 + $0x1f0] sm:$0xff] }
  0xd5   : > { %578 = vmatpush.msra.mxu2 %v301_v60  ;;  %599 = vmatpush.msra.mxu3 %v260_v61  ;;  %v790_v61 = vld [vmem:[%s1589_s1 + $0xc0] sm:$0xff] }
  0xd7   : > { %579 = vmatpush.msra.mxu2 %v259_v62  ;;  %v797_v62 = vld [vmem:[%s1589_s1 + $0xf8] sm:$0xff] }
  0xd9   : > { %v1266_v9 = vpop.permute.xlu0 %363  ;;  %v1268_v1 = vpop.permute.xlu1 %403 }
  0xda   : > { %v1283_v18 = vpop.permute.xlu2 %319  ;;  %v373_v30 = vsel %vm365_vm4, %v1266_v9, %v1211_v31  ;;  %v783_v31 = vld [vmem:[%s1589_s1 + $0x88] sm:$0xff] }
  0xdb   : > { %v390_v39 = vmul.f32 %v805_v10, %v373_v30  ;;  %v782_v30 = vld [vmem:[%s1589_s1 + $0x80] sm:$0xff] }
  0xe1   : > { %v185_v12 = vpop.permute.xlu0 %184  ;;  %v1274_v14 = vpop.permute.xlu1 %186 }
  0xe2   : > { %v203_v16 = vsel %vm198_vm8, %v185_v12, %v1274_v14  ;;  %v1318_v40 = vpop.permute.xlu2 %223 }
  0xe3   : > { %v218_v19 = vmul.f32 %v210_v11, %v203_v16  ;;  %v246_v47 = vsel %vm239_vm7, %v1318_v40, %v226_v53  ;;  %v828_v53 = vld [vmem:[%s1589_s1 + $0x230] sm:$0xff] }
  0xe4   : > { %v258_v56 = vmul.f32 %v775_v25, %v246_v47  ;;  %v804_v16 = vld [vmem:[%s1589_s1 + $0x170] sm:$0xff]  ;;  %v451_v25 = vsel %vm449_vm2, %v1264_v0, %v1243_v52 }
  0xe5   : > { %600 = vmatpush.msra.mxu3 %v218_v19 }
  0xe7   : > { %844 = vmatpush.msk.msrb.mxu3 %vm521_vm0, %v882_v7 }
  0xe9   : > { %672 = vmatpush.msrb.mxu3 %v516_v29  ;;  %v308_v32 = vpop.permute.xlu0 %307  ;;  %v1311_v33 = vpop.permute.xlu1 %361 }
  0xea   : > { %v330_v34 = vsel %vm323_vm5, %v308_v32, %v310_v35  ;;  %v1360_v58 = vpop.permute.xlu2 %317 }
  0xeb   : > { %673 = vmatpush.msrb.mxu3 %v474_v15  ;;  %v342_v38 = vmul.f32 %v791_v28, %v330_v34  ;;  %v325_v29 = vsel %vm323_vm5, %v1360_v58, %v1283_v18 }
  0xec   : > { %v347_v26 = vmul.f32 %v796_v23, %v325_v29 }
  0xed   : > { %674 = vmatpush.msrb.mxu3 %v432_v36  ;;  %557 = vmatpush.msra.mxu1 %v342_v38 }
  0xef   : > { %675 = vmatpush.msrb.mxu3 %v390_v39 }
  0xf1   : > { %676 = vmatpush.msrb.mxu3 %v966_v5  ;;  %v1327_v35 = vpop.permute.xlu0 %182  ;;  %v266_v43 = vpop.permute.xlu1 %265  ;;  %v492_v5 = vsel %vm491_vm1, %v1206_v27, %v1168_v63  ;;  %v408_v27 = vsel %vm407_vm3, %v1268_v1, %v1241_v51  ;;  %v366_v51 = vsel %vm365_vm4, %v1311_v33, %v1266_v9 }
  0xf2   : > { %v204_v48 = vsel %vm198_vm8, %v1327_v35, %v185_v12  ;;  %v288_v49 = vsel %vm281_vm6, %v266_v43, %v268_v3  ;;  %v450_v3 = vsel %vm449_vm2, %v1243_v52, %v1135_v50  ;;  %v515_v63 = vmul.f32 %v828_v53, %v492_v5  ;;  %v812_v50 = vld [vmem:[%s1589_s1 + $0x1b0] sm:$0xff]  ;;  %v1393_v15 = vpop.permute.xlu2 %235  ;;  %v819_v5 = vld [vmem:[%s1589_s1 + $0x1e8] sm:$0xff]  ;;  %v774_v52 = vld [vmem:[%s1589_s1 + $0x40] sm:$0xff] }
  0xf3   : > { %v300_v54 = vmul.f32 %v783_v31, %v288_v49  ;;  %v217_v4 = vmul.f32 %v209_v42, %v204_v48  ;;  %v473_v60 = vmul.f32 %v820_v57, %v450_v3  ;;  %v431_v20 = vmul.f32 %v812_v50, %v408_v27  ;;  %v208_v31 = vld [vmem:[%s1589_s1 + $0x8] sm:$0xff]  ;;  %v781_v53 = vld [vmem:[%s1589_s1 + $0x78] sm:$0xff] }
  0xf4   : > { %v389_v9 = vmul.f32 %v804_v16, %v366_v51  ;;  %v827_v49 = vld [vmem:[%s1589_s1 + $0x228] sm:$0xff]  ;;  %v472_v3 = vmul.f32 %v819_v5, %v451_v25 }
  0xf5   : > { %558 = vmatpush.msra.mxu1 %v300_v54  ;;  %580 = vmatpush.msra.mxu2 %v217_v4  ;;  %v811_v4 = vld [vmem:[%s1589_s1 + $0x1a8] sm:$0xff] }
  0xf6   : > { %v803_v50 = vld [vmem:[%s1589_s1 + $0x168] sm:$0xff] }
  0xf7   : > { %842 = vmatpush.msk.msrb.mxu2 %vm521_vm0, %v882_v7  ;;  %559 = vmatpush.msra.mxu1 %v258_v56 }
  0xf9   : > { %652 = vmatpush.msrb.mxu2 %v515_v63  ;;  %v322_v11 = vpop.permute.xlu0 %321  ;;  %v1375_v12 = vpop.permute.xlu1 %401 }
  0xfa   : > { %v324_v17 = vsel %vm323_vm5, %v1283_v18, %v322_v11  ;;  %v331_v19 = vsel %vm323_vm5, %v322_v11, %v308_v32  ;;  %v789_v18 = vld [vmem:[%s1589_s1 + $0xb8] sm:$0xff]  ;;  %v1404_v32 = vld [vmem:[%s1590_s2] sm:$0x7]  ;;  %v1419_v47 = vpop.permute.xlu2 %192  ;;  %v409_v54 = vsel %vm407_vm3, %v1375_v12, %v1268_v1  ;;  %v788_v1 = vld [vmem:[%s1589_s1 + $0xb0] sm:$0xff] }
  0xfb   : > { %653 = vmatpush.msrb.mxu2 %v473_v60  ;;  %v341_v21 = vmul.f32 %v790_v61, %v331_v19  ;;  %v348_v22 = vmul.f32 %v797_v62, %v324_v17  ;;  %837 = vmatmul.msk.f32.vlgmr.msra.gmra.mxu3 %vm517_vm9, %v1404_v32  ;;  %v430_v61 = vmul.f32 %v811_v4, %v409_v54  ;;  %v795_v17 = vld [vmem:[%s1589_s1 + $0xe8] sm:$0xff]  ;;  %v207_v19 = vld [vmem:[%s1589_s1] sm:$0xff] }
  0xfc   : > { %835 = vmatmul.msk.f32.vlgmr.msra.gmra.mxu2 %vm517_vm9, %v1404_v32 }
  0xfd   : > { %654 = vmatpush.msrb.mxu2 %v431_v20  ;;  %537 = vmatpush.msra.mxu0 %v341_v21  ;;  %v214_v20 = vld [vmem:[%s1589_s1 + $0x38] sm:$0xff] }
  0xfe   : > { %677 = vmatpush.msrb.mxu3 %v348_v22 }
  0xff   : > { %655 = vmatpush.msrb.mxu2 %v389_v9 }
 0x101   : > { %656 = vmatpush.msrb.mxu2 %v981_v6  ;;  %v278_v28 = vpop.permute.xlu0 %277 }
 0x102   : > { %v280_v10 = vpop.permute.xlu1 %279  ;;  %v316_v11 = vpop.permute.xlu2 %315 }
 0x103   : > { %657 = vmatpush.msrb.mxu2 %v347_v26  ;;  %v282_v6 = vsel %vm281_vm6, %v278_v28, %v280_v10  ;;  %v289_v34 = vsel %vm281_vm6, %v280_v10, %v266_v43  ;;  %v452_v10 = vsel %vm449_vm2, %v1069_v24, %v1264_v0  ;;  %v810_v24 = vld [vmem:[%s1589_s1 + $0x1a0] sm:$0xff] }
 0x104   : > { %v299_v36 = vmul.f32 %v782_v30, %v289_v34  ;;  %v306_v38 = vmul.f32 %v789_v18, %v282_v6  ;;  %v826_v30 = vld [vmem:[%s1589_s1 + $0x220] sm:$0xff]  ;;  %v410_v34 = vsel %vm407_vm3, %v1103_v37, %v1375_v12  ;;  %v787_v12 = vld [vmem:[%s1589_s1 + $0xa8] sm:$0xff] }
 0x105   : > { %v818_v6 = vld [vmem:[%s1589_s1 + $0x1e0] sm:$0xff] }
 0x106   : > { %538 = vmatpush.msra.mxu0 %v299_v36  ;;  %678 = vmatpush.msrb.mxu3 %v306_v38  ;;  %v471_v0 = vmul.f32 %v818_v6, %v452_v10  ;;  %v802_v36 = vld [vmem:[%s1589_s1 + $0x160] sm:$0xff] }
 0x109   : > { %v1414_v39 = vpop.permute.xlu0 %359 }
 0x10a   : > { %v181_v42 = vpop.permute.xlu1 %180  ;;  %v367_v56 = vsel %vm365_vm4, %v1414_v39, %v1311_v33  ;;  %v368_v37 = vsel %vm365_vm4, %v1126_v46, %v1414_v39  ;;  %v232_v38 = vpop.permute.xlu2 %231 }
 0x10b   : > { %v205_v43 = vsel %vm198_vm8, %v181_v42, %v1327_v35  ;;  %v514_v35 = vmul.f32 %v827_v49, %v1232_v44  ;;  %v388_v16 = vmul.f32 %v803_v50, %v367_v56  ;;  %v779_v49 = vld [vmem:[%s1589_s1 + $0x68] sm:$0xff]  ;;  %v387_v5 = vmul.f32 %v802_v36, %v368_v37 }
 0x10c   : > { %v216_v48 = vmul.f32 %v208_v31, %v205_v43  ;;  %v429_v43 = vmul.f32 %v810_v24, %v410_v34 }
 0x10e   : > { %560 = vmatpush.msra.mxu1 %v216_v48 }
 0x10f   : > { %833 = vmatmul.msk.f32.vlgmr.msra.gmra.mxu1 %vm517_vm9, %v1404_v32 }
 0x110   : > { %840 = vmatpush.msk.msrb.mxu1 %vm521_vm0, %v882_v7 }
 0x111   : > { %v238_v44 = vpop.permute.xlu0 %237 }
 0x112   : > { %632 = vmatpush.msrb.mxu1 %v514_v35  ;;  %v240_v57 = vsel %vm239_vm7, %v1393_v15, %v238_v44  ;;  %v247_v63 = vsel %vm239_vm7, %v238_v44, %v1318_v40  ;;  %v276_v27 = vpop.permute.xlu1 %275  ;;  %v326_v40 = vsel %vm323_vm5, %v316_v11, %v1360_v58  ;;  %v780_v58 = vld [vmem:[%s1589_s1 + $0x70] sm:$0xff]  ;;  %v794_v35 = vld [vmem:[%s1589_s1 + $0xe0] sm:$0xff]  ;;  %v243_v44 = vsel %vm239_vm7, %v1252_v55, %v232_v38 }
 0x113   : > { %v283_v60 = vsel %vm281_vm6, %v276_v27, %v278_v28  ;;  %v257_v62 = vmul.f32 %v774_v52, %v247_v63  ;;  %v264_v33 = vmul.f32 %v781_v53, %v240_v57  ;;  %v346_v22 = vmul.f32 %v795_v17, %v326_v40  ;;  %v786_v52 = vld [vmem:[%s1589_s1 + $0xa0] sm:$0xff]  ;;  %v212_v53 = vld [vmem:[%s1589_s1 + $0x28] sm:$0xff] }
 0x114   : > { %633 = vmatpush.msrb.mxu1 %v472_v3  ;;  %v305_v51 = vmul.f32 %v788_v1, %v283_v60  ;;  %v778_v3 = vld [vmem:[%s1589_s1 + $0x60] sm:$0xff] }
 0x115   : > { %539 = vmatpush.msra.mxu0 %v257_v62  ;;  %679 = vmatpush.msrb.mxu3 %v264_v33  ;;  %v211_v55 = vld [vmem:[%s1589_s1 + $0x20] sm:$0xff]  ;;  %v261_v63 = vmul.f32 %v778_v3, %v243_v44 }
 0x116   : > { %634 = vmatpush.msrb.mxu1 %v430_v61  ;;  %658 = vmatpush.msrb.mxu2 %v305_v51 }
 0x118   : > { %635 = vmatpush.msrb.mxu1 %v388_v16 }
 0x119   : > { %v195_v21 = vpop.permute.xlu0 %194 }
 0x11a   : > { %636 = vmatpush.msrb.mxu1 %v1012_v8  ;;  %v199_v9 = vsel %vm198_vm8, %v1419_v47, %v195_v21  ;;  %v206_v29 = vsel %vm198_vm8, %v195_v21, %v181_v42  ;;  %v234_v23 = vpop.permute.xlu1 %233 }
 0x11b   : > { %v241_v26 = vsel %vm239_vm7, %v234_v23, %v1393_v15  ;;  %v215_v8 = vmul.f32 %v207_v19, %v206_v29  ;;  %v222_v28 = vmul.f32 %v214_v20, %v199_v9  ;;  %v513_v15 = vmul.f32 %v826_v30, %v1237_v45 }
 0x11c   : > { %637 = vmatpush.msrb.mxu1 %v346_v22  ;;  %v263_v18 = vmul.f32 %v780_v58, %v241_v26  ;;  %v242_v46 = vsel %vm239_vm7, %v232_v38, %v234_v23 }
 0x11d   : > { %540 = vmatpush.msra.mxu0 %v215_v8  ;;  %680 = vmatpush.msrb.mxu3 %v222_v28  ;;  %v262_v54 = vmul.f32 %v779_v49, %v242_v46 }
 0x11e   : > { %659 = vmatpush.msrb.mxu2 %v263_v18  ;;  %831 = vmatmul.msk.f32.vlgmr.msra.gmra.mxu0 %vm517_vm9, %v1404_v32 }
 0x11f   : > { %838 = vmatpush.msk.msrb.mxu0 %vm521_vm0, %v882_v7  ;;  %845 = vmatmul.msk.f32.vlgmr.msrb.gmra.mxu3 %vm517_vm9, %v1404_v32  ;;  %v213_v7 = vld [vmem:[%s1589_s1 + $0x30] sm:$0xff] }
 0x121   : > { %612 = vmatpush.msrb.mxu0 %v513_v15  ;;  %v191_v45 = vpop.permute.xlu0 %190 }
 0x122   : > { %v200_v31 = vsel %vm198_vm8, %v191_v45, %v1419_v47  ;;  %v274_v42 = vpop.permute.xlu1 %273  ;;  %v327_v47 = vsel %vm323_vm5, %v1111_v41, %v316_v11 }
 0x123   : > { %613 = vmatpush.msrb.mxu0 %v471_v0  ;;  %v284_v39 = vsel %vm281_vm6, %v274_v42, %v276_v27  ;;  %v221_v48 = vmul.f32 %v213_v7, %v200_v31  ;;  %v285_v4 = vsel %vm281_vm6, %v1155_v59, %v274_v42  ;;  %v345_v41 = vmul.f32 %v794_v35, %v327_v47 }
 0x124   : > { %v304_v25 = vmul.f32 %v787_v12, %v284_v39 }
 0x125   : > { %614 = vmatpush.msrb.mxu0 %v429_v43  ;;  %660 = vmatpush.msrb.mxu2 %v221_v48 }
 0x126   : > { %638 = vmatpush.msrb.mxu1 %v304_v25  ;;  %843 = vmatmul.msk.f32.vlgmr.msrb.gmra.mxu2 %vm517_vm9, %v1404_v32 }
 0x127   : > { %615 = vmatpush.msrb.mxu0 %v387_v5 }
 0x128   : > { %639 = vmatpush.msrb.mxu1 %v262_v54 }
 0x129   : > { %616 = vmatpush.msrb.mxu0 %v933_v2  ;;  %v189_v59 = vpop.permute.xlu0 %188  ;;  %v303_v2 = vmul.f32 %v786_v52, %v285_v4 }
 0x12a   : > { %v201_v1 = vsel %vm198_vm8, %v189_v59, %v191_v45  ;;  %v202_v56 = vsel %vm198_vm8, %v1274_v14, %v189_v59 }
 0x12b   : > { %617 = vmatpush.msrb.mxu0 %v345_v41  ;;  %v220_v57 = vmul.f32 %v212_v53, %v201_v1  ;;  %v219_v27 = vmul.f32 %v211_v55, %v202_v56 }
 0x12d   : > { %618 = vmatpush.msrb.mxu0 %v303_v2  ;;  %640 = vmatpush.msrb.mxu1 %v220_v57 }
 0x12e   : > { %841 = vmatmul.msk.f32.vlgmr.msrb.gmra.mxu1 %vm517_vm9, %v1404_v32 }
 0x12f   : > { %619 = vmatpush.msrb.mxu0 %v261_v63 }
 0x131   : > { %620 = vmatpush.msrb.mxu0 %v219_v27 }
 0x132   : > { %839 = vmatmul.msk.f32.vlgmr.msrb.gmra.mxu0 %vm517_vm9, %v1404_v32 }
 0x17e   : > { %v602_v13 = vpop.f32.mrf.mxu3 }
 0x17f   : > { %v694_v14 = vrot.slane %v602_v13, 4  ;;  %v582_v50 = vpop.f32.mrf.mxu2 }
 0x181   : > { %v699_v60 = vsel %vm697_vm10, %v582_v50, %v694_v14 }
 0x182   : > { %707 = vst [vmem:[%s170_s25 + $0x8] sm:$0x77] %v699_v60 }
 0x18c   : > { %v562_v61 = vpop.f32.mrf.mxu1 }
 0x18d   : > { %v693_v62 = vrot.slane %v562_v61, 4 }
 0x19b   : > { %v542_v33 = vpop.f32.mrf.mxu0 }
 0x19c   : > { %v698_v51 = vsel %vm697_vm10, %v542_v33, %v693_v62 }
 0x19d   : > { %706 = vst [vmem:[%s170_s25] sm:$0x77] %v698_v51 }
 0x1a2   : > { %v682_v11 = vpop.f32.mrf.mxu3 }
 0x1a3   : > { %v696_v32 = vrot.slane %v682_v11, 4 }
 0x1a9   : > { %v662_v16 = vpop.f32.mrf.mxu2 }
 0x1aa   : > { %v701_v17 = vsel %vm697_vm10, %v662_v16, %v696_v32 }
 0x1ab   : > { %v642_v40 = vpop.f32.mrf.mxu1  ;;  %709 = vst [vmem:[%s170_s25 + $0x18] sm:$0x77] %v701_v17 }
 0x1ac   : > { %v695_v19 = vrot.slane %v642_v40, 4 }
 0x1af   : > { %v622_v20 = vpop.f32.mrf.mxu0 }
 0x1b0   : > { %v700_v21 = vsel %vm697_vm10, %v622_v20, %v695_v19 }
 0x1b1   : > { %708 = vst [vmem:[%s170_s25 + $0x10] sm:$0x77] %v700_v21 }
 0x1b2 PF: > { %s13_s12 = sadd.s32 1, %s873_s12  }
 0x1b3   : > { %p10_p4 = scmp.ge.s32.totalorder %s13_s12, 4  }
 0x1b5   :  { %12 = sbr.rel (!%p10_p4) target bundleno = 1 (0x1), region = 69 }

// kernel: emsr_forward.2
= control target key start
LH: loop header
LB: loop body
LE: loop exit
PB: predicated region body
PF: predicated region fallthrough
CT: control target
= control target key end

     0   :  { %s2058_s27 = smov 0   ;;  %s3246_s0 = inlined_call_operand.vmem [shape: f32[2,8,256], index: 0, kind: input, shape index: {}]   ;;  %s3247_s1 = inlined_call_operand.vmem [shape: f32[8,1], index: 1, kind: input, shape index: {}]   ;;  %s3248_s2 = inlined_call_operand.vmem [shape: f32[9,8,256], index: 2, kind: input, shape index: {}]   ;;  %s3249_s3 = inlined_call_operand.vmem [shape: f32[8,73], index: 3, kind: input, shape index: {}]   ;;  %s3250_s4 = inlined_call_operand.vmem [shape: f32[64,8,73], index: 4, kind: input, shape index: {}]   ;;  %s3251_s5 = inlined_call_operand.vmem [shape: f32[8,8,8], index: 5, kind: input, shape index: {}]   ;;  %s3252_s6 = inlined_call_operand.vmem [shape: f32[8,1], index: 6, kind: input, shape index: {}]   ;;  %s3253_s7 = inlined_call_operand.vmem [shape: f32[32,73], index: 7, kind: input, shape index: {}]   ;;  %s3254_s8 = inlined_call_operand.vmem [shape: f32[2,32,256], index: 8, kind: output, shape index: {}]  }
   0x1 LB: > { %s1715_s28 = sadd.s32 4294967295, %s1972_s27   ;;  %p1719_p0 = scmp.ge.s32.totalorder %s1972_s27, 1  ;;  %s1972_s27 = sphi %s2058_s27, %s18_s27  }
   0x2   : > { %p262_p1 = scmp.lt.s32.totalorder %s1972_s27, 3 }
   0x4   : > { %p263_p2 = pnand %p1719_p0, %p262_p1 }
   0x5   : > { %p296_p3 = scmp.lt.s32.totalorder (!%p263_p2), %s1715_s28, 1  ;;  %s1995_s17 = smov (!%p263_p2), 112  }
   0x6   : > { %266 = sbr.rel (%p263_p2) target bundleno = 3170 (0xc62), region = 52  ;;  %s1996_s18 = smov (!%p263_p2), 111  }
   0x7   : > { %s1997_s19 = smov (!%p263_p2), 113   ;;  %s3263_s20 = smov (!%p263_p2), 127  }
   0x8   : > { %s3261_s21 = smov (!%p263_p2), 1   ;;  %s3259_s22 = smov (!%p263_p2), 15  }
   0x9   : > { %s3257_s23 = smov (!%p263_p2), 16   ;;  %s3255_s24 = smov (!%p263_p2), 17  }
   0xa   : > { %s2277_s15 = smov (!%p263_p2), 0  }
   0xb   : > { %v308_v0 = vld [vmem:[%s3247_s1] sm:$0xff]  ;;  %v1994_v1 = vmov 0   ;;  %s3275_s28 = smov (!%p296_p3, %s1715_s28), 1  ;;  %vm418_vm0 = vcmask 1040384   ;;  %v2003_v7 = vmov 1.0   ;;  %v321_v8 = vlaneseq  ;;  %v2129_v13 = vld [vmem:[%s3248_s2 + $0x88] sm:$0xff] }
   0xc   : > { %1928 = vset.pattern.permute.xlu0 %v1994_v1  ;;  %s1829_s9 = sshll.u32 %s3275_s28, 6  ;;  %s1828_s13 = sshll.u32 %s3275_s28, 4  ;;  %1738 = vmatpush.msk.msra.mxu0 %vm418_vm0, %v2003_v7  ;;  %v2124_v12 = vld [vmem:[%s3248_s2 + $0x80] sm:$0xff]  ;;  %v2142_v20 = vld [vmem:[%s3248_s2 + $0x70] sm:$0xff]  ;;  %v2147_v21 = vld [vmem:[%s3248_s2 + $0x78] sm:$0xff]  ;;  %vm414_vm9 = vcmask 596992  }
   0xd   : > { %311 = vperm.xlu0 %1928, %v308_v0   ;;  %s2073_s12 = scalar_lea.vmem %s3254_s8, %s1829_s9  ;;  %s300_s16 = scalar_lea.vmem %s3246_s0, %s1828_s13  ;;  %1740 = vmatpush.msk.msra.mxu1 %vm418_vm0, %v2003_v7  ;;  %v2118_v10 = vand.u32 127, %v321_v8  ;;  %v2156_v26 = vld [vmem:[%s3248_s2 + $0x60] sm:$0xff]  ;;  %v2161_v27 = vld [vmem:[%s3248_s2 + $0x68] sm:$0xff]  ;;  %v2175_v35 = vld [vmem:[%s3248_s2 + $0x50] sm:$0xff] }
   0xe   : > { %v306_v2 = vld [vmem:[%s300_s16] sm:$0xff]  ;;  %v307_v3 = vld [vmem:[%s300_s16 + $0x8] sm:$0xff]  ;;  %v2180_v36 = vld [vmem:[%s3248_s2 + $0x58] sm:$0xff] }
   0xf   : > { %vm406_vm1 = vcmp.lt.s32.totalorder %v2118_v10, 111  ;;  %vm394_vm2 = vcmp.lt.s32.totalorder %v2118_v10, 112  ;;  %vm382_vm3 = vcmp.lt.s32.totalorder %v2118_v10, 113  ;;  %vm370_vm4 = vcmp.lt.s32.totalorder %v2118_v10, 127  ;;  %v2195_v44 = vld [vmem:[%s3248_s2 + $0x30] sm:$0xff]  ;;  %v2200_v45 = vld [vmem:[%s3248_s2 + $0x38] sm:$0xff] }
  0x10   : > { %vm358_vm5 = vcmp.lt.s32.totalorder %v2118_v10, 1  ;;  %vm346_vm6 = vcmp.lt.s32.totalorder %v2118_v10, 15  ;;  %v2209_v50 = vld [vmem:[%s3248_s2 + $0x20] sm:$0xff]  ;;  %v2214_v51 = vld [vmem:[%s3248_s2 + $0x28] sm:$0xff]  ;;  %vm334_vm7 = vcmp.lt.s32.totalorder %v2118_v10, 16  ;;  %v2228_v58 = vld [vmem:[%s3248_s2 + $0x10] sm:$0xff] }
  0x11   : > { %v2233_v59 = vld [vmem:[%s3248_s2 + $0x18] sm:$0xff]  ;;  %vm323_vm8 = vcmp.lt.s32.totalorder %v2118_v10, 17 }
  0x7f   : > { %v312_v4 = vpop.permute.xlu0 %311 }
  0x80   : > { %v2078_v5 = vsub.f32 %v306_v2, %v312_v4  ;;  %v2080_v6 = vsub.f32 %v307_v3, %v312_v4  ;;  %v2245_v3 = vld [vmem:[%s3248_s2] sm:$0xff]  ;;  %v2250_v4 = vld [vmem:[%s3248_s2 + $0x8] sm:$0xff] }
  0x82   : > { %392 = vrot.lane.b32.xlu2 %v2080_v6, %s1995_s17  ;;  %404 = vrot.lane.b32.xlu1 %v2080_v6, %s1996_s18 }
  0x83   : > { %402 = vrot.lane.b32.xlu0 %v2078_v5, %s1996_s18 }
  0x8a   : > { %378 = vrot.lane.b32.xlu2 %v2078_v5, %s1997_s19  ;;  %390 = vrot.lane.b32.xlu1 %v2078_v5, %s1995_s17 }
  0x8b   : > { %380 = vrot.lane.b32.xlu0 %v2080_v6, %s1997_s19 }
  0x92   : > { %368 = vrot.lane.b32.xlu2 %v2080_v6, %s3263_s20  ;;  %366 = vrot.lane.b32.xlu1 %v2078_v5, %s3263_s20 }
  0x93   : > { %354 = vrot.lane.b32.xlu0 %v2078_v5, %s3261_s21 }
  0x9a   : > { %342 = vrot.lane.b32.xlu2 %v2078_v5, %s3259_s22  ;;  %356 = vrot.lane.b32.xlu1 %v2080_v6, %s3261_s21 }
  0x9b   : > { %344 = vrot.lane.b32.xlu0 %v2080_v6, %s3259_s22 }
  0xa2   : > { %332 = vrot.lane.b32.xlu2 %v2080_v6, %s3257_s23  ;;  %330 = vrot.lane.b32.xlu1 %v2078_v5, %s3257_s23 }
  0xa3   : > { %317 = vrot.lane.b32.xlu0 %v2078_v5, %s3255_s24 }
  0xaa   : > { %319 = vrot.lane.b32.xlu1 %v2080_v6, %s3255_s24 }
  0xdc   : > { %v393_v9 = vpop.permute.xlu2 %392 }
  0xe4   : > { %v379_v15 = vpop.permute.xlu2 %378 }
  0xec   : > { %v369_v32 = vpop.permute.xlu2 %368 }
  0xf4   : > { %v405_v11 = vpop.permute.xlu1 %404  ;;  %v343_v43 = vpop.permute.xlu2 %342 }
  0xf5   : > { %v403_v14 = vpop.permute.xlu0 %402 }
  0xf6   : > { %v407_v16 = vsel %vm406_vm1, %v403_v14, %v405_v11  ;;  %v408_v17 = vsel %vm406_vm1, %v405_v11, %v403_v14 }
  0xf7   : > { %v412_v18 = vmul.f32 %v2124_v12, %v407_v16  ;;  %v413_v19 = vmul.f32 %v2129_v13, %v408_v17 }
  0xf9   : > { %429 = vmatpush.msra.mxu0 %v412_v18  ;;  %449 = vmatpush.msra.mxu1 %v413_v19  ;;  %v2267_v18 = vmov 0.0   ;;  %v2269_v19 = vmov 0.0  }
  0xfc   : > { %v391_v22 = vpop.permute.xlu1 %390  ;;  %v333_v60 = vpop.permute.xlu2 %332 }
  0xfd   : > { %v395_v23 = vsel %vm394_vm2, %v391_v22, %v393_v9  ;;  %v396_v24 = vsel %vm394_vm2, %v393_v9, %v391_v22  ;;  %v381_v25 = vpop.permute.xlu0 %380 }
  0xfe   : > { %v383_v28 = vsel %vm382_vm3, %v379_v15, %v381_v25  ;;  %v384_v29 = vsel %vm382_vm3, %v381_v25, %v379_v15  ;;  %v400_v30 = vmul.f32 %v2142_v20, %v395_v23  ;;  %v401_v31 = vmul.f32 %v2147_v21, %v396_v24  ;;  %v316_v15 = vld [vmem:[%s3249_s3] sm:$0xff] }
  0xff   : > { %v388_v33 = vmul.f32 %v2156_v26, %v383_v28  ;;  %v389_v34 = vmul.f32 %v2161_v27, %v384_v29 }
 0x100   : > { %430 = vmatpush.msra.mxu0 %v400_v30  ;;  %450 = vmatpush.msra.mxu1 %v401_v31 }
 0x102   : > { %431 = vmatpush.msra.mxu0 %v388_v33  ;;  %451 = vmatpush.msra.mxu1 %v389_v34 }
 0x104   : > { %v367_v37 = vpop.permute.xlu1 %366 }
 0x105   : > { %v371_v38 = vsel %vm370_vm4, %v367_v37, %v369_v32  ;;  %v372_v39 = vsel %vm370_vm4, %v369_v32, %v367_v37  ;;  %v355_v40 = vpop.permute.xlu0 %354 }
 0x106   : > { %v376_v41 = vmul.f32 %v2175_v35, %v371_v38  ;;  %v377_v42 = vmul.f32 %v2180_v36, %v372_v39 }
 0x108   : > { %432 = vmatpush.msra.mxu0 %v376_v41  ;;  %452 = vmatpush.msra.mxu1 %v377_v42 }
 0x10a   : > { %433 = vmatpush.msra.mxu0 %v2078_v5  ;;  %453 = vmatpush.msra.mxu1 %v2080_v6 }
 0x10c   : > { %v357_v46 = vpop.permute.xlu1 %356 }
 0x10d   : > { %v359_v47 = vsel %vm358_vm5, %v355_v40, %v357_v46  ;;  %v360_v48 = vsel %vm358_vm5, %v357_v46, %v355_v40  ;;  %v345_v49 = vpop.permute.xlu0 %344 }
 0x10e   : > { %v347_v52 = vsel %vm346_vm6, %v343_v43, %v345_v49  ;;  %v348_v53 = vsel %vm346_vm6, %v345_v49, %v343_v43  ;;  %v364_v54 = vmul.f32 %v2195_v44, %v360_v48  ;;  %v365_v55 = vmul.f32 %v2200_v45, %v359_v47 }
 0x10f   : > { %v352_v56 = vmul.f32 %v2209_v50, %v348_v53  ;;  %v353_v57 = vmul.f32 %v2214_v51, %v347_v52 }
 0x110   : > { %434 = vmatpush.msra.mxu0 %v364_v54  ;;  %454 = vmatpush.msra.mxu1 %v365_v55 }
 0x112   : > { %435 = vmatpush.msra.mxu0 %v352_v56  ;;  %455 = vmatpush.msra.mxu1 %v353_v57 }
 0x114   : > { %v331_v61 = vpop.permute.xlu1 %330 }
 0x115   : > { %v335_v62 = vsel %vm334_vm7, %v331_v61, %v333_v60  ;;  %v336_v63 = vsel %vm334_vm7, %v333_v60, %v331_v61  ;;  %v318_v5 = vpop.permute.xlu0 %317 }
 0x116   : > { %v340_v0 = vmul.f32 %v2228_v58, %v336_v63  ;;  %v341_v2 = vmul.f32 %v2233_v59, %v335_v62 }
 0x118   : > { %436 = vmatpush.msra.mxu0 %v340_v0  ;;  %456 = vmatpush.msra.mxu1 %v341_v2 }
 0x11c   : > { %v320_v6 = vpop.permute.xlu1 %319 }
 0x11d   : > { %v324_v8 = vsel %vm323_vm8, %v318_v5, %v320_v6  ;;  %v325_v9 = vsel %vm323_vm8, %v320_v6, %v318_v5 }
 0x11e   : > { %v328_v11 = vmul.f32 %v2245_v3, %v325_v9  ;;  %v329_v14 = vmul.f32 %v2250_v4, %v324_v8 }
 0x120   : > { %437 = vmatpush.msra.mxu0 %v328_v11  ;;  %457 = vmatpush.msra.mxu1 %v329_v14 }
 0x121   : > { %1739 = vmatmul.msk.f32.vlgmr.msra.gmra.mxu0 %vm414_vm9, %v316_v15  ;;  %1741 = vmatmul.msk.f32.vlgmr.msra.gmra.mxu1 %vm414_vm9, %v316_v15 }
 0x19e   : > { %v2263_v16 = vpop.f32.mrf.mxu0   ;;  %v2265_v17 = vpop.f32.mrf.mxu1  }
 0x19f   : > { %v3265_v22 = vmov %v2265_v17  ;;  %v3266_v23 = vmov %v2263_v16 }
 0x1a0 LB: >> { %s2004_s16 = smov 112   ;;  %s2005_s25 = smov 111   ;;  %v2012_v24 = vmov 1.0   ;;  %v2337_v31 = vld [vmem:[%s3248_s2 + $0x80] sm:$0xff]  ;;  %v2342_v32 = vld [vmem:[%s3248_s2 + $0x88] sm:$0xff]  ;;  %v2355_v41 = vld [vmem:[%s3248_s2 + $0x70] sm:$0xff]  ;;  %s1992_s15 = sphi %s2277_s15, %s467_s15   ;;  %v1988_v23 = vphi %v3266_v23, %v1402_v23   ;;  %v1984_v22 = vphi %v3265_v22, %v1403_v22   ;;  %v1980_v19 = vphi %v2269_v19, %v3268_v19   ;;  %v1976_v18 = vphi %v2267_v18, %v3267_v18  }
 0x1a1   : >> { %536 = vrot.lane.b32.xlu1 %v1988_v23, %s2004_s16  ;;  %546 = vrot.lane.b32.xlu0 %v1988_v23, %s2005_s25  ;;  %s2006_s26 = smov 113   ;;  %s2007_s28 = smov 127   ;;  %v2360_v42 = vld [vmem:[%s3248_s2 + $0x78] sm:$0xff]  ;;  %v2371_v49 = vld [vmem:[%s3248_s2 + $0x60] sm:$0xff]  ;;  %vm1406_vm10 = vcmask 64512  }
 0x1a2   : >> { %526 = vrot.lane.b32.xlu2 %v1988_v23, %s2006_s26  ;;  %s2008_s29 = smov 1   ;;  %s2009_s30 = smov 15   ;;  %1758 = vmatpush.msk.msra.mxu0 %vm418_vm0, %v2012_v24  ;;  %v2376_v52 = vld [vmem:[%s3248_s2 + $0x68] sm:$0xff]  ;;  %v2385_v60 = vld [vmem:[%s3248_s2 + $0x50] sm:$0xff]  ;;  %v2390_v61 = vld [vmem:[%s3248_s2 + $0x58] sm:$0xff] }
 0x1a3   : >> { %s2010_s9 = smov 16   ;;  %s2011_s10 = smov 17   ;;  %1760 = vmatpush.msk.msra.mxu1 %vm418_vm0, %v2012_v24  ;;  %1765 = vmatpush.msk.msra.mxu2 %vm418_vm0, %v2012_v24  ;;  %v2403_v8 = vld [vmem:[%s3248_s2 + $0x30] sm:$0xff]  ;;  %v2408_v11 = vld [vmem:[%s3248_s2 + $0x38] sm:$0xff]  ;;  %v2413_v14 = vld [vmem:[%s3248_s2 + $0x20] sm:$0xff] }
 0x1a4   : >> { %1767 = vmatpush.msk.msra.mxu3 %vm418_vm0, %v2012_v24  ;;  %v2418_v15 = vld [vmem:[%s3248_s2 + $0x28] sm:$0xff]  ;;  %s1830_s22 = sshll.u32 %s1992_s15, 6 }
 0x1a5   : >> { %s2462_s13 = scalar_lea.vmem %s3250_s4, %s1830_s22 }
 0x1a9   : >> { %538 = vrot.lane.b32.xlu1 %v1984_v22, %s2004_s16  ;;  %548 = vrot.lane.b32.xlu0 %v1984_v22, %s2005_s25 }
 0x1aa   : >> { %528 = vrot.lane.b32.xlu2 %v1984_v22, %s2006_s26 }
 0x1b1   : >> { %518 = vrot.lane.b32.xlu1 %v1984_v22, %s2007_s28  ;;  %516 = vrot.lane.b32.xlu0 %v1988_v23, %s2007_s28 }
 0x1b2   : >> { %506 = vrot.lane.b32.xlu2 %v1988_v23, %s2008_s29 }
 0x1b9   : >> { %496 = vrot.lane.b32.xlu1 %v1988_v23, %s2009_s30  ;;  %508 = vrot.lane.b32.xlu0 %v1984_v22, %s2008_s29 }
 0x1ba   : >> { %498 = vrot.lane.b32.xlu2 %v1984_v22, %s2009_s30 }
 0x1c1   : >> { %488 = vrot.lane.b32.xlu1 %v1984_v22, %s2010_s9  ;;  %486 = vrot.lane.b32.xlu0 %v1988_v23, %s2010_s9 }
 0x1c2   : >> { %476 = vrot.lane.b32.xlu2 %v1988_v23, %s2011_s10 }
 0x1c9   : >> { %478 = vrot.lane.b32.xlu0 %v1984_v22, %s2011_s10 }
 0x1fc   : >> { %v527_v25 = vpop.permute.xlu2 %526 }
 0x204   : >> { %v529_v30 = vpop.permute.xlu2 %528 }
 0x205   : >> { %v530_v47 = vsel %vm382_vm3, %v527_v25, %v529_v30  ;;  %v531_v48 = vsel %vm382_vm3, %v529_v30, %v527_v25 }
 0x206   : >> { %v534_v56 = vmul.f32 %v2371_v49, %v530_v47  ;;  %v535_v57 = vmul.f32 %v2376_v52, %v531_v48 }
 0x20c   : >> { %v507_v55 = vpop.permute.xlu2 %506 }
 0x213   : >> { %v537_v28 = vpop.permute.xlu1 %536  ;;  %v547_v29 = vpop.permute.xlu0 %546 }
 0x214   : >> { %v499_v9 = vpop.permute.xlu2 %498 }
 0x21b   : >> { %v539_v33 = vpop.permute.xlu1 %538  ;;  %v549_v34 = vpop.permute.xlu0 %548 }
 0x21c   : >> { %v540_v37 = vsel %vm394_vm2, %v537_v28, %v539_v33  ;;  %v541_v38 = vsel %vm394_vm2, %v539_v33, %v537_v28  ;;  %v550_v39 = vsel %vm406_vm1, %v547_v29, %v549_v34  ;;  %v551_v40 = vsel %vm406_vm1, %v549_v34, %v547_v29 }
 0x21d   : >> { %v554_v43 = vmul.f32 %v2337_v31, %v550_v39  ;;  %v555_v46 = vmul.f32 %v2342_v32, %v551_v40  ;;  %v544_v53 = vmul.f32 %v2355_v41, %v540_v37  ;;  %v545_v54 = vmul.f32 %v2360_v42, %v541_v38 }
 0x21f   : >> { %566 = vmatpush.msra.mxu0 %v554_v43  ;;  %586 = vmatpush.msra.mxu1 %v555_v46  ;;  %v2435_v43 = vld [vmem:[%s3248_s2 + $0x10] sm:$0xff]  ;;  %v2440_v46 = vld [vmem:[%s3248_s2 + $0x18] sm:$0xff] }
 0x221   : >> { %567 = vmatpush.msra.mxu0 %v544_v53  ;;  %587 = vmatpush.msra.mxu1 %v545_v54 }
 0x223   : >> { %v519_v62 = vpop.permute.xlu1 %518  ;;  %568 = vmatpush.msra.mxu0 %v534_v56  ;;  %588 = vmatpush.msra.mxu1 %v535_v57  ;;  %v517_v63 = vpop.permute.xlu0 %516 }
 0x224   : >> { %v520_v0 = vsel %vm370_vm4, %v517_v63, %v519_v62  ;;  %v521_v2 = vsel %vm370_vm4, %v519_v62, %v517_v63  ;;  %v477_v57 = vpop.permute.xlu2 %476  ;;  %v2452_v62 = vld [vmem:[%s3248_s2] sm:$0xff]  ;;  %v2457_v63 = vld [vmem:[%s3248_s2 + $0x8] sm:$0xff] }
 0x225   : >> { %v524_v5 = vmul.f32 %v2385_v60, %v520_v0  ;;  %v525_v6 = vmul.f32 %v2390_v61, %v521_v2 }
 0x227   : >> { %569 = vmatpush.msra.mxu0 %v524_v5  ;;  %589 = vmatpush.msra.mxu1 %v525_v6 }
 0x229   : >> { %570 = vmatpush.msra.mxu0 %v1988_v23  ;;  %590 = vmatpush.msra.mxu1 %v1984_v22 }
 0x22b   : >> { %v497_v25 = vpop.permute.xlu1 %496  ;;  %v509_v28 = vpop.permute.xlu0 %508 }
 0x22c   : >> { %v510_v29 = vsel %vm358_vm5, %v507_v55, %v509_v28  ;;  %v511_v30 = vsel %vm358_vm5, %v509_v28, %v507_v55  ;;  %v500_v33 = vsel %vm346_vm6, %v497_v25, %v499_v9  ;;  %v501_v34 = vsel %vm346_vm6, %v499_v9, %v497_v25  ;;  %v475_v25 = vld [vmem:[%s2462_s13] sm:$0xff] }
 0x22d   : >> { %v514_v37 = vmul.f32 %v2403_v8, %v511_v30  ;;  %v515_v38 = vmul.f32 %v2408_v11, %v510_v29  ;;  %v504_v39 = vmul.f32 %v2413_v14, %v501_v34  ;;  %v505_v40 = vmul.f32 %v2418_v15, %v500_v33 }
 0x22f   : >> { %571 = vmatpush.msra.mxu0 %v514_v37  ;;  %591 = vmatpush.msra.mxu1 %v515_v38 }
 0x231   : >> { %572 = vmatpush.msra.mxu0 %v504_v39  ;;  %592 = vmatpush.msra.mxu1 %v505_v40 }
 0x233   : >> { %v489_v47 = vpop.permute.xlu1 %488  ;;  %v487_v48 = vpop.permute.xlu0 %486 }
 0x234   : >> { %v490_v53 = vsel %vm334_vm7, %v487_v48, %v489_v47  ;;  %v491_v54 = vsel %vm334_vm7, %v489_v47, %v487_v48 }
 0x235   : >> { %v494_v55 = vmul.f32 %v2435_v43, %v491_v54  ;;  %v495_v56 = vmul.f32 %v2440_v46, %v490_v53 }
 0x237   : >> { %573 = vmatpush.msra.mxu0 %v494_v55  ;;  %593 = vmatpush.msra.mxu1 %v495_v56 }
 0x23b   : >> { %v479_v0 = vpop.permute.xlu0 %478 }
 0x23c   : >> { %v480_v2 = vsel %vm323_vm8, %v477_v57, %v479_v0  ;;  %v481_v5 = vsel %vm323_vm8, %v479_v0, %v477_v57 }
 0x23d   : >> { %v484_v6 = vmul.f32 %v2452_v62, %v481_v5  ;;  %v485_v9 = vmul.f32 %v2457_v63, %v480_v2 }
 0x23f   : >> { %574 = vmatpush.msra.mxu0 %v484_v6  ;;  %594 = vmatpush.msra.mxu1 %v485_v9 }
 0x240   : >> { %1759 = vmatmul.msk.f32.vlgmr.msra.gmra.mxu0 %vm414_vm9, %v475_v25  ;;  %1761 = vmatmul.msk.f32.vlgmr.msra.gmra.mxu1 %vm414_vm9, %v475_v25 }
 0x241   : >> { %1772 = vmatpush.msk.msrb.mxu0 %vm418_vm0, %v2012_v24  ;;  %1774 = vmatpush.msk.msrb.mxu1 %vm418_vm0, %v2012_v24 }
 0x2bd   : >> { %v576_v28 = vpop.f32.mrf.mxu0  ;;  %v596_v29 = vpop.f32.mrf.mxu1 }
 0x2be   : >> { %v599_v30 = vmax.f32 %v576_v28, 0.0  ;;  %v600_v33 = vmax.f32 %v596_v29, 0.0 }
 0x2c0   : >> { %653 = vrot.lane.b32.xlu0 %v599_v30, %s2004_s16  ;;  %661 = vrot.lane.b32.xlu1 %v599_v30, %s2005_s25 }
 0x2c1   : >> { %663 = vrot.lane.b32.xlu2 %v600_v33, %s2005_s25 }
 0x2c8   : >> { %647 = vrot.lane.b32.xlu0 %v600_v33, %s2006_s26  ;;  %655 = vrot.lane.b32.xlu1 %v600_v33, %s2004_s16 }
 0x2c9   : >> { %645 = vrot.lane.b32.xlu2 %v599_v30, %s2006_s26 }
 0x2d0   : >> { %629 = vrot.lane.b32.xlu0 %v599_v30, %s2008_s29  ;;  %637 = vrot.lane.b32.xlu1 %v599_v30, %s2007_s28 }
 0x2d1   : >> { %639 = vrot.lane.b32.xlu2 %v600_v33, %s2007_s28 }
 0x2d8   : >> { %623 = vrot.lane.b32.xlu0 %v600_v33, %s2009_s30  ;;  %631 = vrot.lane.b32.xlu1 %v600_v33, %s2008_s29 }
 0x2d9   : >> { %621 = vrot.lane.b32.xlu2 %v599_v30, %s2009_s30 }
 0x2e0   : >> { %605 = vrot.lane.b32.xlu0 %v599_v30, %s2011_s10  ;;  %613 = vrot.lane.b32.xlu1 %v599_v30, %s2010_s9 }
 0x2e1   : >> { %615 = vrot.lane.b32.xlu2 %v600_v33, %s2010_s9 }
 0x2e8   : >> { %607 = vrot.lane.b32.xlu1 %v600_v33, %s2011_s10 }
 0x31b   : >> { %v664_v34 = vpop.permute.xlu2 %663 }
 0x323   : >> { %v646_v47 = vpop.permute.xlu2 %645 }
 0x32b   : >> { %v640_v9 = vpop.permute.xlu2 %639 }
 0x332   : >> { %v654_v37 = vpop.permute.xlu0 %653  ;;  %v662_v38 = vpop.permute.xlu1 %661 }
 0x333   : >> { %v665_v39 = vsel %vm406_vm1, %v662_v38, %v664_v34  ;;  %v666_v40 = vsel %vm406_vm1, %v664_v34, %v662_v38 }
 0x334   : >> { %v667_v48 = vmul.f32 %v2337_v31, %v665_v39  ;;  %v668_v53 = vmul.f32 %v2342_v32, %v666_v40 }
 0x336   : >> { %679 = vmatpush.msra.mxu2 %v667_v48  ;;  %699 = vmatpush.msra.mxu3 %v668_v53 }
 0x33a   : >> { %v648_v54 = vpop.permute.xlu0 %647  ;;  %v656_v55 = vpop.permute.xlu1 %655 }
 0x33b   : >> { %v649_v56 = vsel %vm382_vm3, %v646_v47, %v648_v54  ;;  %v650_v57 = vsel %vm382_vm3, %v648_v54, %v646_v47  ;;  %v657_v0 = vsel %vm394_vm2, %v654_v37, %v656_v55  ;;  %v658_v2 = vsel %vm394_vm2, %v656_v55, %v654_v37  ;;  %v622_v47 = vpop.permute.xlu2 %621 }
 0x33c   : >> { %v659_v5 = vmul.f32 %v2355_v41, %v657_v0  ;;  %v660_v6 = vmul.f32 %v2360_v42, %v658_v2  ;;  %v651_v25 = vmul.f32 %v2371_v49, %v649_v56  ;;  %v652_v28 = vmul.f32 %v2376_v52, %v650_v57 }
 0x33e   : >> { %680 = vmatpush.msra.mxu2 %v659_v5  ;;  %700 = vmatpush.msra.mxu3 %v660_v6 }
 0x340   : >> { %681 = vmatpush.msra.mxu2 %v651_v25  ;;  %701 = vmatpush.msra.mxu3 %v652_v28 }
 0x342   : >> { %v630_v29 = vpop.permute.xlu0 %629  ;;  %v638_v34 = vpop.permute.xlu1 %637 }
 0x343   : >> { %v641_v38 = vsel %vm370_vm4, %v638_v34, %v640_v9  ;;  %v642_v37 = vsel %vm370_vm4, %v640_v9, %v638_v34  ;;  %v616_v5 = vpop.permute.xlu2 %615 }
 0x344   : >> { %v643_v39 = vmul.f32 %v2385_v60, %v641_v38  ;;  %v644_v40 = vmul.f32 %v2390_v61, %v642_v37 }
 0x346   : >> { %682 = vmatpush.msra.mxu2 %v643_v39  ;;  %702 = vmatpush.msra.mxu3 %v644_v40 }
 0x348   : >> { %683 = vmatpush.msra.mxu2 %v599_v30  ;;  %703 = vmatpush.msra.mxu3 %v600_v33 }
 0x34a   : >> { %v624_v48 = vpop.permute.xlu0 %623  ;;  %v632_v53 = vpop.permute.xlu1 %631 }
 0x34b   : >> { %v625_v54 = vsel %vm346_vm6, %v622_v47, %v624_v48  ;;  %v626_v55 = vsel %vm346_vm6, %v624_v48, %v622_v47  ;;  %v633_v56 = vsel %vm358_vm5, %v630_v29, %v632_v53  ;;  %v634_v57 = vsel %vm358_vm5, %v632_v53, %v630_v29  ;;  %v1764_v48 = vld [vmem:[%s2462_s13 + $0x8] sm:$0xff] }
 0x34c   : >> { %v635_v0 = vmul.f32 %v2403_v8, %v634_v57  ;;  %v636_v2 = vmul.f32 %v2408_v11, %v633_v56  ;;  %v627_v30 = vmul.f32 %v2413_v14, %v626_v55  ;;  %v628_v33 = vmul.f32 %v2418_v15, %v625_v54 }
 0x34e   : >> { %684 = vmatpush.msra.mxu2 %v635_v0  ;;  %704 = vmatpush.msra.mxu3 %v636_v2 }
 0x350   : >> { %685 = vmatpush.msra.mxu2 %v627_v30  ;;  %705 = vmatpush.msra.mxu3 %v628_v33 }
 0x352   : >> { %v614_v6 = vpop.permute.xlu1 %613  ;;  %v606_v34 = vpop.permute.xlu0 %605 }
 0x353   : >> { %v617_v9 = vsel %vm334_vm7, %v614_v6, %v616_v5  ;;  %v618_v25 = vsel %vm334_vm7, %v616_v5, %v614_v6 }
 0x354   : >> { %v619_v28 = vmul.f32 %v2435_v43, %v618_v25  ;;  %v620_v29 = vmul.f32 %v2440_v46, %v617_v9 }
 0x356   : >> { %686 = vmatpush.msra.mxu2 %v619_v28  ;;  %706 = vmatpush.msra.mxu3 %v620_v29 }
 0x35a   : >> { %v608_v38 = vpop.permute.xlu1 %607 }
 0x35b   : >> { %v609_v37 = vsel %vm323_vm8, %v606_v34, %v608_v38  ;;  %v610_v39 = vsel %vm323_vm8, %v608_v38, %v606_v34 }
 0x35c   : >> { %v611_v40 = vmul.f32 %v610_v39, %v2452_v62  ;;  %v612_v47 = vmul.f32 %v609_v37, %v2457_v63 }
 0x35e   : >> { %687 = vmatpush.msra.mxu2 %v611_v40  ;;  %707 = vmatpush.msra.mxu3 %v612_v47 }
 0x35f   : >> { %1766 = vmatmul.msk.f32.vlgmr.msra.gmra.mxu2 %vm414_vm9, %v1764_v48  ;;  %1768 = vmatmul.msk.f32.vlgmr.msra.gmra.mxu3 %vm414_vm9, %v1764_v48 }
 0x360   : >> { %1780 = vmatpush.msk.msrb.mxu2 %vm418_vm0, %v2012_v24  ;;  %1782 = vmatpush.msk.msrb.mxu3 %vm418_vm0, %v2012_v24 }
 0x3e2   : >> { %v689_v53 = vpop.f32.mrf.mxu2  ;;  %v709_v54 = vpop.f32.mrf.mxu3 }
 0x3e3   : >> { %v712_v55 = vmul.f32 0.1, %v689_v53  ;;  %v713_v56 = vmul.f32 0.1, %v709_v54 }
 0x3e5   : >> { %v2549_v57 = vadd.f32 %v1988_v23, %v712_v55  ;;  %v2552_v0 = vadd.f32 %v1984_v22, %v713_v56 }
 0x3e7   : >> { %770 = vrot.lane.b32.xlu1 %v2549_v57, %s2004_s16  ;;  %778 = vrot.lane.b32.xlu2 %v2549_v57, %s2005_s25 }
 0x3e8   : >> { %780 = vrot.lane.b32.xlu0 %v2552_v0, %s2005_s25 }
 0x3ef   : >> { %764 = vrot.lane.b32.xlu1 %v2552_v0, %s2006_s26  ;;  %772 = vrot.lane.b32.xlu2 %v2552_v0, %s2004_s16 }
 0x3f0   : >> { %762 = vrot.lane.b32.xlu0 %v2549_v57, %s2006_s26 }
 0x3f7   : >> { %746 = vrot.lane.b32.xlu1 %v2549_v57, %s2008_s29  ;;  %754 = vrot.lane.b32.xlu2 %v2549_v57, %s2007_s28 }
 0x3f8   : >> { %756 = vrot.lane.b32.xlu0 %v2552_v0, %s2007_s28 }
 0x3ff   : >> { %740 = vrot.lane.b32.xlu1 %v2552_v0, %s2009_s30  ;;  %748 = vrot.lane.b32.xlu2 %v2552_v0, %s2008_s29 }
 0x400   : >> { %738 = vrot.lane.b32.xlu0 %v2549_v57, %s2009_s30 }
 0x407   : >> { %722 = vrot.lane.b32.xlu1 %v2549_v57, %s2011_s10  ;;  %730 = vrot.lane.b32.xlu2 %v2549_v57, %s2010_s9 }
 0x408   : >> { %732 = vrot.lane.b32.xlu0 %v2552_v0, %s2010_s9 }
 0x40f   : >> { %724 = vrot.lane.b32.xlu2 %v2552_v0, %s2011_s10 }
 0x441   : >> { %v779_v22 = vpop.permute.xlu2 %778 }
 0x449   : >> { %v773_v23 = vpop.permute.xlu2 %772 }
 0x451   : >> { %v755_v25 = vpop.permute.xlu2 %754 }
 0x459   : >> { %v771_v2 = vpop.permute.xlu1 %770  ;;  %v749_v54 = vpop.permute.xlu2 %748 }
 0x45a   : >> { %v781_v30 = vpop.permute.xlu0 %780  ;;  %v774_v33 = vsel %vm394_vm2, %v771_v2, %v773_v23  ;;  %v775_v5 = vsel %vm394_vm2, %v773_v23, %v771_v2 }
 0x45b   : >> { %v782_v6 = vsel %vm406_vm1, %v779_v22, %v781_v30  ;;  %v783_v9 = vsel %vm406_vm1, %v781_v30, %v779_v22  ;;  %v776_v34 = vmul.f32 %v2355_v41, %v774_v33  ;;  %v777_v38 = vmul.f32 %v2360_v42, %v775_v5 }
 0x45c   : >> { %v784_v28 = vmul.f32 %v2337_v31, %v782_v6  ;;  %v785_v29 = vmul.f32 %v2342_v32, %v783_v9 }
 0x45e   : >> { %796 = vmatpush.msrb.mxu0 %v784_v28  ;;  %816 = vmatpush.msrb.mxu1 %v785_v29 }
 0x460   : >> { %797 = vmatpush.msrb.mxu0 %v776_v34  ;;  %817 = vmatpush.msrb.mxu1 %v777_v38 }
 0x461   : >> { %v765_v37 = vpop.permute.xlu1 %764  ;;  %v731_v6 = vpop.permute.xlu2 %730 }
 0x462   : >> { %v763_v39 = vpop.permute.xlu0 %762 }
 0x463   : >> { %v766_v40 = vsel %vm382_vm3, %v763_v39, %v765_v37  ;;  %v767_v47 = vsel %vm382_vm3, %v765_v37, %v763_v39 }
 0x464   : >> { %v768_v48 = vmul.f32 %v2371_v49, %v766_v40  ;;  %v769_v53 = vmul.f32 %v2376_v52, %v767_v47 }
 0x466   : >> { %798 = vmatpush.msrb.mxu0 %v768_v48  ;;  %818 = vmatpush.msrb.mxu1 %v769_v53 }
 0x469   : >> { %v747_v55 = vpop.permute.xlu1 %746  ;;  %v725_v47 = vpop.permute.xlu2 %724 }
 0x46a   : >> { %v757_v56 = vpop.permute.xlu0 %756  ;;  %v750_v33 = vsel %vm358_vm5, %v747_v55, %v749_v54  ;;  %v751_v5 = vsel %vm358_vm5, %v749_v54, %v747_v55 }
 0x46b   : >> { %v758_v22 = vsel %vm370_vm4, %v755_v25, %v757_v56  ;;  %v759_v23 = vsel %vm370_vm4, %v757_v56, %v755_v25  ;;  %v752_v9 = vmul.f32 %v2403_v8, %v751_v5  ;;  %v753_v25 = vmul.f32 %v2408_v11, %v750_v33  ;;  %v1771_v33 = vld [vmem:[%s2462_s13 + $0x10] sm:$0xff] }
 0x46c   : >> { %v760_v2 = vmul.f32 %v2385_v60, %v758_v22  ;;  %v761_v30 = vmul.f32 %v2390_v61, %v759_v23 }
 0x46e   : >> { %799 = vmatpush.msrb.mxu0 %v760_v2  ;;  %819 = vmatpush.msrb.mxu1 %v761_v30 }
 0x470   : >> { %800 = vmatpush.msrb.mxu0 %v2549_v57  ;;  %820 = vmatpush.msrb.mxu1 %v2552_v0 }
 0x471   : >> { %v741_v28 = vpop.permute.xlu1 %740 }
 0x472   : >> { %801 = vmatpush.msrb.mxu0 %v752_v9  ;;  %821 = vmatpush.msrb.mxu1 %v753_v25  ;;  %v739_v29 = vpop.permute.xlu0 %738 }
 0x473   : >> { %v742_v34 = vsel %vm346_vm6, %v739_v29, %v741_v28  ;;  %v743_v38 = vsel %vm346_vm6, %v741_v28, %v739_v29 }
 0x474   : >> { %v744_v37 = vmul.f32 %v2413_v14, %v743_v38  ;;  %v745_v39 = vmul.f32 %v2418_v15, %v742_v34 }
 0x476   : >> { %802 = vmatpush.msrb.mxu0 %v744_v37  ;;  %822 = vmatpush.msrb.mxu1 %v745_v39 }
 0x479   : >> { %v723_v40 = vpop.permute.xlu1 %722 }
 0x47a   : >> { %v733_v48 = vpop.permute.xlu0 %732  ;;  %v726_v53 = vsel %vm323_vm8, %v723_v40, %v725_v47  ;;  %v727_v54 = vsel %vm323_vm8, %v725_v47, %v723_v40 }
 0x47b   : >> { %v734_v55 = vsel %vm334_vm7, %v731_v6, %v733_v48  ;;  %v735_v56 = vsel %vm334_vm7, %v733_v48, %v731_v6  ;;  %v728_v2 = vmul.f32 %v727_v54, %v2452_v62  ;;  %v729_v30 = vmul.f32 %v726_v53, %v2457_v63 }
 0x47c   : >> { %v736_v22 = vmul.f32 %v2435_v43, %v735_v56  ;;  %v737_v23 = vmul.f32 %v2440_v46, %v734_v55 }
 0x47e   : >> { %803 = vmatpush.msrb.mxu0 %v736_v22  ;;  %823 = vmatpush.msrb.mxu1 %v737_v23 }
 0x480   : >> { %804 = vmatpush.msrb.mxu0 %v728_v2  ;;  %824 = vmatpush.msrb.mxu1 %v729_v30 }
 0x481   : >> { %1773 = vmatmul.msk.f32.vlgmr.msrb.gmra.mxu0 %vm414_vm9, %v1771_v33  ;;  %1775 = vmatmul.msk.f32.vlgmr.msrb.gmra.mxu1 %vm414_vm9, %v1771_v33 }
 0x482   : >> { %1787 = vmatpush.msk.msra.mxu0 %vm418_vm0, %v2012_v24  ;;  %1789 = vmatpush.msk.msra.mxu1 %vm418_vm0, %v2012_v24 }
 0x4fe   : >> { %v806_v5 = vpop.f32.mrf.mxu0  ;;  %v826_v6 = vpop.f32.mrf.mxu1 }
 0x4ff   : >> { %v829_v9 = vmax.f32 %v806_v5, 0.0  ;;  %v830_v25 = vmax.f32 %v826_v6, 0.0 }
 0x501   : >> { %883 = vrot.lane.b32.xlu2 %v829_v9, %s2004_s16  ;;  %891 = vrot.lane.b32.xlu0 %v829_v9, %s2005_s25 }
 0x502   : >> { %893 = vrot.lane.b32.xlu1 %v830_v25, %s2005_s25 }
 0x509   : >> { %877 = vrot.lane.b32.xlu2 %v830_v25, %s2006_s26  ;;  %885 = vrot.lane.b32.xlu0 %v830_v25, %s2004_s16 }
 0x50a   : >> { %875 = vrot.lane.b32.xlu1 %v829_v9, %s2006_s26 }
 0x511   : >> { %859 = vrot.lane.b32.xlu2 %v829_v9, %s2008_s29  ;;  %867 = vrot.lane.b32.xlu0 %v829_v9, %s2007_s28 }
 0x512   : >> { %869 = vrot.lane.b32.xlu1 %v830_v25, %s2007_s28 }
 0x519   : >> { %853 = vrot.lane.b32.xlu2 %v830_v25, %s2009_s30  ;;  %861 = vrot.lane.b32.xlu0 %v830_v25, %s2008_s29 }
 0x51a   : >> { %851 = vrot.lane.b32.xlu1 %v829_v9, %s2009_s30 }
 0x521   : >> { %835 = vrot.lane.b32.xlu2 %v829_v9, %s2011_s10  ;;  %843 = vrot.lane.b32.xlu0 %v829_v9, %s2010_s9 }
 0x522   : >> { %845 = vrot.lane.b32.xlu1 %v830_v25, %s2010_s9 }
 0x529   : >> { %837 = vrot.lane.b32.xlu0 %v830_v25, %s2011_s10 }
 0x55b   : >> { %v884_v28 = vpop.permute.xlu2 %883 }
 0x563   : >> { %v878_v47 = vpop.permute.xlu2 %877 }
 0x56b   : >> { %v860_v5 = vpop.permute.xlu2 %859 }
 0x573   : >> { %v892_v29 = vpop.permute.xlu0 %891 }
 0x574   : >> { %v894_v34 = vpop.permute.xlu1 %893 }
 0x575   : >> { %v895_v38 = vsel %vm406_vm1, %v892_v29, %v894_v34  ;;  %v896_v37 = vsel %vm406_vm1, %v894_v34, %v892_v29 }
 0x576   : >> { %v897_v39 = vmul.f32 %v2337_v31, %v895_v38  ;;  %v898_v40 = vmul.f32 %v2342_v32, %v896_v37 }
 0x578   : >> { %909 = vmatpush.msrb.mxu2 %v897_v39  ;;  %929 = vmatpush.msrb.mxu3 %v898_v40  ;;  %v854_v40 = vpop.permute.xlu2 %853 }
 0x57b   : >> { %v886_v48 = vpop.permute.xlu0 %885 }
 0x57c   : >> { %v887_v53 = vsel %vm394_vm2, %v884_v28, %v886_v48  ;;  %v888_v54 = vsel %vm394_vm2, %v886_v48, %v884_v28  ;;  %v876_v55 = vpop.permute.xlu1 %875 }
 0x57d   : >> { %v879_v56 = vsel %vm382_vm3, %v876_v55, %v878_v47  ;;  %v880_v22 = vsel %vm382_vm3, %v878_v47, %v876_v55  ;;  %v889_v23 = vmul.f32 %v2355_v41, %v887_v53  ;;  %v890_v2 = vmul.f32 %v2360_v42, %v888_v54 }
 0x57e   : >> { %v881_v30 = vmul.f32 %v2371_v49, %v879_v56  ;;  %v882_v33 = vmul.f32 %v2376_v52, %v880_v22 }
 0x57f   : >> { %910 = vmatpush.msrb.mxu2 %v889_v23  ;;  %930 = vmatpush.msrb.mxu3 %v890_v2 }
 0x581   : >> { %911 = vmatpush.msrb.mxu2 %v881_v30  ;;  %931 = vmatpush.msrb.mxu3 %v882_v33 }
 0x583   : >> { %v868_v6 = vpop.permute.xlu0 %867 }
 0x584   : >> { %v870_v28 = vpop.permute.xlu1 %869 }
 0x585   : >> { %v871_v29 = vsel %vm370_vm4, %v868_v6, %v870_v28  ;;  %v872_v34 = vsel %vm370_vm4, %v870_v28, %v868_v6  ;;  %v836_v28 = vpop.permute.xlu2 %835 }
 0x586   : >> { %v873_v38 = vmul.f32 %v2385_v60, %v871_v29  ;;  %v874_v37 = vmul.f32 %v2390_v61, %v872_v34 }
 0x588   : >> { %912 = vmatpush.msrb.mxu2 %v873_v38  ;;  %932 = vmatpush.msrb.mxu3 %v874_v37 }
 0x58a   : >> { %913 = vmatpush.msrb.mxu2 %v829_v9  ;;  %933 = vmatpush.msrb.mxu3 %v830_v25 }
 0x58b   : >> { %v862_v39 = vpop.permute.xlu0 %861 }
 0x58c   : >> { %v863_v47 = vsel %vm358_vm5, %v860_v5, %v862_v39  ;;  %v864_v48 = vsel %vm358_vm5, %v862_v39, %v860_v5  ;;  %v852_v53 = vpop.permute.xlu1 %851 }
 0x58d   : >> { %v855_v54 = vsel %vm346_vm6, %v852_v53, %v854_v40  ;;  %v856_v55 = vsel %vm346_vm6, %v854_v40, %v852_v53  ;;  %v865_v56 = vmul.f32 %v2403_v8, %v864_v48  ;;  %v866_v9 = vmul.f32 %v2408_v11, %v863_v47  ;;  %v1779_v40 = vld [vmem:[%s2462_s13 + $0x18] sm:$0xff] }
 0x58e   : >> { %v857_v25 = vmul.f32 %v2413_v14, %v856_v55  ;;  %v858_v22 = vmul.f32 %v2418_v15, %v855_v54 }
 0x58f   : >> { %914 = vmatpush.msrb.mxu2 %v865_v56  ;;  %934 = vmatpush.msrb.mxu3 %v866_v9 }
 0x591   : >> { %915 = vmatpush.msrb.mxu2 %v857_v25  ;;  %935 = vmatpush.msrb.mxu3 %v858_v22 }
 0x593   : >> { %v844_v23 = vpop.permute.xlu0 %843 }
 0x594   : >> { %v846_v2 = vpop.permute.xlu1 %845 }
 0x595   : >> { %v847_v30 = vsel %vm334_vm7, %v844_v23, %v846_v2  ;;  %v848_v33 = vsel %vm334_vm7, %v846_v2, %v844_v23 }
 0x596   : >> { %v849_v5 = vmul.f32 %v2435_v43, %v848_v33  ;;  %v850_v6 = vmul.f32 %v2440_v46, %v847_v30 }
 0x598   : >> { %916 = vmatpush.msrb.mxu2 %v849_v5  ;;  %936 = vmatpush.msrb.mxu3 %v850_v6 }
 0x59b   : >> { %v838_v29 = vpop.permute.xlu0 %837 }
 0x59c   : >> { %v839_v34 = vsel %vm323_vm8, %v836_v28, %v838_v29  ;;  %v840_v38 = vsel %vm323_vm8, %v838_v29, %v836_v28 }
 0x59d   : >> { %v841_v37 = vmul.f32 %v840_v38, %v2452_v62  ;;  %v842_v39 = vmul.f32 %v839_v34, %v2457_v63 }
 0x59f   : >> { %917 = vmatpush.msrb.mxu2 %v841_v37  ;;  %937 = vmatpush.msrb.mxu3 %v842_v39 }
 0x5a0   : >> { %1781 = vmatmul.msk.f32.vlgmr.msrb.gmra.mxu2 %vm414_vm9, %v1779_v40  ;;  %1783 = vmatmul.msk.f32.vlgmr.msrb.gmra.mxu3 %vm414_vm9, %v1779_v40 }
 0x5a1   : >> { %1795 = vmatpush.msk.msra.mxu2 %vm418_vm0, %v2012_v24  ;;  %1797 = vmatpush.msk.msra.mxu3 %vm418_vm0, %v2012_v24 }
 0x623   : >> { %v919_v47 = vpop.f32.mrf.mxu2  ;;  %v939_v48 = vpop.f32.mrf.mxu3 }
 0x624   : >> { %v942_v53 = vmul.f32 0.1, %v919_v47  ;;  %v943_v54 = vmul.f32 0.1, %v939_v48 }
 0x626   : >> { %v2715_v55 = vadd.f32 %v942_v53, %v2549_v57  ;;  %v2718_v56 = vadd.f32 %v943_v54, %v2552_v0 }
 0x628   : >> { %999 = vrot.lane.b32.xlu0 %v2715_v55, %s2004_s16  ;;  %1007 = vrot.lane.b32.xlu1 %v2715_v55, %s2005_s25 }
 0x629   : >> { %1009 = vrot.lane.b32.xlu2 %v2718_v56, %s2005_s25 }
 0x630   : >> { %993 = vrot.lane.b32.xlu0 %v2718_v56, %s2006_s26  ;;  %1001 = vrot.lane.b32.xlu1 %v2718_v56, %s2004_s16 }
 0x631   : >> { %991 = vrot.lane.b32.xlu2 %v2715_v55, %s2006_s26 }
 0x638   : >> { %975 = vrot.lane.b32.xlu0 %v2715_v55, %s2008_s29  ;;  %983 = vrot.lane.b32.xlu1 %v2715_v55, %s2007_s28 }
 0x639   : >> { %985 = vrot.lane.b32.xlu2 %v2718_v56, %s2007_s28 }
 0x640   : >> { %969 = vrot.lane.b32.xlu0 %v2718_v56, %s2009_s30  ;;  %977 = vrot.lane.b32.xlu1 %v2718_v56, %s2008_s29 }
 0x641   : >> { %967 = vrot.lane.b32.xlu2 %v2715_v55, %s2009_s30 }
 0x648   : >> { %951 = vrot.lane.b32.xlu0 %v2715_v55, %s2011_s10  ;;  %959 = vrot.lane.b32.xlu1 %v2715_v55, %s2010_s9 }
 0x649   : >> { %961 = vrot.lane.b32.xlu2 %v2718_v56, %s2010_s9 }
 0x650   : >> { %953 = vrot.lane.b32.xlu1 %v2718_v56, %s2011_s10 }
 0x683   : >> { %v1010_v57 = vpop.permute.xlu2 %1009 }
 0x68b   : >> { %v992_v23 = vpop.permute.xlu2 %991 }
 0x693   : >> { %v986_v39 = vpop.permute.xlu2 %985 }
 0x69a   : >> { %v1000_v0 = vpop.permute.xlu0 %999  ;;  %v1008_v9 = vpop.permute.xlu1 %1007 }
 0x69b   : >> { %v1011_v25 = vsel %vm406_vm1, %v1008_v9, %v1010_v57  ;;  %v1012_v22 = vsel %vm406_vm1, %v1010_v57, %v1008_v9 }
 0x69c   : >> { %v1013_v2 = vmul.f32 %v2337_v31, %v1011_v25  ;;  %v1014_v30 = vmul.f32 %v2342_v32, %v1012_v22  ;;  %v968_v25 = vpop.permute.xlu2 %967 }
 0x69e   : >> { %1025 = vmatpush.msra.mxu0 %v1013_v2  ;;  %1045 = vmatpush.msra.mxu1 %v1014_v30 }
 0x6a2   : >> { %v994_v33 = vpop.permute.xlu0 %993  ;;  %v1002_v5 = vpop.permute.xlu1 %1001 }
 0x6a3   : >> { %v995_v6 = vsel %vm382_vm3, %v992_v23, %v994_v33  ;;  %v996_v28 = vsel %vm382_vm3, %v994_v33, %v992_v23  ;;  %v1003_v29 = vsel %vm394_vm2, %v1000_v0, %v1002_v5  ;;  %v1004_v34 = vsel %vm394_vm2, %v1002_v5, %v1000_v0 }
 0x6a4   : >> { %v1005_v38 = vmul.f32 %v2355_v41, %v1003_v29  ;;  %v1006_v37 = vmul.f32 %v2360_v42, %v1004_v34  ;;  %v997_v40 = vmul.f32 %v2371_v49, %v995_v6  ;;  %v998_v47 = vmul.f32 %v2376_v52, %v996_v28 }
 0x6a6   : >> { %1026 = vmatpush.msra.mxu0 %v1005_v38  ;;  %1046 = vmatpush.msra.mxu1 %v1006_v37  ;;  %v962_v38 = vpop.permute.xlu2 %961 }
 0x6a8   : >> { %1027 = vmatpush.msra.mxu0 %v997_v40  ;;  %1047 = vmatpush.msra.mxu1 %v998_v47 }
 0x6aa   : >> { %v976_v48 = vpop.permute.xlu0 %975  ;;  %v984_v53 = vpop.permute.xlu1 %983 }
 0x6ab   : >> { %v987_v54 = vsel %vm370_vm4, %v984_v53, %v986_v39  ;;  %v988_v57 = vsel %vm370_vm4, %v986_v39, %v984_v53 }
 0x6ac   : >> { %v989_v0 = vmul.f32 %v2385_v60, %v987_v54  ;;  %v990_v9 = vmul.f32 %v2390_v61, %v988_v57 }
 0x6ae   : >> { %1028 = vmatpush.msra.mxu0 %v989_v0  ;;  %1048 = vmatpush.msra.mxu1 %v990_v9 }
 0x6b0   : >> { %1029 = vmatpush.msra.mxu0 %v2715_v55  ;;  %1049 = vmatpush.msra.mxu1 %v2718_v56 }
 0x6b2   : >> { %v970_v22 = vpop.permute.xlu0 %969  ;;  %v978_v23 = vpop.permute.xlu1 %977 }
 0x6b3   : >> { %v971_v2 = vsel %vm346_vm6, %v968_v25, %v970_v22  ;;  %v972_v30 = vsel %vm346_vm6, %v970_v22, %v968_v25  ;;  %v979_v33 = vsel %vm358_vm5, %v976_v48, %v978_v23  ;;  %v980_v5 = vsel %vm358_vm5, %v978_v23, %v976_v48  ;;  %v1786_v22 = vld [vmem:[%s2462_s13 + $0x20] sm:$0xff] }
 0x6b4   : >> { %v981_v6 = vmul.f32 %v2403_v8, %v980_v5  ;;  %v982_v28 = vmul.f32 %v2408_v11, %v979_v33  ;;  %v973_v29 = vmul.f32 %v2413_v14, %v972_v30  ;;  %v974_v34 = vmul.f32 %v2418_v15, %v971_v2 }
 0x6b6   : >> { %1030 = vmatpush.msra.mxu0 %v981_v6  ;;  %1050 = vmatpush.msra.mxu1 %v982_v28 }
 0x6b8   : >> { %1031 = vmatpush.msra.mxu0 %v973_v29  ;;  %1051 = vmatpush.msra.mxu1 %v974_v34 }
 0x6ba   : >> { %v960_v37 = vpop.permute.xlu1 %959  ;;  %v952_v53 = vpop.permute.xlu0 %951 }
 0x6bb   : >> { %v963_v39 = vsel %vm334_vm7, %v960_v37, %v962_v38  ;;  %v964_v40 = vsel %vm334_vm7, %v962_v38, %v960_v37 }
 0x6bc   : >> { %v965_v47 = vmul.f32 %v2435_v43, %v964_v40  ;;  %v966_v48 = vmul.f32 %v2440_v46, %v963_v39 }
 0x6be   : >> { %1032 = vmatpush.msra.mxu0 %v965_v47  ;;  %1052 = vmatpush.msra.mxu1 %v966_v48 }
 0x6c2   : >> { %v954_v54 = vpop.permute.xlu1 %953 }
 0x6c3   : >> { %v955_v57 = vsel %vm323_vm8, %v952_v53, %v954_v54  ;;  %v956_v0 = vsel %vm323_vm8, %v954_v54, %v952_v53 }
 0x6c4   : >> { %v957_v9 = vmul.f32 %v956_v0, %v2452_v62  ;;  %v958_v25 = vmul.f32 %v955_v57, %v2457_v63 }
 0x6c6   : >> { %1033 = vmatpush.msra.mxu0 %v957_v9  ;;  %1053 = vmatpush.msra.mxu1 %v958_v25 }
 0x6c7   : >> { %1788 = vmatmul.msk.f32.vlgmr.msra.gmra.mxu0 %vm414_vm9, %v1786_v22  ;;  %1790 = vmatmul.msk.f32.vlgmr.msra.gmra.mxu1 %vm414_vm9, %v1786_v22 }
 0x6c8   : >> { %1802 = vmatpush.msk.msrb.mxu0 %vm418_vm0, %v2012_v24  ;;  %1804 = vmatpush.msk.msrb.mxu1 %vm418_vm0, %v2012_v24 }
 0x744   : >> { %v1035_v23 = vpop.f32.mrf.mxu0  ;;  %v1055_v2 = vpop.f32.mrf.mxu1 }
 0x745   : >> { %v1058_v30 = vmax.f32 %v1035_v23, 0.0  ;;  %v1059_v33 = vmax.f32 %v1055_v2, 0.0 }
 0x747   : >> { %1112 = vrot.lane.b32.xlu1 %v1058_v30, %s2004_s16  ;;  %1120 = vrot.lane.b32.xlu2 %v1058_v30, %s2005_s25 }
 0x748   : >> { %1122 = vrot.lane.b32.xlu0 %v1059_v33, %s2005_s25 }
 0x74f   : >> { %1106 = vrot.lane.b32.xlu1 %v1059_v33, %s2006_s26  ;;  %1114 = vrot.lane.b32.xlu2 %v1059_v33, %s2004_s16 }
 0x750   : >> { %1104 = vrot.lane.b32.xlu0 %v1058_v30, %s2006_s26 }
 0x757   : >> { %1088 = vrot.lane.b32.xlu1 %v1058_v30, %s2008_s29  ;;  %1096 = vrot.lane.b32.xlu2 %v1058_v30, %s2007_s28 }
 0x758   : >> { %1098 = vrot.lane.b32.xlu0 %v1059_v33, %s2007_s28 }
 0x75f   : >> { %1082 = vrot.lane.b32.xlu1 %v1059_v33, %s2009_s30  ;;  %1090 = vrot.lane.b32.xlu2 %v1059_v33, %s2008_s29 }
 0x760   : >> { %1080 = vrot.lane.b32.xlu0 %v1058_v30, %s2009_s30 }
 0x767   : >> { %1064 = vrot.lane.b32.xlu1 %v1058_v30, %s2011_s10  ;;  %1072 = vrot.lane.b32.xlu2 %v1058_v30, %s2010_s9 }
 0x768   : >> { %1074 = vrot.lane.b32.xlu0 %v1059_v33, %s2010_s9 }
 0x76f   : >> { %1066 = vrot.lane.b32.xlu2 %v1059_v33, %s2011_s10 }
 0x7a1   : >> { %v1121_v5 = vpop.permute.xlu2 %1120 }
 0x7a9   : >> { %v1115_v6 = vpop.permute.xlu2 %1114 }
 0x7b1   : >> { %v1097_v40 = vpop.permute.xlu2 %1096 }
 0x7b9   : >> { %v1113_v28 = vpop.permute.xlu1 %1112  ;;  %v1091_v22 = vpop.permute.xlu2 %1090 }
 0x7ba   : >> { %v1123_v29 = vpop.permute.xlu0 %1122  ;;  %v1116_v34 = vsel %vm394_vm2, %v1113_v28, %v1115_v6  ;;  %v1117_v38 = vsel %vm394_vm2, %v1115_v6, %v1113_v28 }
 0x7bb   : >> { %v1124_v37 = vsel %vm406_vm1, %v1121_v5, %v1123_v29  ;;  %v1125_v39 = vsel %vm406_vm1, %v1123_v29, %v1121_v5  ;;  %v1118_v53 = vmul.f32 %v2355_v41, %v1116_v34  ;;  %v1119_v54 = vmul.f32 %v2360_v42, %v1117_v38 }
 0x7bc   : >> { %v1126_v47 = vmul.f32 %v2337_v31, %v1124_v37  ;;  %v1127_v48 = vmul.f32 %v2342_v32, %v1125_v39 }
 0x7be   : >> { %1138 = vmatpush.msra.mxu2 %v1126_v47  ;;  %1158 = vmatpush.msra.mxu3 %v1127_v48 }
 0x7c0   : >> { %1139 = vmatpush.msra.mxu2 %v1118_v53  ;;  %1159 = vmatpush.msra.mxu3 %v1119_v54 }
 0x7c1   : >> { %v1107_v57 = vpop.permute.xlu1 %1106  ;;  %v1073_v28 = vpop.permute.xlu2 %1072 }
 0x7c2   : >> { %v1105_v0 = vpop.permute.xlu0 %1104 }
 0x7c3   : >> { %v1108_v9 = vsel %vm382_vm3, %v1105_v0, %v1107_v57  ;;  %v1109_v25 = vsel %vm382_vm3, %v1107_v57, %v1105_v0  ;;  %v1794_v0 = vld [vmem:[%s2462_s13 + $0x28] sm:$0xff] }
 0x7c4   : >> { %v1110_v31 = vmul.f32 %v2371_v49, %v1108_v9  ;;  %v1111_v32 = vmul.f32 %v2376_v52, %v1109_v25 }
 0x7c6   : >> { %1140 = vmatpush.msra.mxu2 %v1110_v31  ;;  %1160 = vmatpush.msra.mxu3 %v1111_v32 }
 0x7c9   : >> { %v1089_v41 = vpop.permute.xlu1 %1088 }
 0x7ca   : >> { %v1099_v42 = vpop.permute.xlu0 %1098  ;;  %v1092_v49 = vsel %vm358_vm5, %v1089_v41, %v1091_v22  ;;  %v1093_v52 = vsel %vm358_vm5, %v1091_v22, %v1089_v41  ;;  %v2925_v22 = vld [vmem:[%s3248_s2 + $0x80] sm:$0xff] }
 0x7cb   : >> { %v1100_v23 = vsel %vm370_vm4, %v1097_v40, %v1099_v42  ;;  %v1101_v2 = vsel %vm370_vm4, %v1099_v42, %v1097_v40  ;;  %v1094_v29 = vmul.f32 %v2403_v8, %v1093_v52  ;;  %v1095_v34 = vmul.f32 %v2408_v11, %v1092_v49  ;;  %v1067_v11 = vpop.permute.xlu2 %1066  ;;  %v2931_v42 = vld [vmem:[%s3248_s2 + $0x88] sm:$0xff] }
 0x7cc   : >> { %v1102_v5 = vmul.f32 %v2385_v60, %v1100_v23  ;;  %v1103_v6 = vmul.f32 %v2390_v61, %v1101_v2 }
 0x7ce   : >> { %1141 = vmatpush.msra.mxu2 %v1102_v5  ;;  %1161 = vmatpush.msra.mxu3 %v1103_v6 }
 0x7d0   : >> { %1142 = vmatpush.msra.mxu2 %v1058_v30  ;;  %1162 = vmatpush.msra.mxu3 %v1059_v33 }
 0x7d1   : >> { %v1083_v38 = vpop.permute.xlu1 %1082 }
 0x7d2   : >> { %1143 = vmatpush.msra.mxu2 %v1094_v29  ;;  %1163 = vmatpush.msra.mxu3 %v1095_v34  ;;  %v1081_v60 = vpop.permute.xlu0 %1080  ;;  %v2947_v34 = vld [vmem:[%s3248_s2 + $0x78] sm:$0xff] }
 0x7d3   : >> { %v1084_v61 = vsel %vm346_vm6, %v1081_v60, %v1083_v38  ;;  %v1085_v37 = vsel %vm346_vm6, %v1083_v38, %v1081_v60 }
 0x7d4   : >> { %v1086_v39 = vmul.f32 %v2413_v14, %v1085_v37  ;;  %v1087_v40 = vmul.f32 %v2418_v15, %v1084_v61  ;;  %v2957_v37 = vld [vmem:[%s3248_s2 + $0x60] sm:$0xff] }
 0x7d6   : >> { %1144 = vmatpush.msra.mxu2 %v1086_v39  ;;  %1164 = vmatpush.msra.mxu3 %v1087_v40  ;;  %v2963_v40 = vld [vmem:[%s3248_s2 + $0x68] sm:$0xff] }
 0x7d9   : >> { %v1065_v8 = vpop.permute.xlu1 %1064 }
 0x7da   : >> { %v1075_v30 = vpop.permute.xlu0 %1074  ;;  %v1068_v33 = vsel %vm323_vm8, %v1065_v8, %v1067_v11  ;;  %v1069_v47 = vsel %vm323_vm8, %v1067_v11, %v1065_v8 }
 0x7db   : >> { %v1076_v48 = vsel %vm334_vm7, %v1073_v28, %v1075_v30  ;;  %v1077_v14 = vsel %vm334_vm7, %v1075_v30, %v1073_v28  ;;  %v1070_v54 = vmul.f32 %v1069_v47, %v2452_v62  ;;  %v1071_v57 = vmul.f32 %v1068_v33, %v2457_v63  ;;  %v2941_v28 = vld [vmem:[%s3248_s2 + $0x70] sm:$0xff] }
 0x7dc   : >> { %v1078_v15 = vmul.f32 %v2435_v43, %v1077_v14  ;;  %v1079_v53 = vmul.f32 %v2440_v46, %v1076_v48  ;;  %v2973_v14 = vld [vmem:[%s3248_s2 + $0x50] sm:$0xff] }
 0x7de   : >> { %1145 = vmatpush.msra.mxu2 %v1078_v15  ;;  %1165 = vmatpush.msra.mxu3 %v1079_v53  ;;  %v2979_v53 = vld [vmem:[%s3248_s2 + $0x58] sm:$0xff] }
 0x7e0   : >> { %1146 = vmatpush.msra.mxu2 %v1070_v54  ;;  %1166 = vmatpush.msra.mxu3 %v1071_v57 }
 0x7e1   : >> { %1796 = vmatmul.msk.f32.vlgmr.msra.gmra.mxu2 %vm414_vm9, %v1794_v0  ;;  %1798 = vmatmul.msk.f32.vlgmr.msra.gmra.mxu3 %vm414_vm9, %v1794_v0 }
 0x7e2   : >> { %1810 = vmatpush.msk.msrb.mxu2 %vm418_vm0, %v2012_v24  ;;  %1812 = vmatpush.msk.msrb.mxu3 %vm418_vm0, %v2012_v24 }
 0x864   : >> { %v1148_v43 = vpop.f32.mrf.mxu2  ;;  %v1168_v46 = vpop.f32.mrf.mxu3 }
 0x865   : >> { %v1171_v62 = vmul.f32 0.1, %v1148_v43  ;;  %v1172_v9 = vmul.f32 0.1, %v1168_v46 }
 0x867   : >> { %v2881_v63 = vadd.f32 %v1171_v62, %v2715_v55  ;;  %v2884_v25 = vadd.f32 %v1172_v9, %v2718_v56  ;;  %v2991_v9 = vld [vmem:[%s3248_s2 + $0x30] sm:$0xff] }
 0x869   : >> { %1228 = vrot.lane.b32.xlu2 %v2881_v63, %s2004_s16  ;;  %1236 = vrot.lane.b32.xlu0 %v2881_v63, %s2005_s25 }
 0x86a   : >> { %1238 = vrot.lane.b32.xlu1 %v2884_v25, %s2005_s25 }
 0x871   : >> { %1222 = vrot.lane.b32.xlu2 %v2884_v25, %s2006_s26  ;;  %1230 = vrot.lane.b32.xlu0 %v2884_v25, %s2004_s16 }
 0x872   : >> { %1220 = vrot.lane.b32.xlu1 %v2881_v63, %s2006_s26 }
 0x879   : >> { %1204 = vrot.lane.b32.xlu2 %v2881_v63, %s2008_s29  ;;  %1212 = vrot.lane.b32.xlu0 %v2881_v63, %s2007_s28 }
 0x87a   : >> { %1214 = vrot.lane.b32.xlu1 %v2884_v25, %s2007_s28 }
 0x881   : >> { %1198 = vrot.lane.b32.xlu2 %v2884_v25, %s2009_s30  ;;  %1206 = vrot.lane.b32.xlu0 %v2884_v25, %s2008_s29 }
 0x882   : >> { %1196 = vrot.lane.b32.xlu1 %v2881_v63, %s2009_s30 }
 0x889   : >> { %1180 = vrot.lane.b32.xlu2 %v2881_v63, %s2011_s10  ;;  %1188 = vrot.lane.b32.xlu0 %v2881_v63, %s2010_s9 }
 0x88a   : >> { %1190 = vrot.lane.b32.xlu1 %v2884_v25, %s2010_s9 }
 0x891   : >> { %1182 = vrot.lane.b32.xlu0 %v2884_v25, %s2011_s10 }
 0x8c3   : >> { %v1229_v24 = vpop.permute.xlu2 %1228 }
 0x8cb   : >> { %v1223_v2 = vpop.permute.xlu2 %1222 }
 0x8d3   : >> { %v1205_v11 = vpop.permute.xlu2 %1204 }
 0x8db   : >> { %v1237_v55 = vpop.permute.xlu0 %1236  ;;  %v1199_v0 = vpop.permute.xlu2 %1198 }
 0x8dc   : >> { %v1239_v56 = vpop.permute.xlu1 %1238 }
 0x8dd   : >> { %v1240_v31 = vsel %vm406_vm1, %v1237_v55, %v1239_v56  ;;  %v1241_v32 = vsel %vm406_vm1, %v1239_v56, %v1237_v55  ;;  %v2997_v55 = vld [vmem:[%s3248_s2 + $0x38] sm:$0xff] }
 0x8de   : >> { %v1242_v41 = vmul.f32 %v2925_v22, %v1240_v31  ;;  %v1243_v23 = vmul.f32 %v2931_v42, %v1241_v32 }
 0x8e0   : >> { %1254 = vmatpush.msrb.mxu0 %v1242_v41  ;;  %1274 = vmatpush.msrb.mxu1 %v1243_v23  ;;  %v3007_v41 = vld [vmem:[%s3248_s2 + $0x20] sm:$0xff] }
 0x8e3   : >> { %v1231_v5 = vpop.permute.xlu0 %1230 }
 0x8e4   : >> { %v1232_v6 = vsel %vm394_vm2, %v1229_v24, %v1231_v5  ;;  %v1233_v49 = vsel %vm394_vm2, %v1231_v5, %v1229_v24  ;;  %v1221_v52 = vpop.permute.xlu1 %1220 }
 0x8e5   : >> { %v1234_v29 = vmul.f32 %v2941_v28, %v1232_v6  ;;  %v1235_v38 = vmul.f32 %v2947_v34, %v1233_v49  ;;  %v1224_v60 = vsel %vm382_vm3, %v1221_v52, %v1223_v2  ;;  %v1225_v61 = vsel %vm382_vm3, %v1223_v2, %v1221_v52  ;;  %v3013_v2 = vld [vmem:[%s3248_s2 + $0x28] sm:$0xff] }
 0x8e6   : >> { %v1226_v39 = vmul.f32 %v2957_v37, %v1224_v60  ;;  %v1227_v8 = vmul.f32 %v2963_v40, %v1225_v61  ;;  %v3029_v61 = vld [vmem:[%s3248_s2 + $0x18] sm:$0xff] }
 0x8e7   : >> { %1255 = vmatpush.msrb.mxu0 %v1234_v29  ;;  %1275 = vmatpush.msrb.mxu1 %v1235_v38  ;;  %v3023_v38 = vld [vmem:[%s3248_s2 + $0x10] sm:$0xff] }
 0x8e9   : >> { %1256 = vmatpush.msrb.mxu0 %v1226_v39  ;;  %1276 = vmatpush.msrb.mxu1 %v1227_v8  ;;  %v1181_v8 = vpop.permute.xlu2 %1180 }
 0x8eb   : >> { %v1213_v30 = vpop.permute.xlu0 %1212 }
 0x8ec   : >> { %v1215_v33 = vpop.permute.xlu1 %1214 }
 0x8ed   : >> { %v1216_v47 = vsel %vm370_vm4, %v1213_v30, %v1215_v33  ;;  %v1217_v48 = vsel %vm370_vm4, %v1215_v33, %v1213_v30 }
 0x8ee   : >> { %v1218_v15 = vmul.f32 %v2973_v14, %v1216_v47  ;;  %v1219_v54 = vmul.f32 %v2979_v53, %v1217_v48  ;;  %v3039_v47 = vld [vmem:[%s3248_s2] sm:$0xff] }
 0x8f0   : >> { %1257 = vmatpush.msrb.mxu0 %v1218_v15  ;;  %1277 = vmatpush.msrb.mxu1 %v1219_v54  ;;  %v3045_v15 = vld [vmem:[%s3248_s2 + $0x8] sm:$0xff] }
 0x8f2   : >> { %1258 = vmatpush.msrb.mxu0 %v2881_v63  ;;  %1278 = vmatpush.msrb.mxu1 %v2884_v25 }
 0x8f3   : >> { %v1207_v57 = vpop.permute.xlu0 %1206 }
 0x8f4   : >> { %v1208_v43 = vsel %vm358_vm5, %v1205_v11, %v1207_v57  ;;  %v1209_v46 = vsel %vm358_vm5, %v1207_v57, %v1205_v11  ;;  %v1197_v62 = vpop.permute.xlu1 %1196  ;;  %v1801_v57 = vld [vmem:[%s2462_s13 + $0x30] sm:$0xff] }
 0x8f5   : >> { %v1210_v24 = vmul.f32 %v2991_v9, %v1209_v46  ;;  %v1211_v56 = vmul.f32 %v2997_v55, %v1208_v43  ;;  %v1200_v31 = vsel %vm346_vm6, %v1197_v62, %v1199_v0  ;;  %v1201_v32 = vsel %vm346_vm6, %v1199_v0, %v1197_v62 }
 0x8f6   : >> { %v1202_v23 = vmul.f32 %v3007_v41, %v1201_v32  ;;  %v1203_v5 = vmul.f32 %v3013_v2, %v1200_v31 }
 0x8f7   : >> { %1259 = vmatpush.msrb.mxu0 %v1210_v24  ;;  %1279 = vmatpush.msrb.mxu1 %v1211_v56 }
 0x8f9   : >> { %1260 = vmatpush.msrb.mxu0 %v1202_v23  ;;  %1280 = vmatpush.msrb.mxu1 %v1203_v5 }
 0x8fb   : >> { %v1189_v6 = vpop.permute.xlu0 %1188 }
 0x8fc   : >> { %v1191_v49 = vpop.permute.xlu1 %1190 }
 0x8fd   : >> { %v1192_v52 = vsel %vm334_vm7, %v1189_v6, %v1191_v49  ;;  %v1193_v29 = vsel %vm334_vm7, %v1191_v49, %v1189_v6 }
 0x8fe   : >> { %v1194_v60 = vmul.f32 %v3023_v38, %v1193_v29  ;;  %v1195_v39 = vmul.f32 %v3029_v61, %v1192_v52 }
 0x900   : >> { %1261 = vmatpush.msrb.mxu0 %v1194_v60  ;;  %1281 = vmatpush.msrb.mxu1 %v1195_v39 }
 0x903   : >> { %v1183_v11 = vpop.permute.xlu0 %1182 }
 0x904   : >> { %v1184_v30 = vsel %vm323_vm8, %v1181_v8, %v1183_v11  ;;  %v1185_v33 = vsel %vm323_vm8, %v1183_v11, %v1181_v8 }
 0x905   : >> { %v1186_v48 = vmul.f32 %v3039_v47, %v1185_v33  ;;  %v1187_v54 = vmul.f32 %v3045_v15, %v1184_v30 }
 0x907   : >> { %1262 = vmatpush.msrb.mxu0 %v1186_v48  ;;  %1282 = vmatpush.msrb.mxu1 %v1187_v54 }
 0x908   : >> { %1803 = vmatmul.msk.f32.vlgmr.msrb.gmra.mxu0 %vm414_vm9, %v1801_v57  ;;  %1805 = vmatmul.msk.f32.vlgmr.msrb.gmra.mxu1 %vm414_vm9, %v1801_v57 }
 0x985   : >> { %v1264_v0 = vpop.f32.mrf.mxu0  ;;  %v1284_v43 = vpop.f32.mrf.mxu1 }
 0x986   : >> { %v1287_v46 = vmax.f32 %v1264_v0, 0.0  ;;  %v1288_v62 = vmax.f32 %v1284_v43, 0.0 }
 0x988   : >> { %1341 = vrot.lane.b32.xlu0 %v1287_v46, %s2004_s16  ;;  %1349 = vrot.lane.b32.xlu1 %v1287_v46, %s2005_s25 }
 0x989   : >> { %1351 = vrot.lane.b32.xlu2 %v1288_v62, %s2005_s25 }
 0x990   : >> { %1335 = vrot.lane.b32.xlu0 %v1288_v62, %s2006_s26  ;;  %1343 = vrot.lane.b32.xlu1 %v1288_v62, %s2004_s16  ;;  %s1742_s16 = sshll.u32 %s1992_s15, 3  ;;  %s467_s15 = sadd.s32 1, %s1992_s15  }
 0x991   : >> { %1333 = vrot.lane.b32.xlu2 %v1287_v46, %s2006_s26  ;;  %p464_p4 = scmp.ge.s32.totalorder %s467_s15, 8  }
 0x992   : > { %1945 = vset.pattern.permute.xlu0 (%p464_p4), %v1994_v1  ;;  %s3269_s15 = smov (%p464_p4), 127   ;;  %v1465_v10 = vld [vmem:[%s3253_s7 + $0x18] sm:$0xff] (%p464_p4) }
 0x998   : >> { %1317 = vrot.lane.b32.xlu0 %v1287_v46, %s2008_s29  ;;  %1325 = vrot.lane.b32.xlu1 %v1287_v46, %s2007_s28 }
 0x999   : >> { %1327 = vrot.lane.b32.xlu2 %v1288_v62, %s2007_s28  ;;  %s1404_s28 = scalar_lea.vmem %s3251_s5, %s1742_s16 }
 0x9a0   : >> { %1311 = vrot.lane.b32.xlu0 %v1288_v62, %s2009_s30  ;;  %1319 = vrot.lane.b32.xlu1 %v1288_v62, %s2008_s29 }
 0x9a1   : >> { %1309 = vrot.lane.b32.xlu2 %v1287_v46, %s2009_s30 }
 0x9a8   : >> { %1293 = vrot.lane.b32.xlu0 %v1287_v46, %s2011_s10  ;;  %1301 = vrot.lane.b32.xlu1 %v1287_v46, %s2010_s9 }
 0x9a9   : >> { %1303 = vrot.lane.b32.xlu2 %v1288_v62, %s2010_s9  ;;  %s3270_s9 = smov (%p464_p4), 1  }
 0x9b0   : >> { %1295 = vrot.lane.b32.xlu1 %v1288_v62, %s2011_s10  ;;  %s3271_s10 = smov (%p464_p4), 15  }
 0x9e3   : >> { %v1352_v24 = vpop.permute.xlu2 %1351 }
 0x9eb   : >> { %v1334_v5 = vpop.permute.xlu2 %1333 }
 0x9f3   : >> { %v1328_v30 = vpop.permute.xlu2 %1327 }
 0x9fa   : >> { %v1342_v56 = vpop.permute.xlu0 %1341  ;;  %v1350_v31 = vpop.permute.xlu1 %1349 }
 0x9fb   : >> { %v1353_v32 = vsel %vm406_vm1, %v1350_v31, %v1352_v24  ;;  %v1354_v23 = vsel %vm406_vm1, %v1352_v24, %v1350_v31 }
 0x9fc   : >> { %v1355_v6 = vmul.f32 %v2925_v22, %v1353_v32  ;;  %v1356_v49 = vmul.f32 %v2931_v42, %v1354_v23 }
 0x9fe   : >> { %1367 = vmatpush.msrb.mxu2 %v1355_v6  ;;  %1387 = vmatpush.msrb.mxu3 %v1356_v49 }
 0xa02   : >> { %v1336_v52 = vpop.permute.xlu0 %1335  ;;  %v1344_v29 = vpop.permute.xlu1 %1343 }
 0xa03   : >> { %v1337_v60 = vsel %vm382_vm3, %v1334_v5, %v1336_v52  ;;  %v1338_v39 = vsel %vm382_vm3, %v1336_v52, %v1334_v5  ;;  %v1345_v8 = vsel %vm394_vm2, %v1342_v56, %v1344_v29  ;;  %v1346_v11 = vsel %vm394_vm2, %v1344_v29, %v1342_v56 }
 0xa04   : >> { %v1347_v22 = vmul.f32 %v2941_v28, %v1345_v8  ;;  %v1348_v42 = vmul.f32 %v2947_v34, %v1346_v11  ;;  %v1339_v33 = vmul.f32 %v2957_v37, %v1337_v60  ;;  %v1340_v48 = vmul.f32 %v2963_v40, %v1338_v39  ;;  %v1310_v37 = vpop.permute.xlu2 %1309  ;;  %v1809_v11 = vld [vmem:[%s2462_s13 + $0x38] sm:$0xff]  ;;  %s3272_s13 = smov (%p464_p4), 16  }
 0xa06   : >> { %1368 = vmatpush.msrb.mxu2 %v1347_v22  ;;  %1388 = vmatpush.msrb.mxu3 %v1348_v42 }
 0xa08   : >> { %1369 = vmatpush.msrb.mxu2 %v1339_v33  ;;  %1389 = vmatpush.msrb.mxu3 %v1340_v48 }
 0xa0a   : >> { %v1318_v54 = vpop.permute.xlu0 %1317  ;;  %v1326_v57 = vpop.permute.xlu1 %1325 }
 0xa0b   : >> { %v1329_v0 = vsel %vm370_vm4, %v1326_v57, %v1328_v30  ;;  %v1330_v43 = vsel %vm370_vm4, %v1328_v30, %v1326_v57 }
 0xa0c   : >> { %v1331_v28 = vmul.f32 %v2973_v14, %v1329_v0  ;;  %v1332_v34 = vmul.f32 %v2979_v53, %v1330_v43  ;;  %v1304_v5 = vpop.permute.xlu2 %1303 }
 0xa0e   : >> { %1370 = vmatpush.msrb.mxu2 %v1331_v28  ;;  %1390 = vmatpush.msrb.mxu3 %v1332_v34 }
 0xa10   : >> { %1371 = vmatpush.msrb.mxu2 %v1287_v46  ;;  %1391 = vmatpush.msrb.mxu3 %v1288_v62 }
 0xa12   : >> { %v1312_v40 = vpop.permute.xlu0 %1311  ;;  %v1320_v24 = vpop.permute.xlu1 %1319 }
 0xa13   : >> { %v1313_v56 = vsel %vm346_vm6, %v1310_v37, %v1312_v40  ;;  %v1314_v31 = vsel %vm346_vm6, %v1312_v40, %v1310_v37  ;;  %v1321_v32 = vsel %vm358_vm5, %v1318_v54, %v1320_v24  ;;  %v1322_v14 = vsel %vm358_vm5, %v1320_v24, %v1318_v54 }
 0xa14   : >> { %v1323_v53 = vmul.f32 %v2991_v9, %v1322_v14  ;;  %v1324_v23 = vmul.f32 %v2997_v55, %v1321_v32  ;;  %v1315_v46 = vmul.f32 %v3007_v41, %v1314_v31  ;;  %v1316_v62 = vmul.f32 %v3013_v2, %v1313_v56 }
 0xa16   : >> { %1372 = vmatpush.msrb.mxu2 %v1323_v53  ;;  %1392 = vmatpush.msrb.mxu3 %v1324_v23 }
 0xa18   : >> { %1373 = vmatpush.msrb.mxu2 %v1315_v46  ;;  %1393 = vmatpush.msrb.mxu3 %v1316_v62 }
 0xa1a   : >> { %v1302_v6 = vpop.permute.xlu1 %1301  ;;  %v1294_v41 = vpop.permute.xlu0 %1293 }
 0xa1b   : >> { %v1305_v49 = vsel %vm334_vm7, %v1302_v6, %v1304_v5  ;;  %v1306_v52 = vsel %vm334_vm7, %v1304_v5, %v1302_v6 }
 0xa1c   : >> { %v1307_v9 = vmul.f32 %v3023_v38, %v1306_v52  ;;  %v1308_v55 = vmul.f32 %v3029_v61, %v1305_v49 }
 0xa1e   : >> { %1374 = vmatpush.msrb.mxu2 %v1307_v9  ;;  %1394 = vmatpush.msrb.mxu3 %v1308_v55 }
 0xa22   : >> { %v1296_v2 = vpop.permute.xlu1 %1295 }
 0xa23   : >> { %v1297_v29 = vsel %vm323_vm8, %v1294_v41, %v1296_v2  ;;  %v1298_v60 = vsel %vm323_vm8, %v1296_v2, %v1294_v41 }
 0xa24   : >> { %v1299_v39 = vmul.f32 %v3039_v47, %v1298_v60  ;;  %v1300_v8 = vmul.f32 %v3045_v15, %v1297_v29  ;;  %v1405_v47 = vld [vmem:[%s1404_s28] sm:$0xff] }
 0xa26   : >> { %1375 = vmatpush.msrb.mxu2 %v1299_v39  ;;  %1395 = vmatpush.msrb.mxu3 %v1300_v8 }
 0xa27   : >> { %1811 = vmatmul.msk.f32.vlgmr.msrb.gmra.mxu2 %vm414_vm9, %v1809_v11  ;;  %1813 = vmatmul.msk.f32.vlgmr.msrb.gmra.mxu3 %vm414_vm9, %v1809_v11 }
 0xa28   : > { %1841 = vmatpush.msk.msra.mxu2 (%p464_p4), %vm418_vm0, %v2003_v7  ;;  %1851 = vmatpush.msk.msra.mxu3 (%p464_p4), %vm418_vm0, %v2003_v7 }
 0xaaa   : >> { %v1377_v38 = vpop.f32.mrf.mxu2  ;;  %v1397_v61 = vpop.f32.mrf.mxu3 }
 0xaab   : >> { %v1400_v22 = vmul.f32 0.1, %v1377_v38  ;;  %v1401_v42 = vmul.f32 0.1, %v1397_v61 }
 0xaad   : >> { %v1402_v23 = vadd.f32 %v1400_v22, %v2881_v63   ;;  %v1403_v22 = vadd.f32 %v1401_v42, %v2884_v25   ;;  %v1452_v63 = vld [vmem:[%s3252_s6] sm:$0xff] (%p464_p4) }
 0xaae   : > { %1455 = vperm.xlu0 (%p464_p4), %1945, %v1452_v63  }
 0xaaf   : >> { %1425 = vmatpush.msra.mxu0 %v1402_v23  ;;  %1445 = vmatpush.msra.mxu1 %v1403_v22 }
 0xab0   : >> { %1814 = vmatmul.msk.f32.vlgmr.msra.gmra.mxu0 %vm1406_vm10, %v1405_v47  ;;  %1815 = vmatmul.msk.f32.vlgmr.msra.gmra.mxu1 %vm1406_vm10, %v1405_v47 }
 0xab1   : > { %1816 = vmatpush.msk.msra.mxu0 (%p464_p4), %vm418_vm0, %v2003_v7  ;;  %1821 = vmatpush.msk.msra.mxu1 (%p464_p4), %vm418_vm0, %v2003_v7 }
 0xb20   : > { %v1456_v25 = vpop.permute.xlu0 (%p464_p4), %1455 }
 0xb2c   : > { %466 = sbr.rel (!%p464_p4) target bundleno = 416 (0x1a0), region = 105 }
 0xb2d   : >> { %v1427_v15 = vpop.f32.mrf.mxu0  ;;  %v1447_v30 = vpop.f32.mrf.mxu1 }
 0xb2e   : >> { %v1450_v33 = vadd.f32 %v1980_v19, %v1427_v15   ;;  %v1451_v48 = vadd.f32 %v1976_v18, %v1447_v30  }
 0xb30   : >> { %v3267_v18 = vmov %v1451_v48  ;;  %v3268_v19 = vmov %v1450_v33  ;;  %v1459_v1 = vadd.f32 (%p464_p4), %v1456_v25, %v1451_v48 }
 0xb31   : > { %v1458_v18 = vadd.f32 %v1456_v25, %v1450_v33 }
 0xb32   : > { %v1461_v54 = vadd.f32 %v1459_v1, %v2265_v17 }
 0xb33   : > { %v1460_v19 = vadd.f32 %v1458_v18, %v2263_v16 }
 0xb34   : > { %1516 = vrot.lane.b32.xlu2 %v1461_v54, %s1995_s17  ;;  %1524 = vrot.lane.b32.xlu1 %v1461_v54, %s1996_s18 }
 0xb35   : > { %1522 = vrot.lane.b32.xlu0 %v1460_v19, %s1996_s18  ;;  %s3273_s18 = smov 17  }
 0xb3c   : > { %1506 = vrot.lane.b32.xlu2 %v1460_v19, %s1997_s19  ;;  %1514 = vrot.lane.b32.xlu1 %v1460_v19, %s1995_s17 }
 0xb3d   : > { %1508 = vrot.lane.b32.xlu0 %v1461_v54, %s1997_s19 }
 0xb44   : > { %1500 = vrot.lane.b32.xlu2 %v1461_v54, %s3269_s15  ;;  %1498 = vrot.lane.b32.xlu1 %v1460_v19, %s3269_s15 }
 0xb45   : > { %1490 = vrot.lane.b32.xlu0 %v1460_v19, %s3270_s9 }
 0xb4c   : > { %1482 = vrot.lane.b32.xlu2 %v1460_v19, %s3271_s10  ;;  %1492 = vrot.lane.b32.xlu1 %v1461_v54, %s3270_s9 }
 0xb4d   : > { %1484 = vrot.lane.b32.xlu0 %v1461_v54, %s3271_s10 }
 0xb54   : > { %1476 = vrot.lane.b32.xlu2 %v1461_v54, %s3272_s13  ;;  %1474 = vrot.lane.b32.xlu1 %v1460_v19, %s3272_s13 }
 0xb55   : > { %1466 = vrot.lane.b32.xlu0 %v1460_v19, %s3273_s18 }
 0xb5c   : > { %1468 = vrot.lane.b32.xlu1 %v1461_v54, %s3273_s18 }
 0xb8e   : > { %v1517_v7 = vpop.permute.xlu2 %1516 }
 0xb96   : > { %v1507_v57 = vpop.permute.xlu2 %1506 }
 0xb9e   : > { %v1501_v14 = vpop.permute.xlu2 %1500 }
 0xba6   : > { %v1525_v16 = vpop.permute.xlu1 %1524 }
 0xba7   : > { %v1523_v17 = vpop.permute.xlu0 %1522 }
 0xba8   : > { %v1526_v0 = vsel %vm406_vm1, %v1523_v17, %v1525_v16  ;;  %v1527_v43 = vsel %vm406_vm1, %v1525_v16, %v1523_v17 }
 0xba9   : > { %v1528_v28 = vmul.f32 %v2124_v12, %v1526_v0  ;;  %v1529_v34 = vmul.f32 %v2129_v13, %v1527_v43 }
 0xbab   : > { %1549 = vmatpush.msra.mxu0 %v1528_v28  ;;  %1842 = vmatpush.msra.mxu2 %v1528_v28 }
 0xbac   : > { %1578 = vmatpush.msra.mxu1 %v1529_v34  ;;  %1852 = vmatpush.msra.mxu3 %v1529_v34 }
 0xbae   : > { %v1515_v37 = vpop.permute.xlu1 %1514 }
 0xbaf   : > { %v1509_v40 = vpop.permute.xlu0 %1508  ;;  %v1518_v24 = vsel %vm394_vm2, %v1515_v37, %v1517_v7  ;;  %v1519_v56 = vsel %vm394_vm2, %v1517_v7, %v1515_v37 }
 0xbb0   : > { %v1520_v31 = vmul.f32 %v2142_v20, %v1518_v24  ;;  %v1521_v32 = vmul.f32 %v2147_v21, %v1519_v56  ;;  %v1510_v12 = vsel %vm382_vm3, %v1507_v57, %v1509_v40  ;;  %v1511_v13 = vsel %vm382_vm3, %v1509_v40, %v1507_v57 }
 0xbb1   : > { %v1512_v53 = vmul.f32 %v2156_v26, %v1510_v12  ;;  %v1513_v23 = vmul.f32 %v2161_v27, %v1511_v13  ;;  %v1483_v27 = vpop.permute.xlu2 %1482 }
 0xbb2   : > { %1550 = vmatpush.msra.mxu0 %v1520_v31  ;;  %1843 = vmatpush.msra.mxu2 %v1520_v31 }
 0xbb3   : > { %1579 = vmatpush.msra.mxu1 %v1521_v32  ;;  %1853 = vmatpush.msra.mxu3 %v1521_v32 }
 0xbb4   : > { %1551 = vmatpush.msra.mxu0 %v1512_v53  ;;  %1844 = vmatpush.msra.mxu2 %v1512_v53 }
 0xbb5   : > { %1580 = vmatpush.msra.mxu1 %v1513_v23  ;;  %1854 = vmatpush.msra.mxu3 %v1513_v23 }
 0xbb6   : > { %v1499_v20 = vpop.permute.xlu1 %1498 }
 0xbb7   : > { %v1491_v21 = vpop.permute.xlu0 %1490  ;;  %v1502_v46 = vsel %vm370_vm4, %v1499_v20, %v1501_v14  ;;  %v1503_v62 = vsel %vm370_vm4, %v1501_v14, %v1499_v20 }
 0xbb8   : > { %v1504_v5 = vmul.f32 %v2175_v35, %v1502_v46  ;;  %v1505_v26 = vmul.f32 %v2180_v36, %v1503_v62 }
 0xbba   : > { %1552 = vmatpush.msra.mxu0 %v1504_v5  ;;  %1845 = vmatpush.msra.mxu2 %v1504_v5 }
 0xbbb   : > { %1581 = vmatpush.msra.mxu1 %v1505_v26  ;;  %1855 = vmatpush.msra.mxu3 %v1505_v26 }
 0xbbc   : > { %1553 = vmatpush.msra.mxu0 %v1460_v19  ;;  %1846 = vmatpush.msra.mxu2 %v1460_v19 }
 0xbbd   : > { %1582 = vmatpush.msra.mxu1 %v1461_v54  ;;  %1856 = vmatpush.msra.mxu3 %v1461_v54 }
 0xbbe   : > { %v1493_v6 = vpop.permute.xlu1 %1492 }
 0xbbf   : > { %v1485_v49 = vpop.permute.xlu0 %1484  ;;  %v1495_v52 = vsel %vm358_vm5, %v1493_v6, %v1491_v21  ;;  %v1494_v9 = vsel %vm358_vm5, %v1491_v21, %v1493_v6 }
 0xbc0   : > { %v1496_v35 = vmul.f32 %v2195_v44, %v1495_v52  ;;  %v1497_v36 = vmul.f32 %v2200_v45, %v1494_v9  ;;  %v1487_v55 = vsel %vm346_vm6, %v1485_v49, %v1483_v27  ;;  %v1486_v41 = vsel %vm346_vm6, %v1483_v27, %v1485_v49  ;;  %v1477_v44 = vpop.permute.xlu2 %1476 }
 0xbc1   : > { %v1488_v2 = vmul.f32 %v2209_v50, %v1487_v55  ;;  %v1489_v29 = vmul.f32 %v2214_v51, %v1486_v41 }
 0xbc2   : > { %1554 = vmatpush.msra.mxu0 %v1496_v35  ;;  %1847 = vmatpush.msra.mxu2 %v1496_v35 }
 0xbc3   : > { %1583 = vmatpush.msra.mxu1 %v1497_v36  ;;  %1857 = vmatpush.msra.mxu3 %v1497_v36 }
 0xbc4   : > { %1555 = vmatpush.msra.mxu0 %v1488_v2  ;;  %1848 = vmatpush.msra.mxu2 %v1488_v2 }
 0xbc5   : > { %1584 = vmatpush.msra.mxu1 %v1489_v29  ;;  %1858 = vmatpush.msra.mxu3 %v1489_v29 }
 0xbc6   : > { %v1475_v45 = vpop.permute.xlu1 %1474 }
 0xbc7   : > { %v1479_v60 = vsel %vm334_vm7, %v1477_v44, %v1475_v45  ;;  %v1478_v39 = vsel %vm334_vm7, %v1475_v45, %v1477_v44  ;;  %v1467_v51 = vpop.permute.xlu0 %1466 }
 0xbc8   : > { %v1480_v8 = vmul.f32 %v2228_v58, %v1479_v60  ;;  %v1481_v50 = vmul.f32 %v2233_v59, %v1478_v39  ;;  %v1464_v58 = vld [vmem:[%s3253_s7 + $0x10] sm:$0xff]  ;;  %v1462_v59 = vld [vmem:[%s3253_s7] sm:$0xff] }
 0xbca   : > { %1556 = vmatpush.msra.mxu0 %v1480_v8  ;;  %1849 = vmatpush.msra.mxu2 %v1480_v8 }
 0xbcb   : > { %1585 = vmatpush.msra.mxu1 %v1481_v50  ;;  %1859 = vmatpush.msra.mxu3 %v1481_v50 }
 0xbce   : > { %v1469_v11 = vpop.permute.xlu1 %1468 }
 0xbcf   : > { %v1470_v38 = vsel %vm323_vm8, %v1467_v51, %v1469_v11  ;;  %v1471_v61 = vsel %vm323_vm8, %v1469_v11, %v1467_v51 }
 0xbd0   : > { %v1472_v22 = vmul.f32 %v1471_v61, %v2245_v3  ;;  %v1473_v42 = vmul.f32 %v1470_v38, %v2250_v4  ;;  %v1463_v3 = vld [vmem:[%s3253_s7 + $0x8] sm:$0xff] }
 0xbd2   : > { %1557 = vmatpush.msra.mxu0 %v1472_v22  ;;  %1850 = vmatpush.msra.mxu2 %v1472_v22 }
 0xbd3   : > { %1586 = vmatpush.msra.mxu1 %v1473_v42  ;;  %1860 = vmatpush.msra.mxu3 %v1473_v42 }
 0xbd4   : > { %1819 = vmatmul.msk.f32.vlgmr.msra.gmra.mxu2 %vm414_vm9, %v1464_v58  ;;  %1824 = vmatmul.msk.f32.vlgmr.msra.gmra.mxu3 %vm414_vm9, %v1464_v58 }
 0xbd5   : > { %1817 = vmatmul.msk.f32.vlgmr.msra.gmra.mxu0 %vm414_vm9, %v1462_v59  ;;  %1822 = vmatmul.msk.f32.vlgmr.msra.gmra.mxu1 %vm414_vm9, %v1462_v59 }
 0xbdc   : > { %1820 = vmatmul.msk.f32.gmra.mxu2 %vm414_vm9, %v1465_v10  ;;  %1825 = vmatmul.msk.f32.gmra.mxu3 %vm414_vm9, %v1465_v10 }
 0xbdd   : > { %1818 = vmatmul.msk.f32.gmra.mxu0 %vm414_vm9, %v1463_v3  ;;  %1823 = vmatmul.msk.f32.gmra.mxu1 %vm414_vm9, %v1463_v3 }
 0xc52   : > { %v1559_v4 = vpop.f32.mrf.mxu0  ;;  %v1588_v47 = vpop.f32.mrf.mxu1 }
 0xc53   : > { %1600 = vst [vmem:[%s2073_s12] sm:$0xff] %v1559_v4 }
 0xc54   : > { %1601 = vst [vmem:[%s2073_s12 + $0x8] sm:$0xff] %v1588_v47 }
 0xc57   : > { %v1565_v15 = vpop.f32.mrf.mxu2  ;;  %v1594_v30 = vpop.f32.mrf.mxu3 }
 0xc58   : > { %1604 = vst [vmem:[%s2073_s12 + $0x20] sm:$0xff] %v1565_v15 }
 0xc59   : > { %1605 = vst [vmem:[%s2073_s12 + $0x28] sm:$0xff] %v1594_v30 }
 0xc5a   : > { %v1562_v33 = vpop.f32.mrf.mxu0  ;;  %v1591_v48 = vpop.f32.mrf.mxu1 }
 0xc5b   : > { %1602 = vst [vmem:[%s2073_s12 + $0x10] sm:$0xff] %v1562_v33 }
 0xc5c   : > { %1603 = vst [vmem:[%s2073_s12 + $0x18] sm:$0xff] %v1591_v48 }
 0xc5f   : > { %v1568_v63 = vpop.f32.mrf.mxu2  ;;  %v1597_v25 = vpop.f32.mrf.mxu3 }
 0xc60   : > { %1606 = vst [vmem:[%s2073_s12 + $0x30] sm:$0xff] %v1568_v63 }
 0xc61   : > { %1607 = vst [vmem:[%s2073_s12 + $0x38] sm:$0xff] %v1597_v25 }
 0xc62 PF: > { %s18_s27 = sadd.s32 1, %s1972_s27  }
 0xc63   : > { %p15_p5 = scmp.ge.s32.totalorder %s18_s27, 4  }
 0xc65   :  { %17 = sbr.rel (!%p15_p5) target bundleno = 1 (0x1), region = 116 }

</bundles_post_ra>
